<compile_context>
chip_gen: v6e
topology: v6e:2x2x1
jax: 0.10.0
libtpu: 0.0.40
codegen_flags: <defaults>
</compile_context>

<pallas_src>
import functools

import jax
import jax.numpy as jnp
from jax.experimental import pallas as pl
from jax.experimental.pallas import tpu as pltpu

EPS = 1e-5          # torch.nn.BatchNorm3d default
LANE = 128


def _round_up(x, m):
    return ((x + m - 1) // m) * m


def _vmem_budget():
    """Scoped-VMEM budget: ~3/4 of physical, capped at 96 MiB.
    v5e/v6e (128 MiB) -> 96 MiB, v7x (64 MiB) -> 48 MiB; safe fallback 48 MiB."""
    try:
        cap = int(pltpu.get_tpu_info().vmem_capacity_bytes)
    except Exception:
        cap = 64 * 1024 * 1024
    return int(min(cap * 3 // 4, 96 * 1024 * 1024))


def _pick_row_tile(halo, cin, cout, budget):
    """Row tile ~4x halo, shrunk until the estimated per-step VMEM working set
    fits the budget with 2x headroom for compiler temps / pipelining."""
    row_tile = _round_up(4 * halo, LANE)

    def need(rt):
        sr = rt + 2 * halo
        return (2 * cin * sr * 2            # double-buffered bf16 input slab
                + 2 * cout * rt * 2         # double-buffered bf16 output block
                + 2 * sr * 4                # mask blocks (auto-pipelined)
                + cout * rt * 4             # f32 accumulator temp
                + cin * sr * 4              # f32 affine temp (conv2)
                + cin * sr * 2              # bf16 activation temp
                + 2 * 27 * cout * cin * 2   # resident tap weights
                + 4 * cout * LANE * 4)      # sum / sum-of-squares blocks

    while row_tile > LANE and 2 * need(row_tile) > budget:
        row_tile -= LANE
    return max(row_tile, LANE)


# ----------------------------------------------------------------------------
# Kernel 1: fused (optional BN+ReLU of the previous layer) + 3x3x3 conv
#           + per-sample batch-norm statistics
# ----------------------------------------------------------------------------
def _conv_kernel(x_hbm, m_ref, w_ref, scale_ref, shift_ref,      # inputs
                 y_ref, sum_ref, sq_ref,                          # outputs
                 x_slab, sem,                                     # scratch
                 *, row_tile, halo, margin, offsets, apply_affine):
    n = pl.program_id(0)
    rt = pl.program_id(1)
    n_rt = pl.num_programs(1)
    slab_rows = row_tile + 2 * halo
    slot = rt & 1

    # ---- double-buffered halo-slab fetch (manual DMA straight from HBM) ----
    def start_fetch(target_rt, target_slot):
        row0 = target_rt * row_tile + (margin - halo)
        pltpu.make_async_copy(
            x_hbm.at[n, :, pl.ds(row0, slab_rows)],
            x_slab.at[target_slot], sem.at[target_slot]).start()

    @pl.when(rt == 0)                    # prime slot 0 once per sample
    def _():
        start_fetch(0, 0)

    @pl.when(rt + 1 < n_rt)              # prefetch the next tile's slab
    def _():
        start_fetch(rt + 1, (rt + 1) & 1)

    pltpu.make_async_copy(               # wait only on the current slot
        x_hbm.at[n, :, pl.ds(rt * row_tile + (margin - halo), slab_rows)],
        x_slab.at[slot], sem.at[slot]).wait()

    x = x_slab[slot]                     # (Cin, slab_rows) bf16
    m = m_ref[...]                       # (1, slab_rows) f32 validity mask

    # Fused BN+ReLU of the *previous* layer (skipped entirely for conv1, whose
    # padding is already exact zeros).  The mask restores exact zeros at
    # padding rows (relu(shift) != 0) and discards the never-written head/tail
    # margin rows of the previous layer's output (garbage/NaN cannot leak:
    # jnp.where selects 0.0 wherever the mask is 0).  All math in f32.
    if apply_affine:
        a32 = x.astype(jnp.float32) * scale_ref[...] + shift_ref[...]
        a32 = jnp.maximum(a32, 0.0)
        a32 = jnp.where(m > 0.5, a32, 0.0)
        a = a32.astype(jnp.bfloat16)
    else:
        a = x

    # 27 per-tap accumulating dots — no (27*Cin, row_tile) im2col temp.  Each
    # tap is a static lane-offset slice of the slab; accumulation stays f32.
    w = w_ref[...]                       # (27, Cout, Cin) bf16
    acc = None
    for t, off in enumerate(offsets):
        part = jnp.dot(w[t], a[:, halo + off: halo + off + row_tile],
                       preferred_element_type=jnp.float32)
        acc = part if acc is None else acc + part

    # Zero non-interior output rows so they never pollute the batch statistics
    # nor the next conv's input.
    out_valid = m[:, halo: halo + row_tile] > 0.5
    out = jnp.where(out_valid, acc, 0.0)

    y_ref[...] = out.astype(y_ref.dtype)

    # ---- per-sample BN statistics: lane-dense (Cout, 128) partial sums -----
    @pl.when(rt == 0)
    def _():
        sum_ref[...] = jnp.zeros_like(sum_ref)
        sq_ref[...] = jnp.zeros_like(sq_ref)

    s_part = jnp.zeros(sum_ref.shape, jnp.float32)
    q_part = jnp.zeros(sq_ref.shape, jnp.float32)
    for c in range(row_tile // LANE):    # lane-aligned chunks: pure VPU adds
        blk = out[:, c * LANE:(c + 1) * LANE]
        s_part = s_part + blk
        q_part = q_part + blk * blk
    sum_ref[...] += s_part
    sq_ref[...] += q_part


def _conv_pass(x_flat, mask_slab, w_taps, scale, shift, *,
               n_batch, cin, cout, row_tile, n_row_tiles, halo, margin,
               offsets, apply_affine, vmem_limit):
    rows_total = x_flat.shape[-1]
    slab_rows = row_tile + 2 * halo
    margin_tiles = margin // row_tile
    kernel = functools.partial(
        _conv_kernel, row_tile=row_tile, halo=halo, margin=margin,
        offsets=offsets, apply_affine=apply_affine)
    return pl.pallas_call(
        kernel,
        out_shape=(
            jax.ShapeDtypeStruct((n_batch, cout, rows_total), jnp.bfloat16),
            jax.ShapeDtypeStruct((n_batch, cout, LANE), jnp.float32),
            jax.ShapeDtypeStruct((n_batch, cout, LANE), jnp.float32),
        ),
        grid_spec=pltpu.PrefetchScalarGridSpec(
            num_scalar_prefetch=0,
            grid=(n_batch, n_row_tiles),
            in_specs=[
                pl.BlockSpec(memory_space=pl.ANY),                       # activations (manual halo DMA)
                pl.BlockSpec((None, 1, slab_rows), lambda n, r: (r, 0, 0)),  # per-tile slab mask (auto)
                pl.BlockSpec((27, cout, cin), lambda n, r: (0, 0, 0)),   # resident tap weights
                pl.BlockSpec((cin, 1), lambda n, r: (0, 0)),             # fused BN scale
                pl.BlockSpec((cin, 1), lambda n, r: (0, 0)),             # fused BN shift
            ],
            out_specs=(
                pl.BlockSpec((None, cout, row_tile),
                             lambda n, r: (n, 0, r + margin_tiles)),
                pl.BlockSpec((None, cout, LANE), lambda n, r: (n, 0, 0)),
                pl.BlockSpec((None, cout, LANE), lambda n, r: (n, 0, 0)),
            ),
            scratch_shapes=[
                pltpu.VMEM((2, cin, slab_rows), jnp.bfloat16),   # double-buffered slab
                pltpu.SemaphoreType.DMA((2,)),
            ],
        ),
        compiler_params=pltpu.CompilerParams(
            dimension_semantics=("parallel", "arbitrary"),
            vmem_limit_bytes=vmem_limit,
        ),
    )(x_flat, mask_slab, w_taps, scale, shift)


# ----------------------------------------------------------------------------
# Kernel 2: final BN (affine) + ReLU, elementwise, channels-major layout
# ----------------------------------------------------------------------------
def _bn_relu_kernel(y_ref, scale_ref, shift_ref, o_ref):
    y = y_ref[...].astype(jnp.float32)
    o_ref[...] = jnp.maximum(y * scale_ref[...] + shift_ref[...], 0.0)


def _bn_relu_pass(y_flat, scale, shift, *, n_batch, cout, row_tile,
                  n_row_tiles, margin_tiles, pp_alloc, vmem_limit):
    return pl.pallas_call(
        _bn_relu_kernel,
        out_shape=jax.ShapeDtypeStruct((n_batch, cout, pp_alloc), jnp.float32),
        grid=(n_batch, n_row_tiles),
        in_specs=[
            pl.BlockSpec((None, cout, row_tile),
                         lambda n, r: (n, 0, r + margin_tiles)),
            pl.BlockSpec((cout, 1), lambda n, r: (0, 0)),
            pl.BlockSpec((cout, 1), lambda n, r: (0, 0)),
        ],
        out_specs=pl.BlockSpec((None, cout, row_tile), lambda n, r: (n, 0, r)),
        compiler_params=pltpu.CompilerParams(
            dimension_semantics=("parallel", "parallel"),
            vmem_limit_bytes=vmem_limit),
    )(y_flat, scale, shift)


# ----------------------------------------------------------------------------
# Glue: BN scalar math, weight reshaping, full forward
# ----------------------------------------------------------------------------
def _bn_scale_shift(ssum, ssq, count, gamma, beta):
    # Training-mode BatchNorm: batch statistics, biased variance.
    s = jnp.sum(ssum, axis=(0, 2))                  # (Cout,)
    q = jnp.sum(ssq, axis=(0, 2))
    mean = s / count
    var = jnp.maximum(q / count - mean * mean, 0.0)  # clamp f32 cancellation
    scale = gamma / jnp.sqrt(var + EPS)
    shift = beta - mean * scale
    return scale.reshape(-1, 1), shift.reshape(-1, 1)


def _w_to_taps(w):
    # torch Conv3d weight (Cout, Cin, 3, 3, 3) -> (27, Cout, Cin), tap order
    # matching the kernel's offsets enumeration (kd, kh, kw).
    cout, cin = w.shape[0], w.shape[1]
    return jnp.transpose(w, (2, 3, 4, 0, 1)).reshape(27, cout, cin).astype(jnp.bfloat16)


@jax.jit
def double_conv_forward(x, params):
    """Pallas DoubleConv forward.  x: (N, Cin, D, H, W) float32 (NCDHW)."""
    n, cin, d, h, w_sp = x.shape
    c1 = params["w1"].shape[0]
    dp, hp, wp = d + 2, h + 2, w_sp + 2
    pp = dp * hp * wp                                # padded volume, flattened
    # halo >= max |tap row offset|; 64-aligned so bf16 slab DMA starts stay
    # 128-byte aligned.
    halo = _round_up(hp * wp + wp + 1, 64)
    budget = _vmem_budget()
    row_tile = _pick_row_tile(halo, max(cin, c1), c1, budget)
    n_row_tiles = -(-pp // row_tile)
    pp_alloc = n_row_tiles * row_tile
    margin_tiles = -(-halo // row_tile)
    margin = margin_tiles * row_tile                 # head/tail margins keep every
    rows_total = pp_alloc + 2 * margin               # halo'd slab DMA in bounds
    slab_rows = row_tile + 2 * halo
    count = float(n * d * h * w_sp)

    # The 3x3x3 stencil as 27 static row offsets of the flattened padded volume.
    offsets = tuple((kd - 1) * hp * wp + (kh - 1) * wp + (kw - 1)
                    for kd in range(3) for kh in range(3) for kw in range(3))

    # --- host-side layout prep (single cheap pass; no NCDHW<->NDHWC transpose)
    xpad = jnp.pad(x, ((0, 0), (0, 0), (1, 1), (1, 1), (1, 1)))
    x_flat = jnp.pad(xpad.reshape(n, cin, pp),
                     ((0, 0), (0, 0), (margin, rows_total - margin - pp))
                     ).astype(jnp.bfloat16)

    # Interior-validity mask, pre-sliced into per-row-tile halo'd slabs so the
    # kernel receives it through a plain auto-pipelined BlockSpec (no manual
    # DMA, no per-step semaphore).
    mask_core = jnp.zeros((dp, hp, wp), jnp.float32)
    mask_core = mask_core.at[1:-1, 1:-1, 1:-1].set(1.0).reshape(pp)
    mask_flat = jnp.pad(mask_core, (margin, rows_total - margin - pp))
    gather = (margin - halo
              + row_tile * jnp.arange(n_row_tiles)[:, None]
              + jnp.arange(slab_rows)[None, :])
    mask_slab = mask_flat[gather].reshape(n_row_tiles, 1, slab_rows)

    w1t = _w_to_taps(params["w1"])
    w2t = _w_to_taps(params["w2"])

    common = dict(n_batch=n, row_tile=row_tile, n_row_tiles=n_row_tiles,
                  halo=halo, margin=margin, offsets=offsets, vmem_limit=budget)

    # --- conv1 (+ batch stats); no fused affine (padding already exact zero) -
    y1, s1, q1 = _conv_pass(
        x_flat, mask_slab, w1t,
        jnp.ones((cin, 1), jnp.float32), jnp.zeros((cin, 1), jnp.float32),
        cin=cin, cout=c1, apply_affine=False, **common)
    sc1, sh1 = _bn_scale_shift(s1, q1, count, params["gamma1"], params["beta1"])

    # --- conv2, with BN1+ReLU fused into its input load ----------------------
    y2, s2, q2 = _conv_pass(
        y1, mask_slab, w2t, sc1, sh1,
        cin=c1, cout=c1, apply_affine=True, **common)
    sc2, sh2 = _bn_scale_shift(s2, q2, count, params["gamma2"], params["beta2"])

    # --- final BN2 + ReLU (second pass is inherent to batch-norm) ------------
    out_flat = _bn_relu_pass(y2, sc2, sh2, n_batch=n, cout=c1,
                             row_tile=row_tile, n_row_tiles=n_row_tiles,
                             margin_tiles=margin_tiles, pp_alloc=pp_alloc,
                             vmem_limit=budget)

    # Output is already channels-major (N, C, rows): just crop the padding.
    out = out_flat[:, :, :pp].reshape(n, c1, dp, hp, wp)
    return out[:, :, 1:-1, 1:-1, 1:-1]


# ----------------------------------------------------------------------------
# Pure-JAX reference (training-mode BN), for the correctness check
# ----------------------------------------------------------------------------
def ref_forward(x, params):
    def conv(v, wgt):
        return jax.lax.conv_general_dilated(
            v, wgt, (1, 1, 1), [(1, 1), (1, 1), (1, 1)],
            dimension_numbers=("NCDHW", "OIDHW", "NCDHW"),
            precision=jax.lax.Precision.HIGHEST)

    def bnrelu(v, gamma, beta):
        mean = jnp.mean(v, axis=(0, 2, 3, 4), keepdims=True)
        var = jnp.var(v, axis=(0, 2, 3, 4), keepdims=True)   # biased
        g = gamma.reshape(1, -1, 1, 1, 1)
        b = beta.reshape(1, -1, 1, 1, 1)
        return jnp.maximum((v - mean) / jnp.sqrt(var + EPS) * g + b, 0.0)

    y = bnrelu(conv(x, params["w1"]), params["gamma1"], params["beta1"])
    return bnrelu(conv(y, params["w2"]), params["gamma2"], params["beta2"])


if __name__ == "__main__":
    N, CIN, COUT, D, H, W = 2, 4, 8, 8, 8, 8

    key = jax.random.PRNGKey(0)
    kx, kw1, kw2 = jax.random.split(key, 3)
    x = jax.random.normal(kx, (N, CIN, D, H, W), jnp.float32)

    # Deterministic params (Conv3d bias=False; BatchNorm3d affine defaults).
    params = {
        "w1": jax.random.normal(kw1, (COUT, CIN, 3, 3, 3), jnp.float32)
              * (2.0 / (CIN * 27)) ** 0.5,
        "w2": jax.random.normal(kw2, (COUT, COUT, 3, 3, 3), jnp.float32)
              * (2.0 / (COUT * 27)) ** 0.5,
        "gamma1": jnp.ones((COUT,), jnp.float32),
        "beta1": jnp.zeros((COUT,), jnp.float32),
        "gamma2": jnp.ones((COUT,), jnp.float32),
        "beta2": jnp.zeros((COUT,), jnp.float32),
    }

    out = jax.block_until_ready(double_conv_forward(x, params))
    assert out.shape == (N, COUT, D, H, W), out.shape

    ref = jax.block_until_ready(ref_forward(x, params))
    err = float(jnp.max(jnp.abs(out - ref)))
    # bf16 activations/weights at the MXU (f32 accumulation) -> ~1e-2-scale
    # error on the BN-normalized outputs vs the f32 HIGHEST-precision reference.
    if err > 5e-2:
        raise AssertionError(f"mismatch vs reference: max abs err = {err}")

    print("KERNEL_OK")
</pallas_src>

<mosaic_0001>
module attributes {stable_mosaic.version = 11 : i64} {
  func.func @_conv_kernel(%arg0: i32, %arg1: i32, %arg2: memref<2x4x2048xbf16, #tpu.memory_space<any>>, %arg3: memref<1x1x768xf32, #tpu.memory_space<vmem>>, %arg4: memref<27x8x4xbf16, #tpu.memory_space<vmem>>, %arg5: memref<4x1xf32, #tpu.memory_space<vmem>>, %arg6: memref<4x1xf32, #tpu.memory_space<vmem>>, %arg7: memref<1x8x512xbf16, #tpu.memory_space<vmem>>, %arg8: memref<1x8x128xf32, #tpu.memory_space<vmem>>, %arg9: memref<1x8x128xf32, #tpu.memory_space<vmem>>, %arg10: memref<2x4x768xbf16, #tpu.memory_space<vmem>>, %arg11: memref<2x!tpu.dma_semaphore, #tpu.memory_space<semaphore_mem>>) attributes {dimension_semantics = [#tpu.dimension_semantics<parallel>, #tpu.dimension_semantics<arbitrary>], iteration_bounds = array<i64: 2, 2>, scalar_prefetch = 0 : i64, scratch_operands = 2 : i64, tpu.core_type = #tpu.core_type<tc>, window_params = [{}, {transform_indices = @transform_1, window_bounds = array<i64: 1, 1, 768>}, {pipeline_mode = #tpu.pipeline_mode<synchronous>, transform_indices = @transform_2, window_bounds = array<i64: 27, 8, 4>}, {pipeline_mode = #tpu.pipeline_mode<synchronous>, transform_indices = @transform_3, window_bounds = array<i64: 4, 1>}, {pipeline_mode = #tpu.pipeline_mode<synchronous>, transform_indices = @transform_4, window_bounds = array<i64: 4, 1>}, {transform_indices = @transform_5, window_bounds = array<i64: 1, 8, 512>}, {transform_indices = @transform_6, window_bounds = array<i64: 1, 8, 128>}, {transform_indices = @transform_7, window_bounds = array<i64: 1, 8, 128>}]} {
    %c1_i32 = arith.constant 1 : i32
    %0 = arith.andi %arg1, %c1_i32 : i32
    %c0_i32 = arith.constant 0 : i32
    %1 = arith.cmpi eq, %arg1, %c0_i32 : i32
    %2 = arith.extui %1 : i1 to i32
    %c0_i32_0 = arith.constant 0 : i32
    %3 = arith.cmpi ne, %2, %c0_i32_0 : i32
    scf.if %3 {
      %c0_i32_60 = arith.constant 0 : i32
      %c0_i32_61 = arith.constant 0 : i32
      %c0_i32_62 = arith.constant 0 : i32
      %c384_i32_63 = arith.constant 384 : i32
      %200 = tpu.memref_slice %arg2[%arg0, %c0_i32_62, %c384_i32_63] : memref<2x4x2048xbf16, #tpu.memory_space<any>> -> memref<1x4x768xbf16, #tpu.memory_space<any>>
      %201 = tpu.memref_squeeze %200 : memref<1x4x768xbf16, #tpu.memory_space<any>> -> memref<4x768xbf16, #tpu.memory_space<any>>
      %c0_i32_64 = arith.constant 0 : i32
      %c0_i32_65 = arith.constant 0 : i32
      %202 = tpu.memref_slice %arg10[%c0_i32_60, %c0_i32_64, %c0_i32_65] : memref<2x4x768xbf16, #tpu.memory_space<vmem>> -> memref<1x4x768xbf16, #tpu.memory_space<vmem>>
      %203 = tpu.memref_squeeze %202 : memref<1x4x768xbf16, #tpu.memory_space<vmem>> -> memref<4x768xbf16, #tpu.memory_space<vmem>>
      %204 = tpu.memref_slice %arg11[%c0_i32_61] : memref<2x!tpu.dma_semaphore, #tpu.memory_space<semaphore_mem>> -> memref<1x!tpu.dma_semaphore, #tpu.memory_space<semaphore_mem>>
      %205 = tpu.memref_squeeze %204 : memref<1x!tpu.dma_semaphore, #tpu.memory_space<semaphore_mem>> -> memref<!tpu.dma_semaphore, #tpu.memory_space<semaphore_mem>>
      tpu.enqueue_dma source(%201 : memref<4x768xbf16, #tpu.memory_space<any>>) target(%203 : memref<4x768xbf16, #tpu.memory_space<vmem>>) target_semaphore(%205 : memref<!tpu.dma_semaphore, #tpu.memory_space<semaphore_mem>>)
    } else {
    }
    %c1_i32_1 = arith.constant 1 : i32
    %4 = arith.addi %arg1, %c1_i32_1 : i32
    %c2_i32 = arith.constant 2 : i32
    %5 = arith.cmpi slt, %4, %c2_i32 : i32
    %6 = arith.extui %5 : i1 to i32
    %c0_i32_2 = arith.constant 0 : i32
    %7 = arith.cmpi ne, %6, %c0_i32_2 : i32
    scf.if %7 {
      %c1_i32_60 = arith.constant 1 : i32
      %200 = arith.addi %arg1, %c1_i32_60 : i32
      %c1_i32_61 = arith.constant 1 : i32
      %201 = arith.addi %arg1, %c1_i32_61 : i32
      %c1_i32_62 = arith.constant 1 : i32
      %202 = arith.andi %201, %c1_i32_62 : i32
      %c512_i32_63 = arith.constant 512 : i32
      %203 = arith.muli %200, %c512_i32_63 : i32
      %c384_i32_64 = arith.constant 384 : i32
      %204 = arith.addi %203, %c384_i32_64 : i32
      %c0_i32_65 = arith.constant 0 : i32
      %205 = tpu.memref_slice %arg2[%arg0, %c0_i32_65, %204] : memref<2x4x2048xbf16, #tpu.memory_space<any>> -> memref<1x4x768xbf16, #tpu.memory_space<any>>
      %206 = tpu.memref_squeeze %205 : memref<1x4x768xbf16, #tpu.memory_space<any>> -> memref<4x768xbf16, #tpu.memory_space<any>>
      %c0_i32_66 = arith.constant 0 : i32
      %c0_i32_67 = arith.constant 0 : i32
      %207 = tpu.memref_slice %arg10[%202, %c0_i32_66, %c0_i32_67] : memref<2x4x768xbf16, #tpu.memory_space<vmem>> -> memref<1x4x768xbf16, #tpu.memory_space<vmem>>
      %208 = tpu.memref_squeeze %207 : memref<1x4x768xbf16, #tpu.memory_space<vmem>> -> memref<4x768xbf16, #tpu.memory_space<vmem>>
      %209 = tpu.memref_slice %arg11[%202] : memref<2x!tpu.dma_semaphore, #tpu.memory_space<semaphore_mem>> -> memref<1x!tpu.dma_semaphore, #tpu.memory_space<semaphore_mem>>
      %210 = tpu.memref_squeeze %209 : memref<1x!tpu.dma_semaphore, #tpu.memory_space<semaphore_mem>> -> memref<!tpu.dma_semaphore, #tpu.memory_space<semaphore_mem>>
      tpu.enqueue_dma source(%206 : memref<4x768xbf16, #tpu.memory_space<any>>) target(%208 : memref<4x768xbf16, #tpu.memory_space<vmem>>) target_semaphore(%210 : memref<!tpu.dma_semaphore, #tpu.memory_space<semaphore_mem>>)
    } else {
    }
    %c512_i32 = arith.constant 512 : i32
    %8 = arith.muli %arg1, %c512_i32 : i32
    %c384_i32 = arith.constant 384 : i32
    %9 = arith.addi %8, %c384_i32 : i32
    %c0_i32_3 = arith.constant 0 : i32
    %10 = tpu.memref_slice %arg2[%arg0, %c0_i32_3, %9] : memref<2x4x2048xbf16, #tpu.memory_space<any>> -> memref<1x4x768xbf16, #tpu.memory_space<any>>
    %11 = tpu.memref_squeeze %10 : memref<1x4x768xbf16, #tpu.memory_space<any>> -> memref<4x768xbf16, #tpu.memory_space<any>>
    %c0_i32_4 = arith.constant 0 : i32
    %c0_i32_5 = arith.constant 0 : i32
    %12 = tpu.memref_slice %arg10[%0, %c0_i32_4, %c0_i32_5] : memref<2x4x768xbf16, #tpu.memory_space<vmem>> -> memref<1x4x768xbf16, #tpu.memory_space<vmem>>
    %13 = tpu.memref_squeeze %12 : memref<1x4x768xbf16, #tpu.memory_space<vmem>> -> memref<4x768xbf16, #tpu.memory_space<vmem>>
    %14 = tpu.memref_slice %arg11[%0] : memref<2x!tpu.dma_semaphore, #tpu.memory_space<semaphore_mem>> -> memref<1x!tpu.dma_semaphore, #tpu.memory_space<semaphore_mem>>
    %15 = tpu.memref_squeeze %14 : memref<1x!tpu.dma_semaphore, #tpu.memory_space<semaphore_mem>> -> memref<!tpu.dma_semaphore, #tpu.memory_space<semaphore_mem>>
    tpu.wait_dma2 semaphore(%15 : memref<!tpu.dma_semaphore, #tpu.memory_space<semaphore_mem>>) src(%11 : memref<4x768xbf16, #tpu.memory_space<any>>) dst(%13 : memref<4x768xbf16, #tpu.memory_space<vmem>>)
    %16 = arith.index_cast %0 : i32 to index
    %c0 = arith.constant 0 : index
    %c0_6 = arith.constant 0 : index
    %17 = vector.load %arg10[%16, %c0, %c0_6] : memref<2x4x768xbf16, #tpu.memory_space<vmem>>, vector<1x4x768xbf16>
    %18 = vector.shape_cast %17 : vector<1x4x768xbf16> to vector<4x768xbf16>
    %c0_7 = arith.constant 0 : index
    %c0_8 = arith.constant 0 : index
    %c0_9 = arith.constant 0 : index
    %19 = vector.load %arg3[%c0_7, %c0_8, %c0_9] : memref<1x1x768xf32, #tpu.memory_space<vmem>>, vector<1x1x768xf32>
    %20 = vector.shape_cast %19 : vector<1x1x768xf32> to vector<1x768xf32>
    %c0_10 = arith.constant 0 : index
    %c0_11 = arith.constant 0 : index
    %c0_12 = arith.constant 0 : index
    %21 = vector.load %arg4[%c0_10, %c0_11, %c0_12] : memref<27x8x4xbf16, #tpu.memory_space<vmem>>, vector<27x8x4xbf16>
    %22 = vector.extract_strided_slice %21 {offsets = [0, 0, 0], sizes = [1, 8, 4], strides = [1, 1, 1]} : vector<27x8x4xbf16> to vector<1x8x4xbf16>
    %23 = vector.shape_cast %22 : vector<1x8x4xbf16> to vector<8x4xbf16>
    %24 = vector.extract_strided_slice %18 {offsets = [0, 17], sizes = [4, 512], strides = [1, 1]} : vector<4x768xbf16> to vector<4x512xbf16>
    %cst = arith.constant dense<0.000000e+00> : vector<8x512xf32>
    %25 = tpu.matmul %23, %24, %cst {dimension_numbers = #tpu.dot_dimension_numbers<[1], [0], [0], [1], [0, 0, 1, 1], [], []>} : vector<8x4xbf16>, vector<4x512xbf16>, vector<8x512xf32> -> vector<8x512xf32>
    %26 = vector.extract_strided_slice %21 {offsets = [1, 0, 0], sizes = [1, 8, 4], strides = [1, 1, 1]} : vector<27x8x4xbf16> to vector<1x8x4xbf16>
    %27 = vector.shape_cast %26 : vector<1x8x4xbf16> to vector<8x4xbf16>
    %28 = vector.extract_strided_slice %18 {offsets = [0, 18], sizes = [4, 512], strides = [1, 1]} : vector<4x768xbf16> to vector<4x512xbf16>
    %cst_13 = arith.constant dense<0.000000e+00> : vector<8x512xf32>
    %29 = tpu.matmul %27, %28, %cst_13 {dimension_numbers = #tpu.dot_dimension_numbers<[1], [0], [0], [1], [0, 0, 1, 1], [], []>} : vector<8x4xbf16>, vector<4x512xbf16>, vector<8x512xf32> -> vector<8x512xf32>
    %30 = arith.addf %25, %29 : vector<8x512xf32>
    %31 = vector.extract_strided_slice %21 {offsets = [2, 0, 0], sizes = [1, 8, 4], strides = [1, 1, 1]} : vector<27x8x4xbf16> to vector<1x8x4xbf16>
    %32 = vector.shape_cast %31 : vector<1x8x4xbf16> to vector<8x4xbf16>
    %33 = vector.extract_strided_slice %18 {offsets = [0, 19], sizes = [4, 512], strides = [1, 1]} : vector<4x768xbf16> to vector<4x512xbf16>
    %cst_14 = arith.constant dense<0.000000e+00> : vector<8x512xf32>
    %34 = tpu.matmul %32, %33, %cst_14 {dimension_numbers = #tpu.dot_dimension_numbers<[1], [0], [0], [1], [0, 0, 1, 1], [], []>} : vector<8x4xbf16>, vector<4x512xbf16>, vector<8x512xf32> -> vector<8x512xf32>
    %35 = arith.addf %30, %34 : vector<8x512xf32>
    %36 = vector.extract_strided_slice %21 {offsets = [3, 0, 0], sizes = [1, 8, 4], strides = [1, 1, 1]} : vector<27x8x4xbf16> to vector<1x8x4xbf16>
    %37 = vector.shape_cast %36 : vector<1x8x4xbf16> to vector<8x4xbf16>
    %38 = vector.extract_strided_slice %18 {offsets = [0, 27], sizes = [4, 512], strides = [1, 1]} : vector<4x768xbf16> to vector<4x512xbf16>
    %cst_15 = arith.constant dense<0.000000e+00> : vector<8x512xf32>
    %39 = tpu.matmul %37, %38, %cst_15 {dimension_numbers = #tpu.dot_dimension_numbers<[1], [0], [0], [1], [0, 0, 1, 1], [], []>} : vector<8x4xbf16>, vector<4x512xbf16>, vector<8x512xf32> -> vector<8x512xf32>
    %40 = arith.addf %35, %39 : vector<8x512xf32>
    %41 = vector.extract_strided_slice %21 {offsets = [4, 0, 0], sizes = [1, 8, 4], strides = [1, 1, 1]} : vector<27x8x4xbf16> to vector<1x8x4xbf16>
    %42 = vector.shape_cast %41 : vector<1x8x4xbf16> to vector<8x4xbf16>
    %43 = vector.extract_strided_slice %18 {offsets = [0, 28], sizes = [4, 512], strides = [1, 1]} : vector<4x768xbf16> to vector<4x512xbf16>
    %cst_16 = arith.constant dense<0.000000e+00> : vector<8x512xf32>
    %44 = tpu.matmul %42, %43, %cst_16 {dimension_numbers = #tpu.dot_dimension_numbers<[1], [0], [0], [1], [0, 0, 1, 1], [], []>} : vector<8x4xbf16>, vector<4x512xbf16>, vector<8x512xf32> -> vector<8x512xf32>
    %45 = arith.addf %40, %44 : vector<8x512xf32>
    %46 = vector.extract_strided_slice %21 {offsets = [5, 0, 0], sizes = [1, 8, 4], strides = [1, 1, 1]} : vector<27x8x4xbf16> to vector<1x8x4xbf16>
    %47 = vector.shape_cast %46 : vector<1x8x4xbf16> to vector<8x4xbf16>
    %48 = vector.extract_strided_slice %18 {offsets = [0, 29], sizes = [4, 512], strides = [1, 1]} : vector<4x768xbf16> to vector<4x512xbf16>
    %cst_17 = arith.constant dense<0.000000e+00> : vector<8x512xf32>
    %49 = tpu.matmul %47, %48, %cst_17 {dimension_numbers = #tpu.dot_dimension_numbers<[1], [0], [0], [1], [0, 0, 1, 1], [], []>} : vector<8x4xbf16>, vector<4x512xbf16>, vector<8x512xf32> -> vector<8x512xf32>
    %50 = arith.addf %45, %49 : vector<8x512xf32>
    %51 = vector.extract_strided_slice %21 {offsets = [6, 0, 0], sizes = [1, 8, 4], strides = [1, 1, 1]} : vector<27x8x4xbf16> to vector<1x8x4xbf16>
    %52 = vector.shape_cast %51 : vector<1x8x4xbf16> to vector<8x4xbf16>
    %53 = vector.extract_strided_slice %18 {offsets = [0, 37], sizes = [4, 512], strides = [1, 1]} : vector<4x768xbf16> to vector<4x512xbf16>
    %cst_18 = arith.constant dense<0.000000e+00> : vector<8x512xf32>
    %54 = tpu.matmul %52, %53, %cst_18 {dimension_numbers = #tpu.dot_dimension_numbers<[1], [0], [0], [1], [0, 0, 1, 1], [], []>} : vector<8x4xbf16>, vector<4x512xbf16>, vector<8x512xf32> -> vector<8x512xf32>
    %55 = arith.addf %50, %54 : vector<8x512xf32>
    %56 = vector.extract_strided_slice %21 {offsets = [7, 0, 0], sizes = [1, 8, 4], strides = [1, 1, 1]} : vector<27x8x4xbf16> to vector<1x8x4xbf16>
    %57 = vector.shape_cast %56 : vector<1x8x4xbf16> to vector<8x4xbf16>
    %58 = vector.extract_strided_slice %18 {offsets = [0, 38], sizes = [4, 512], strides = [1, 1]} : vector<4x768xbf16> to vector<4x512xbf16>
    %cst_19 = arith.constant dense<0.000000e+00> : vector<8x512xf32>
    %59 = tpu.matmul %57, %58, %cst_19 {dimension_numbers = #tpu.dot_dimension_numbers<[1], [0], [0], [1], [0, 0, 1, 1], [], []>} : vector<8x4xbf16>, vector<4x512xbf16>, vector<8x512xf32> -> vector<8x512xf32>
    %60 = arith.addf %55, %59 : vector<8x512xf32>
    %61 = vector.extract_strided_slice %21 {offsets = [8, 0, 0], sizes = [1, 8, 4], strides = [1, 1, 1]} : vector<27x8x4xbf16> to vector<1x8x4xbf16>
    %62 = vector.shape_cast %61 : vector<1x8x4xbf16> to vector<8x4xbf16>
    %63 = vector.extract_strided_slice %18 {offsets = [0, 39], sizes = [4, 512], strides = [1, 1]} : vector<4x768xbf16> to vector<4x512xbf16>
    %cst_20 = arith.constant dense<0.000000e+00> : vector<8x512xf32>
    %64 = tpu.matmul %62, %63, %cst_20 {dimension_numbers = #tpu.dot_dimension_numbers<[1], [0], [0], [1], [0, 0, 1, 1], [], []>} : vector<8x4xbf16>, vector<4x512xbf16>, vector<8x512xf32> -> vector<8x512xf32>
    %65 = arith.addf %60, %64 : vector<8x512xf32>
    %66 = vector.extract_strided_slice %21 {offsets = [9, 0, 0], sizes = [1, 8, 4], strides = [1, 1, 1]} : vector<27x8x4xbf16> to vector<1x8x4xbf16>
    %67 = vector.shape_cast %66 : vector<1x8x4xbf16> to vector<8x4xbf16>
    %68 = vector.extract_strided_slice %18 {offsets = [0, 117], sizes = [4, 512], strides = [1, 1]} : vector<4x768xbf16> to vector<4x512xbf16>
    %cst_21 = arith.constant dense<0.000000e+00> : vector<8x512xf32>
    %69 = tpu.matmul %67, %68, %cst_21 {dimension_numbers = #tpu.dot_dimension_numbers<[1], [0], [0], [1], [0, 0, 1, 1], [], []>} : vector<8x4xbf16>, vector<4x512xbf16>, vector<8x512xf32> -> vector<8x512xf32>
    %70 = arith.addf %65, %69 : vector<8x512xf32>
    %71 = vector.extract_strided_slice %21 {offsets = [10, 0, 0], sizes = [1, 8, 4], strides = [1, 1, 1]} : vector<27x8x4xbf16> to vector<1x8x4xbf16>
    %72 = vector.shape_cast %71 : vector<1x8x4xbf16> to vector<8x4xbf16>
    %73 = vector.extract_strided_slice %18 {offsets = [0, 118], sizes = [4, 512], strides = [1, 1]} : vector<4x768xbf16> to vector<4x512xbf16>
    %cst_22 = arith.constant dense<0.000000e+00> : vector<8x512xf32>
    %74 = tpu.matmul %72, %73, %cst_22 {dimension_numbers = #tpu.dot_dimension_numbers<[1], [0], [0], [1], [0, 0, 1, 1], [], []>} : vector<8x4xbf16>, vector<4x512xbf16>, vector<8x512xf32> -> vector<8x512xf32>
    %75 = arith.addf %70, %74 : vector<8x512xf32>
    %76 = vector.extract_strided_slice %21 {offsets = [11, 0, 0], sizes = [1, 8, 4], strides = [1, 1, 1]} : vector<27x8x4xbf16> to vector<1x8x4xbf16>
    %77 = vector.shape_cast %76 : vector<1x8x4xbf16> to vector<8x4xbf16>
    %78 = vector.extract_strided_slice %18 {offsets = [0, 119], sizes = [4, 512], strides = [1, 1]} : vector<4x768xbf16> to vector<4x512xbf16>
    %cst_23 = arith.constant dense<0.000000e+00> : vector<8x512xf32>
    %79 = tpu.matmul %77, %78, %cst_23 {dimension_numbers = #tpu.dot_dimension_numbers<[1], [0], [0], [1], [0, 0, 1, 1], [], []>} : vector<8x4xbf16>, vector<4x512xbf16>, vector<8x512xf32> -> vector<8x512xf32>
    %80 = arith.addf %75, %79 : vector<8x512xf32>
    %81 = vector.extract_strided_slice %21 {offsets = [12, 0, 0], sizes = [1, 8, 4], strides = [1, 1, 1]} : vector<27x8x4xbf16> to vector<1x8x4xbf16>
    %82 = vector.shape_cast %81 : vector<1x8x4xbf16> to vector<8x4xbf16>
    %83 = vector.extract_strided_slice %18 {offsets = [0, 127], sizes = [4, 512], strides = [1, 1]} : vector<4x768xbf16> to vector<4x512xbf16>
    %cst_24 = arith.constant dense<0.000000e+00> : vector<8x512xf32>
    %84 = tpu.matmul %82, %83, %cst_24 {dimension_numbers = #tpu.dot_dimension_numbers<[1], [0], [0], [1], [0, 0, 1, 1], [], []>} : vector<8x4xbf16>, vector<4x512xbf16>, vector<8x512xf32> -> vector<8x512xf32>
    %85 = arith.addf %80, %84 : vector<8x512xf32>
    %86 = vector.extract_strided_slice %21 {offsets = [13, 0, 0], sizes = [1, 8, 4], strides = [1, 1, 1]} : vector<27x8x4xbf16> to vector<1x8x4xbf16>
    %87 = vector.shape_cast %86 : vector<1x8x4xbf16> to vector<8x4xbf16>
    %88 = vector.extract_strided_slice %18 {offsets = [0, 128], sizes = [4, 512], strides = [1, 1]} : vector<4x768xbf16> to vector<4x512xbf16>
    %cst_25 = arith.constant dense<0.000000e+00> : vector<8x512xf32>
    %89 = tpu.matmul %87, %88, %cst_25 {dimension_numbers = #tpu.dot_dimension_numbers<[1], [0], [0], [1], [0, 0, 1, 1], [], []>} : vector<8x4xbf16>, vector<4x512xbf16>, vector<8x512xf32> -> vector<8x512xf32>
    %90 = arith.addf %85, %89 : vector<8x512xf32>
    %91 = vector.extract_strided_slice %21 {offsets = [14, 0, 0], sizes = [1, 8, 4], strides = [1, 1, 1]} : vector<27x8x4xbf16> to vector<1x8x4xbf16>
    %92 = vector.shape_cast %91 : vector<1x8x4xbf16> to vector<8x4xbf16>
    %93 = vector.extract_strided_slice %18 {offsets = [0, 129], sizes = [4, 512], strides = [1, 1]} : vector<4x768xbf16> to vector<4x512xbf16>
    %cst_26 = arith.constant dense<0.000000e+00> : vector<8x512xf32>
    %94 = tpu.matmul %92, %93, %cst_26 {dimension_numbers = #tpu.dot_dimension_numbers<[1], [0], [0], [1], [0, 0, 1, 1], [], []>} : vector<8x4xbf16>, vector<4x512xbf16>, vector<8x512xf32> -> vector<8x512xf32>
    %95 = arith.addf %90, %94 : vector<8x512xf32>
    %96 = vector.extract_strided_slice %21 {offsets = [15, 0, 0], sizes = [1, 8, 4], strides = [1, 1, 1]} : vector<27x8x4xbf16> to vector<1x8x4xbf16>
    %97 = vector.shape_cast %96 : vector<1x8x4xbf16> to vector<8x4xbf16>
    %98 = vector.extract_strided_slice %18 {offsets = [0, 137], sizes = [4, 512], strides = [1, 1]} : vector<4x768xbf16> to vector<4x512xbf16>
    %cst_27 = arith.constant dense<0.000000e+00> : vector<8x512xf32>
    %99 = tpu.matmul %97, %98, %cst_27 {dimension_numbers = #tpu.dot_dimension_numbers<[1], [0], [0], [1], [0, 0, 1, 1], [], []>} : vector<8x4xbf16>, vector<4x512xbf16>, vector<8x512xf32> -> vector<8x512xf32>
    %100 = arith.addf %95, %99 : vector<8x512xf32>
    %101 = vector.extract_strided_slice %21 {offsets = [16, 0, 0], sizes = [1, 8, 4], strides = [1, 1, 1]} : vector<27x8x4xbf16> to vector<1x8x4xbf16>
    %102 = vector.shape_cast %101 : vector<1x8x4xbf16> to vector<8x4xbf16>
    %103 = vector.extract_strided_slice %18 {offsets = [0, 138], sizes = [4, 512], strides = [1, 1]} : vector<4x768xbf16> to vector<4x512xbf16>
    %cst_28 = arith.constant dense<0.000000e+00> : vector<8x512xf32>
    %104 = tpu.matmul %102, %103, %cst_28 {dimension_numbers = #tpu.dot_dimension_numbers<[1], [0], [0], [1], [0, 0, 1, 1], [], []>} : vector<8x4xbf16>, vector<4x512xbf16>, vector<8x512xf32> -> vector<8x512xf32>
    %105 = arith.addf %100, %104 : vector<8x512xf32>
    %106 = vector.extract_strided_slice %21 {offsets = [17, 0, 0], sizes = [1, 8, 4], strides = [1, 1, 1]} : vector<27x8x4xbf16> to vector<1x8x4xbf16>
    %107 = vector.shape_cast %106 : vector<1x8x4xbf16> to vector<8x4xbf16>
    %108 = vector.extract_strided_slice %18 {offsets = [0, 139], sizes = [4, 512], strides = [1, 1]} : vector<4x768xbf16> to vector<4x512xbf16>
    %cst_29 = arith.constant dense<0.000000e+00> : vector<8x512xf32>
    %109 = tpu.matmul %107, %108, %cst_29 {dimension_numbers = #tpu.dot_dimension_numbers<[1], [0], [0], [1], [0, 0, 1, 1], [], []>} : vector<8x4xbf16>, vector<4x512xbf16>, vector<8x512xf32> -> vector<8x512xf32>
    %110 = arith.addf %105, %109 : vector<8x512xf32>
    %111 = vector.extract_strided_slice %21 {offsets = [18, 0, 0], sizes = [1, 8, 4], strides = [1, 1, 1]} : vector<27x8x4xbf16> to vector<1x8x4xbf16>
    %112 = vector.shape_cast %111 : vector<1x8x4xbf16> to vector<8x4xbf16>
    %113 = vector.extract_strided_slice %18 {offsets = [0, 217], sizes = [4, 512], strides = [1, 1]} : vector<4x768xbf16> to vector<4x512xbf16>
    %cst_30 = arith.constant dense<0.000000e+00> : vector<8x512xf32>
    %114 = tpu.matmul %112, %113, %cst_30 {dimension_numbers = #tpu.dot_dimension_numbers<[1], [0], [0], [1], [0, 0, 1, 1], [], []>} : vector<8x4xbf16>, vector<4x512xbf16>, vector<8x512xf32> -> vector<8x512xf32>
    %115 = arith.addf %110, %114 : vector<8x512xf32>
    %116 = vector.extract_strided_slice %21 {offsets = [19, 0, 0], sizes = [1, 8, 4], strides = [1, 1, 1]} : vector<27x8x4xbf16> to vector<1x8x4xbf16>
    %117 = vector.shape_cast %116 : vector<1x8x4xbf16> to vector<8x4xbf16>
    %118 = vector.extract_strided_slice %18 {offsets = [0, 218], sizes = [4, 512], strides = [1, 1]} : vector<4x768xbf16> to vector<4x512xbf16>
    %cst_31 = arith.constant dense<0.000000e+00> : vector<8x512xf32>
    %119 = tpu.matmul %117, %118, %cst_31 {dimension_numbers = #tpu.dot_dimension_numbers<[1], [0], [0], [1], [0, 0, 1, 1], [], []>} : vector<8x4xbf16>, vector<4x512xbf16>, vector<8x512xf32> -> vector<8x512xf32>
    %120 = arith.addf %115, %119 : vector<8x512xf32>
    %121 = vector.extract_strided_slice %21 {offsets = [20, 0, 0], sizes = [1, 8, 4], strides = [1, 1, 1]} : vector<27x8x4xbf16> to vector<1x8x4xbf16>
    %122 = vector.shape_cast %121 : vector<1x8x4xbf16> to vector<8x4xbf16>
    %123 = vector.extract_strided_slice %18 {offsets = [0, 219], sizes = [4, 512], strides = [1, 1]} : vector<4x768xbf16> to vector<4x512xbf16>
    %cst_32 = arith.constant dense<0.000000e+00> : vector<8x512xf32>
    %124 = tpu.matmul %122, %123, %cst_32 {dimension_numbers = #tpu.dot_dimension_numbers<[1], [0], [0], [1], [0, 0, 1, 1], [], []>} : vector<8x4xbf16>, vector<4x512xbf16>, vector<8x512xf32> -> vector<8x512xf32>
    %125 = arith.addf %120, %124 : vector<8x512xf32>
    %126 = vector.extract_strided_slice %21 {offsets = [21, 0, 0], sizes = [1, 8, 4], strides = [1, 1, 1]} : vector<27x8x4xbf16> to vector<1x8x4xbf16>
    %127 = vector.shape_cast %126 : vector<1x8x4xbf16> to vector<8x4xbf16>
    %128 = vector.extract_strided_slice %18 {offsets = [0, 227], sizes = [4, 512], strides = [1, 1]} : vector<4x768xbf16> to vector<4x512xbf16>
    %cst_33 = arith.constant dense<0.000000e+00> : vector<8x512xf32>
    %129 = tpu.matmul %127, %128, %cst_33 {dimension_numbers = #tpu.dot_dimension_numbers<[1], [0], [0], [1], [0, 0, 1, 1], [], []>} : vector<8x4xbf16>, vector<4x512xbf16>, vector<8x512xf32> -> vector<8x512xf32>
    %130 = arith.addf %125, %129 : vector<8x512xf32>
    %131 = vector.extract_strided_slice %21 {offsets = [22, 0, 0], sizes = [1, 8, 4], strides = [1, 1, 1]} : vector<27x8x4xbf16> to vector<1x8x4xbf16>
    %132 = vector.shape_cast %131 : vector<1x8x4xbf16> to vector<8x4xbf16>
    %133 = vector.extract_strided_slice %18 {offsets = [0, 228], sizes = [4, 512], strides = [1, 1]} : vector<4x768xbf16> to vector<4x512xbf16>
    %cst_34 = arith.constant dense<0.000000e+00> : vector<8x512xf32>
    %134 = tpu.matmul %132, %133, %cst_34 {dimension_numbers = #tpu.dot_dimension_numbers<[1], [0], [0], [1], [0, 0, 1, 1], [], []>} : vector<8x4xbf16>, vector<4x512xbf16>, vector<8x512xf32> -> vector<8x512xf32>
    %135 = arith.addf %130, %134 : vector<8x512xf32>
    %136 = vector.extract_strided_slice %21 {offsets = [23, 0, 0], sizes = [1, 8, 4], strides = [1, 1, 1]} : vector<27x8x4xbf16> to vector<1x8x4xbf16>
    %137 = vector.shape_cast %136 : vector<1x8x4xbf16> to vector<8x4xbf16>
    %138 = vector.extract_strided_slice %18 {offsets = [0, 229], sizes = [4, 512], strides = [1, 1]} : vector<4x768xbf16> to vector<4x512xbf16>
    %cst_35 = arith.constant dense<0.000000e+00> : vector<8x512xf32>
    %139 = tpu.matmul %137, %138, %cst_35 {dimension_numbers = #tpu.dot_dimension_numbers<[1], [0], [0], [1], [0, 0, 1, 1], [], []>} : vector<8x4xbf16>, vector<4x512xbf16>, vector<8x512xf32> -> vector<8x512xf32>
    %140 = arith.addf %135, %139 : vector<8x512xf32>
    %141 = vector.extract_strided_slice %21 {offsets = [24, 0, 0], sizes = [1, 8, 4], strides = [1, 1, 1]} : vector<27x8x4xbf16> to vector<1x8x4xbf16>
    %142 = vector.shape_cast %141 : vector<1x8x4xbf16> to vector<8x4xbf16>
    %143 = vector.extract_strided_slice %18 {offsets = [0, 237], sizes = [4, 512], strides = [1, 1]} : vector<4x768xbf16> to vector<4x512xbf16>
    %cst_36 = arith.constant dense<0.000000e+00> : vector<8x512xf32>
    %144 = tpu.matmul %142, %143, %cst_36 {dimension_numbers = #tpu.dot_dimension_numbers<[1], [0], [0], [1], [0, 0, 1, 1], [], []>} : vector<8x4xbf16>, vector<4x512xbf16>, vector<8x512xf32> -> vector<8x512xf32>
    %145 = arith.addf %140, %144 : vector<8x512xf32>
    %146 = vector.extract_strided_slice %21 {offsets = [25, 0, 0], sizes = [1, 8, 4], strides = [1, 1, 1]} : vector<27x8x4xbf16> to vector<1x8x4xbf16>
    %147 = vector.shape_cast %146 : vector<1x8x4xbf16> to vector<8x4xbf16>
    %148 = vector.extract_strided_slice %18 {offsets = [0, 238], sizes = [4, 512], strides = [1, 1]} : vector<4x768xbf16> to vector<4x512xbf16>
    %cst_37 = arith.constant dense<0.000000e+00> : vector<8x512xf32>
    %149 = tpu.matmul %147, %148, %cst_37 {dimension_numbers = #tpu.dot_dimension_numbers<[1], [0], [0], [1], [0, 0, 1, 1], [], []>} : vector<8x4xbf16>, vector<4x512xbf16>, vector<8x512xf32> -> vector<8x512xf32>
    %150 = arith.addf %145, %149 : vector<8x512xf32>
    %151 = vector.extract_strided_slice %21 {offsets = [26, 0, 0], sizes = [1, 8, 4], strides = [1, 1, 1]} : vector<27x8x4xbf16> to vector<1x8x4xbf16>
    %152 = vector.shape_cast %151 : vector<1x8x4xbf16> to vector<8x4xbf16>
    %153 = vector.extract_strided_slice %18 {offsets = [0, 239], sizes = [4, 512], strides = [1, 1]} : vector<4x768xbf16> to vector<4x512xbf16>
    %cst_38 = arith.constant dense<0.000000e+00> : vector<8x512xf32>
    %154 = tpu.matmul %152, %153, %cst_38 {dimension_numbers = #tpu.dot_dimension_numbers<[1], [0], [0], [1], [0, 0, 1, 1], [], []>} : vector<8x4xbf16>, vector<4x512xbf16>, vector<8x512xf32> -> vector<8x512xf32>
    %155 = arith.addf %150, %154 : vector<8x512xf32>
    %156 = vector.extract_strided_slice %20 {offsets = [0, 128], sizes = [1, 512], strides = [1, 1]} : vector<1x768xf32> to vector<1x512xf32>
    %cst_39 = arith.constant 5.000000e-01 : f32
    %157 = vector.broadcast %cst_39 : f32 to vector<1x512xf32>
    %158 = arith.cmpf ogt, %156, %157 : vector<1x512xf32>
    %cst_40 = arith.constant 0.000000e+00 : f32
    %159 = vector.shape_cast %158 : vector<1x512xi1> to vector<1x512xi1>
    %160 = vector.broadcast %159 : vector<1x512xi1> to vector<8x512xi1>
    %161 = vector.broadcast %cst_40 : f32 to vector<8x512xf32>
    %162 = arith.select %160, %155, %161 : vector<8x512xi1>, vector<8x512xf32>
    %163 = arith.truncf %162 : vector<8x512xf32> to vector<8x512xbf16>
    %c0_41 = arith.constant 0 : index
    %c0_42 = arith.constant 0 : index
    %c0_43 = arith.constant 0 : index
    %164 = vector.load %arg7[%c0_41, %c0_42, %c0_43] : memref<1x8x512xbf16, #tpu.memory_space<vmem>>, vector<1x8x512xbf16>
    %165 = vector.shape_cast %164 : vector<1x8x512xbf16> to vector<8x512xbf16>
    %166 = vector.shape_cast %163 : vector<8x512xbf16> to vector<1x8x512xbf16>
    tpu.vector_store %arg7[%c0_41, %c0_42, %c0_43], %166 {strides = array<i32>} : memref<1x8x512xbf16, #tpu.memory_space<vmem>>, vector<1x8x512xbf16>,
    %c0_i32_44 = arith.constant 0 : i32
    %167 = arith.cmpi eq, %arg1, %c0_i32_44 : i32
    %168 = arith.extui %167 : i1 to i32
    %c0_i32_45 = arith.constant 0 : i32
    %169 = arith.cmpi ne, %168, %c0_i32_45 : i32
    scf.if %169 {
      %cst_60 = arith.constant 0.000000e+00 : f32
      %200 = vector.broadcast %cst_60 : f32 to vector<8x128xf32>
      %c0_61 = arith.constant 0 : index
      %c0_62 = arith.constant 0 : index
      %c0_63 = arith.constant 0 : index
      %201 = vector.load %arg8[%c0_61, %c0_62, %c0_63] : memref<1x8x128xf32, #tpu.memory_space<vmem>>, vector<1x8x128xf32>
      %202 = vector.shape_cast %201 : vector<1x8x128xf32> to vector<8x128xf32>
      %203 = vector.shape_cast %200 : vector<8x128xf32> to vector<1x8x128xf32>
      tpu.vector_store %arg8[%c0_61, %c0_62, %c0_63], %203 {strides = array<i32>} : memref<1x8x128xf32, #tpu.memory_space<vmem>>, vector<1x8x128xf32>,
      %cst_64 = arith.constant 0.000000e+00 : f32
      %204 = vector.broadcast %cst_64 : f32 to vector<8x128xf32>
      %c0_65 = arith.constant 0 : index
      %c0_66 = arith.constant 0 : index
      %c0_67 = arith.constant 0 : index
      %205 = vector.load %arg9[%c0_65, %c0_66, %c0_67] : memref<1x8x128xf32, #tpu.memory_space<vmem>>, vector<1x8x128xf32>
      %206 = vector.shape_cast %205 : vector<1x8x128xf32> to vector<8x128xf32>
      %207 = vector.shape_cast %204 : vector<8x128xf32> to vector<1x8x128xf32>
      tpu.vector_store %arg9[%c0_65, %c0_66, %c0_67], %207 {strides = array<i32>} : memref<1x8x128xf32, #tpu.memory_space<vmem>>, vector<1x8x128xf32>,
    } else {
    }
    %cst_46 = arith.constant 0.000000e+00 : f32
    %170 = vector.broadcast %cst_46 : f32 to vector<8x128xf32>
    %cst_47 = arith.constant 0.000000e+00 : f32
    %171 = vector.broadcast %cst_47 : f32 to vector<8x128xf32>
    %172 = vector.extract_strided_slice %162 {offsets = [0, 0], sizes = [8, 128], strides = [1, 1]} : vector<8x512xf32> to vector<8x128xf32>
    %173 = arith.addf %170, %172 : vector<8x128xf32>
    %174 = arith.mulf %172, %172 : vector<8x128xf32>
    %175 = arith.addf %171, %174 : vector<8x128xf32>
    %176 = vector.extract_strided_slice %162 {offsets = [0, 128], sizes = [8, 128], strides = [1, 1]} : vector<8x512xf32> to vector<8x128xf32>
    %177 = arith.addf %173, %176 : vector<8x128xf32>
    %178 = arith.mulf %176, %176 : vector<8x128xf32>
    %179 = arith.addf %175, %178 : vector<8x128xf32>
    %180 = vector.extract_strided_slice %162 {offsets = [0, 256], sizes = [8, 128], strides = [1, 1]} : vector<8x512xf32> to vector<8x128xf32>
    %181 = arith.addf %177, %180 : vector<8x128xf32>
    %182 = arith.mulf %180, %180 : vector<8x128xf32>
    %183 = arith.addf %179, %182 : vector<8x128xf32>
    %184 = vector.extract_strided_slice %162 {offsets = [0, 384], sizes = [8, 128], strides = [1, 1]} : vector<8x512xf32> to vector<8x128xf32>
    %185 = arith.addf %181, %184 : vector<8x128xf32>
    %186 = arith.mulf %184, %184 : vector<8x128xf32>
    %187 = arith.addf %183, %186 : vector<8x128xf32>
    %c0_48 = arith.constant 0 : index
    %c0_49 = arith.constant 0 : index
    %c0_50 = arith.constant 0 : index
    %188 = vector.load %arg8[%c0_48, %c0_49, %c0_50] : memref<1x8x128xf32, #tpu.memory_space<vmem>>, vector<1x8x128xf32>
    %189 = vector.shape_cast %188 : vector<1x8x128xf32> to vector<8x128xf32>
    %190 = arith.addf %189, %185 : vector<8x128xf32>
    %c0_51 = arith.constant 0 : index
    %c0_52 = arith.constant 0 : index
    %c0_53 = arith.constant 0 : index
    %191 = vector.load %arg8[%c0_51, %c0_52, %c0_53] : memref<1x8x128xf32, #tpu.memory_space<vmem>>, vector<1x8x128xf32>
    %192 = vector.shape_cast %191 : vector<1x8x128xf32> to vector<8x128xf32>
    %193 = vector.shape_cast %190 : vector<8x128xf32> to vector<1x8x128xf32>
    tpu.vector_store %arg8[%c0_51, %c0_52, %c0_53], %193 {strides = array<i32>} : memref<1x8x128xf32, #tpu.memory_space<vmem>>, vector<1x8x128xf32>,
    %c0_54 = arith.constant 0 : index
    %c0_55 = arith.constant 0 : index
    %c0_56 = arith.constant 0 : index
    %194 = vector.load %arg9[%c0_54, %c0_55, %c0_56] : memref<1x8x128xf32, #tpu.memory_space<vmem>>, vector<1x8x128xf32>
    %195 = vector.shape_cast %194 : vector<1x8x128xf32> to vector<8x128xf32>
    %196 = arith.addf %195, %187 : vector<8x128xf32>
    %c0_57 = arith.constant 0 : index
    %c0_58 = arith.constant 0 : index
    %c0_59 = arith.constant 0 : index
    %197 = vector.load %arg9[%c0_57, %c0_58, %c0_59] : memref<1x8x128xf32, #tpu.memory_space<vmem>>, vector<1x8x128xf32>
    %198 = vector.shape_cast %197 : vector<1x8x128xf32> to vector<8x128xf32>
    %199 = vector.shape_cast %196 : vector<8x128xf32> to vector<1x8x128xf32>
    tpu.vector_store %arg9[%c0_57, %c0_58, %c0_59], %199 {strides = array<i32>} : memref<1x8x128xf32, #tpu.memory_space<vmem>>, vector<1x8x128xf32>,
    return
  }
  func.func @transform_1(%arg0: i32, %arg1: i32) -> (i32, i32, i32) {
    %c0_i32 = arith.constant 0 : i32
    %c0_i32_0 = arith.constant 0 : i32
    %c0_i32_1 = arith.constant 0 : i32
    return %arg1, %c0_i32, %c0_i32_0 : i32, i32, i32
  }
  func.func @transform_2(%arg0: i32, %arg1: i32) -> (i32, i32, i32) {
    %c0_i32 = arith.constant 0 : i32
    %c0_i32_0 = arith.constant 0 : i32
    %c0_i32_1 = arith.constant 0 : i32
    %c0_i32_2 = arith.constant 0 : i32
    return %c0_i32, %c0_i32_0, %c0_i32_1 : i32, i32, i32
  }
  func.func @transform_3(%arg0: i32, %arg1: i32) -> (i32, i32) {
    %c0_i32 = arith.constant 0 : i32
    %c0_i32_0 = arith.constant 0 : i32
    %c0_i32_1 = arith.constant 0 : i32
    return %c0_i32, %c0_i32_0 : i32, i32
  }
  func.func @transform_4(%arg0: i32, %arg1: i32) -> (i32, i32) {
    %c0_i32 = arith.constant 0 : i32
    %c0_i32_0 = arith.constant 0 : i32
    %c0_i32_1 = arith.constant 0 : i32
    return %c0_i32, %c0_i32_0 : i32, i32
  }
  func.func @transform_5(%arg0: i32, %arg1: i32) -> (i32, i32, i32) {
    %c1_i32 = arith.constant 1 : i32
    %0 = arith.addi %arg1, %c1_i32 : i32
    %c0_i32 = arith.constant 0 : i32
    %c0_i32_0 = arith.constant 0 : i32
    return %arg0, %c0_i32, %0 : i32, i32, i32
  }
  func.func @transform_6(%arg0: i32, %arg1: i32) -> (i32, i32, i32) {
    %c0_i32 = arith.constant 0 : i32
    %c0_i32_0 = arith.constant 0 : i32
    %c0_i32_1 = arith.constant 0 : i32
    return %arg0, %c0_i32, %c0_i32_0 : i32, i32, i32
  }
  func.func @transform_7(%arg0: i32, %arg1: i32) -> (i32, i32, i32) {
    %c0_i32 = arith.constant 0 : i32
    %c0_i32_0 = arith.constant 0 : i32
    %c0_i32_1 = arith.constant 0 : i32
    return %arg0, %c0_i32, %c0_i32_0 : i32, i32, i32
  }
}

module attributes {stable_mosaic.version = 11 : i64} {
  func.func @_bn_relu_kernel(%arg0: i32, %arg1: i32, %arg2: memref<1x8x512xbf16, #tpu.memory_space<vmem>>, %arg3: memref<8x1xf32, #tpu.memory_space<vmem>>, %arg4: memref<8x1xf32, #tpu.memory_space<vmem>>, %arg5: memref<1x8x512xf32, #tpu.memory_space<vmem>>) attributes {dimension_semantics = [#tpu.dimension_semantics<parallel>, #tpu.dimension_semantics<parallel>], iteration_bounds = array<i64: 2, 2>, scalar_prefetch = 0 : i64, scratch_operands = 0 : i64, tpu.core_type = #tpu.core_type<tc>, window_params = [{transform_indices = @transform_0, window_bounds = array<i64: 1, 8, 512>}, {pipeline_mode = #tpu.pipeline_mode<synchronous>, transform_indices = @transform_1, window_bounds = array<i64: 8, 1>}, {pipeline_mode = #tpu.pipeline_mode<synchronous>, transform_indices = @transform_2, window_bounds = array<i64: 8, 1>}, {transform_indices = @transform_3, window_bounds = array<i64: 1, 8, 512>}]} {
    %c0 = arith.constant 0 : index
    %c0_0 = arith.constant 0 : index
    %c0_1 = arith.constant 0 : index
    %0 = vector.load %arg2[%c0, %c0_0, %c0_1] : memref<1x8x512xbf16, #tpu.memory_space<vmem>>, vector<1x8x512xbf16>
    %1 = vector.shape_cast %0 : vector<1x8x512xbf16> to vector<8x512xbf16>
    %2 = arith.extf %1 : vector<8x512xbf16> to vector<8x512xf32>
    %c0_2 = arith.constant 0 : index
    %c0_3 = arith.constant 0 : index
    %3 = vector.load %arg3[%c0_2, %c0_3] : memref<8x1xf32, #tpu.memory_space<vmem>>, vector<8x1xf32>
    %4 = vector.broadcast %3 : vector<8x1xf32> to vector<8x512xf32>
    %5 = arith.mulf %2, %4 : vector<8x512xf32>
    %c0_4 = arith.constant 0 : index
    %c0_5 = arith.constant 0 : index
    %6 = vector.load %arg4[%c0_4, %c0_5] : memref<8x1xf32, #tpu.memory_space<vmem>>, vector<8x1xf32>
    %7 = vector.broadcast %6 : vector<8x1xf32> to vector<8x512xf32>
    %8 = arith.addf %5, %7 : vector<8x512xf32>
    %cst = arith.constant 0.000000e+00 : f32
    %9 = vector.broadcast %cst : f32 to vector<8x512xf32>
    %10 = arith.maximumf %8, %9 : vector<8x512xf32>
    %c0_6 = arith.constant 0 : index
    %c0_7 = arith.constant 0 : index
    %c0_8 = arith.constant 0 : index
    %11 = vector.load %arg5[%c0_6, %c0_7, %c0_8] : memref<1x8x512xf32, #tpu.memory_space<vmem>>, vector<1x8x512xf32>
    %12 = vector.shape_cast %11 : vector<1x8x512xf32> to vector<8x512xf32>
    %13 = vector.shape_cast %10 : vector<8x512xf32> to vector<1x8x512xf32>
    tpu.vector_store %arg5[%c0_6, %c0_7, %c0_8], %13 {strides = array<i32>} : memref<1x8x512xf32, #tpu.memory_space<vmem>>, vector<1x8x512xf32>,
    return
  }
  func.func @transform_0(%arg0: i32, %arg1: i32) -> (i32, i32, i32) {
    %c1_i32 = arith.constant 1 : i32
    %0 = arith.addi %arg1, %c1_i32 : i32
    %c0_i32 = arith.constant 0 : i32
    %c0_i32_0 = arith.constant 0 : i32
    return %arg0, %c0_i32, %0 : i32, i32, i32
  }
  func.func @transform_1(%arg0: i32, %arg1: i32) -> (i32, i32) {
    %c0_i32 = arith.constant 0 : i32
    %c0_i32_0 = arith.constant 0 : i32
    %c0_i32_1 = arith.constant 0 : i32
    return %c0_i32, %c0_i32_0 : i32, i32
  }
  func.func @transform_2(%arg0: i32, %arg1: i32) -> (i32, i32) {
    %c0_i32 = arith.constant 0 : i32
    %c0_i32_0 = arith.constant 0 : i32
    %c0_i32_1 = arith.constant 0 : i32
    return %c0_i32, %c0_i32_0 : i32, i32
  }
  func.func @transform_3(%arg0: i32, %arg1: i32) -> (i32, i32, i32) {
    %c0_i32 = arith.constant 0 : i32
    %c0_i32_0 = arith.constant 0 : i32
    return %arg0, %c0_i32, %arg1 : i32, i32, i32
  }
}

module attributes {stable_mosaic.version = 11 : i64} {
  func.func @_conv_kernel(%arg0: i32, %arg1: i32, %arg2: memref<2x8x2048xbf16, #tpu.memory_space<any>>, %arg3: memref<1x1x768xf32, #tpu.memory_space<vmem>>, %arg4: memref<27x8x8xbf16, #tpu.memory_space<vmem>>, %arg5: memref<8x1xf32, #tpu.memory_space<vmem>>, %arg6: memref<8x1xf32, #tpu.memory_space<vmem>>, %arg7: memref<1x8x512xbf16, #tpu.memory_space<vmem>>, %arg8: memref<1x8x128xf32, #tpu.memory_space<vmem>>, %arg9: memref<1x8x128xf32, #tpu.memory_space<vmem>>, %arg10: memref<2x8x768xbf16, #tpu.memory_space<vmem>>, %arg11: memref<2x!tpu.dma_semaphore, #tpu.memory_space<semaphore_mem>>) attributes {dimension_semantics = [#tpu.dimension_semantics<parallel>, #tpu.dimension_semantics<arbitrary>], iteration_bounds = array<i64: 2, 2>, scalar_prefetch = 0 : i64, scratch_operands = 2 : i64, tpu.core_type = #tpu.core_type<tc>, window_params = [{}, {transform_indices = @transform_1, window_bounds = array<i64: 1, 1, 768>}, {pipeline_mode = #tpu.pipeline_mode<synchronous>, transform_indices = @transform_2, window_bounds = array<i64: 27, 8, 8>}, {pipeline_mode = #tpu.pipeline_mode<synchronous>, transform_indices = @transform_3, window_bounds = array<i64: 8, 1>}, {pipeline_mode = #tpu.pipeline_mode<synchronous>, transform_indices = @transform_4, window_bounds = array<i64: 8, 1>}, {transform_indices = @transform_5, window_bounds = array<i64: 1, 8, 512>}, {transform_indices = @transform_6, window_bounds = array<i64: 1, 8, 128>}, {transform_indices = @transform_7, window_bounds = array<i64: 1, 8, 128>}]} {
    %c1_i32 = arith.constant 1 : i32
    %0 = arith.andi %arg1, %c1_i32 : i32
    %c0_i32 = arith.constant 0 : i32
    %1 = arith.cmpi eq, %arg1, %c0_i32 : i32
    %2 = arith.extui %1 : i1 to i32
    %c0_i32_0 = arith.constant 0 : i32
    %3 = arith.cmpi ne, %2, %c0_i32_0 : i32
    scf.if %3 {
      %c0_i32_67 = arith.constant 0 : i32
      %c0_i32_68 = arith.constant 0 : i32
      %c0_i32_69 = arith.constant 0 : i32
      %c384_i32_70 = arith.constant 384 : i32
      %216 = tpu.memref_slice %arg2[%arg0, %c0_i32_69, %c384_i32_70] : memref<2x8x2048xbf16, #tpu.memory_space<any>> -> memref<1x8x768xbf16, #tpu.memory_space<any>>
      %217 = tpu.memref_squeeze %216 : memref<1x8x768xbf16, #tpu.memory_space<any>> -> memref<8x768xbf16, #tpu.memory_space<any>>
      %c0_i32_71 = arith.constant 0 : i32
      %c0_i32_72 = arith.constant 0 : i32
      %218 = tpu.memref_slice %arg10[%c0_i32_67, %c0_i32_71, %c0_i32_72] : memref<2x8x768xbf16, #tpu.memory_space<vmem>> -> memref<1x8x768xbf16, #tpu.memory_space<vmem>>
      %219 = tpu.memref_squeeze %218 : memref<1x8x768xbf16, #tpu.memory_space<vmem>> -> memref<8x768xbf16, #tpu.memory_space<vmem>>
      %220 = tpu.memref_slice %arg11[%c0_i32_68] : memref<2x!tpu.dma_semaphore, #tpu.memory_space<semaphore_mem>> -> memref<1x!tpu.dma_semaphore, #tpu.memory_space<semaphore_mem>>
      %221 = tpu.memref_squeeze %220 : memref<1x!tpu.dma_semaphore, #tpu.memory_space<semaphore_mem>> -> memref<!tpu.dma_semaphore, #tpu.memory_space<semaphore_mem>>
      tpu.enqueue_dma source(%217 : memref<8x768xbf16, #tpu.memory_space<any>>) target(%219 : memref<8x768xbf16, #tpu.memory_space<vmem>>) target_semaphore(%221 : memref<!tpu.dma_semaphore, #tpu.memory_space<semaphore_mem>>)
    } else {
    }
    %c1_i32_1 = arith.constant 1 : i32
    %4 = arith.addi %arg1, %c1_i32_1 : i32
    %c2_i32 = arith.constant 2 : i32
    %5 = arith.cmpi slt, %4, %c2_i32 : i32
    %6 = arith.extui %5 : i1 to i32
    %c0_i32_2 = arith.constant 0 : i32
    %7 = arith.cmpi ne, %6, %c0_i32_2 : i32
    scf.if %7 {
      %c1_i32_67 = arith.constant 1 : i32
      %216 = arith.addi %arg1, %c1_i32_67 : i32
      %c1_i32_68 = arith.constant 1 : i32
      %217 = arith.addi %arg1, %c1_i32_68 : i32
      %c1_i32_69 = arith.constant 1 : i32
      %218 = arith.andi %217, %c1_i32_69 : i32
      %c512_i32_70 = arith.constant 512 : i32
      %219 = arith.muli %216, %c512_i32_70 : i32
      %c384_i32_71 = arith.constant 384 : i32
      %220 = arith.addi %219, %c384_i32_71 : i32
      %c0_i32_72 = arith.constant 0 : i32
      %221 = tpu.memref_slice %arg2[%arg0, %c0_i32_72, %220] : memref<2x8x2048xbf16, #tpu.memory_space<any>> -> memref<1x8x768xbf16, #tpu.memory_space<any>>
      %222 = tpu.memref_squeeze %221 : memref<1x8x768xbf16, #tpu.memory_space<any>> -> memref<8x768xbf16, #tpu.memory_space<any>>
      %c0_i32_73 = arith.constant 0 : i32
      %c0_i32_74 = arith.constant 0 : i32
      %223 = tpu.memref_slice %arg10[%218, %c0_i32_73, %c0_i32_74] : memref<2x8x768xbf16, #tpu.memory_space<vmem>> -> memref<1x8x768xbf16, #tpu.memory_space<vmem>>
      %224 = tpu.memref_squeeze %223 : memref<1x8x768xbf16, #tpu.memory_space<vmem>> -> memref<8x768xbf16, #tpu.memory_space<vmem>>
      %225 = tpu.memref_slice %arg11[%218] : memref<2x!tpu.dma_semaphore, #tpu.memory_space<semaphore_mem>> -> memref<1x!tpu.dma_semaphore, #tpu.memory_space<semaphore_mem>>
      %226 = tpu.memref_squeeze %225 : memref<1x!tpu.dma_semaphore, #tpu.memory_space<semaphore_mem>> -> memref<!tpu.dma_semaphore, #tpu.memory_space<semaphore_mem>>
      tpu.enqueue_dma source(%222 : memref<8x768xbf16, #tpu.memory_space<any>>) target(%224 : memref<8x768xbf16, #tpu.memory_space<vmem>>) target_semaphore(%226 : memref<!tpu.dma_semaphore, #tpu.memory_space<semaphore_mem>>)
    } else {
    }
    %c512_i32 = arith.constant 512 : i32
    %8 = arith.muli %arg1, %c512_i32 : i32
    %c384_i32 = arith.constant 384 : i32
    %9 = arith.addi %8, %c384_i32 : i32
    %c0_i32_3 = arith.constant 0 : i32
    %10 = tpu.memref_slice %arg2[%arg0, %c0_i32_3, %9] : memref<2x8x2048xbf16, #tpu.memory_space<any>> -> memref<1x8x768xbf16, #tpu.memory_space<any>>
    %11 = tpu.memref_squeeze %10 : memref<1x8x768xbf16, #tpu.memory_space<any>> -> memref<8x768xbf16, #tpu.memory_space<any>>
    %c0_i32_4 = arith.constant 0 : i32
    %c0_i32_5 = arith.constant 0 : i32
    %12 = tpu.memref_slice %arg10[%0, %c0_i32_4, %c0_i32_5] : memref<2x8x768xbf16, #tpu.memory_space<vmem>> -> memref<1x8x768xbf16, #tpu.memory_space<vmem>>
    %13 = tpu.memref_squeeze %12 : memref<1x8x768xbf16, #tpu.memory_space<vmem>> -> memref<8x768xbf16, #tpu.memory_space<vmem>>
    %14 = tpu.memref_slice %arg11[%0] : memref<2x!tpu.dma_semaphore, #tpu.memory_space<semaphore_mem>> -> memref<1x!tpu.dma_semaphore, #tpu.memory_space<semaphore_mem>>
    %15 = tpu.memref_squeeze %14 : memref<1x!tpu.dma_semaphore, #tpu.memory_space<semaphore_mem>> -> memref<!tpu.dma_semaphore, #tpu.memory_space<semaphore_mem>>
    tpu.wait_dma2 semaphore(%15 : memref<!tpu.dma_semaphore, #tpu.memory_space<semaphore_mem>>) src(%11 : memref<8x768xbf16, #tpu.memory_space<any>>) dst(%13 : memref<8x768xbf16, #tpu.memory_space<vmem>>)
    %16 = arith.index_cast %0 : i32 to index
    %c0 = arith.constant 0 : index
    %c0_6 = arith.constant 0 : index
    %17 = vector.load %arg10[%16, %c0, %c0_6] : memref<2x8x768xbf16, #tpu.memory_space<vmem>>, vector<1x8x768xbf16>
    %18 = vector.shape_cast %17 : vector<1x8x768xbf16> to vector<8x768xbf16>
    %c0_7 = arith.constant 0 : index
    %c0_8 = arith.constant 0 : index
    %c0_9 = arith.constant 0 : index
    %19 = vector.load %arg3[%c0_7, %c0_8, %c0_9] : memref<1x1x768xf32, #tpu.memory_space<vmem>>, vector<1x1x768xf32>
    %20 = vector.shape_cast %19 : vector<1x1x768xf32> to vector<1x768xf32>
    %21 = arith.extf %18 : vector<8x768xbf16> to vector<8x768xf32>
    %c0_10 = arith.constant 0 : index
    %c0_11 = arith.constant 0 : index
    %22 = vector.load %arg5[%c0_10, %c0_11] : memref<8x1xf32, #tpu.memory_space<vmem>>, vector<8x1xf32>
    %23 = vector.broadcast %22 : vector<8x1xf32> to vector<8x768xf32>
    %24 = arith.mulf %21, %23 : vector<8x768xf32>
    %c0_12 = arith.constant 0 : index
    %c0_13 = arith.constant 0 : index
    %25 = vector.load %arg6[%c0_12, %c0_13] : memref<8x1xf32, #tpu.memory_space<vmem>>, vector<8x1xf32>
    %26 = vector.broadcast %25 : vector<8x1xf32> to vector<8x768xf32>
    %27 = arith.addf %24, %26 : vector<8x768xf32>
    %cst = arith.constant 0.000000e+00 : f32
    %28 = vector.broadcast %cst : f32 to vector<8x768xf32>
    %29 = arith.maximumf %27, %28 : vector<8x768xf32>
    %cst_14 = arith.constant 5.000000e-01 : f32
    %30 = vector.broadcast %cst_14 : f32 to vector<1x768xf32>
    %31 = arith.cmpf ogt, %20, %30 : vector<1x768xf32>
    %cst_15 = arith.constant 0.000000e+00 : f32
    %32 = vector.shape_cast %31 : vector<1x768xi1> to vector<1x768xi1>
    %33 = vector.broadcast %32 : vector<1x768xi1> to vector<8x768xi1>
    %34 = vector.broadcast %cst_15 : f32 to vector<8x768xf32>
    %35 = arith.select %33, %29, %34 : vector<8x768xi1>, vector<8x768xf32>
    %36 = arith.truncf %35 : vector<8x768xf32> to vector<8x768xbf16>
    %c0_16 = arith.constant 0 : index
    %c0_17 = arith.constant 0 : index
    %c0_18 = arith.constant 0 : index
    %37 = vector.load %arg4[%c0_16, %c0_17, %c0_18] : memref<27x8x8xbf16, #tpu.memory_space<vmem>>, vector<27x8x8xbf16>
    %38 = vector.extract_strided_slice %37 {offsets = [0, 0, 0], sizes = [1, 8, 8], strides = [1, 1, 1]} : vector<27x8x8xbf16> to vector<1x8x8xbf16>
    %39 = vector.shape_cast %38 : vector<1x8x8xbf16> to vector<8x8xbf16>
    %40 = vector.extract_strided_slice %36 {offsets = [0, 17], sizes = [8, 512], strides = [1, 1]} : vector<8x768xbf16> to vector<8x512xbf16>
    %cst_19 = arith.constant dense<0.000000e+00> : vector<8x512xf32>
    %41 = tpu.matmul %39, %40, %cst_19 {dimension_numbers = #tpu.dot_dimension_numbers<[1], [0], [0], [1], [0, 0, 1, 1], [], []>} : vector<8x8xbf16>, vector<8x512xbf16>, vector<8x512xf32> -> vector<8x512xf32>
    %42 = vector.extract_strided_slice %37 {offsets = [1, 0, 0], sizes = [1, 8, 8], strides = [1, 1, 1]} : vector<27x8x8xbf16> to vector<1x8x8xbf16>
    %43 = vector.shape_cast %42 : vector<1x8x8xbf16> to vector<8x8xbf16>
    %44 = vector.extract_strided_slice %36 {offsets = [0, 18], sizes = [8, 512], strides = [1, 1]} : vector<8x768xbf16> to vector<8x512xbf16>
    %cst_20 = arith.constant dense<0.000000e+00> : vector<8x512xf32>
    %45 = tpu.matmul %43, %44, %cst_20 {dimension_numbers = #tpu.dot_dimension_numbers<[1], [0], [0], [1], [0, 0, 1, 1], [], []>} : vector<8x8xbf16>, vector<8x512xbf16>, vector<8x512xf32> -> vector<8x512xf32>
    %46 = arith.addf %41, %45 : vector<8x512xf32>
    %47 = vector.extract_strided_slice %37 {offsets = [2, 0, 0], sizes = [1, 8, 8], strides = [1, 1, 1]} : vector<27x8x8xbf16> to vector<1x8x8xbf16>
    %48 = vector.shape_cast %47 : vector<1x8x8xbf16> to vector<8x8xbf16>
    %49 = vector.extract_strided_slice %36 {offsets = [0, 19], sizes = [8, 512], strides = [1, 1]} : vector<8x768xbf16> to vector<8x512xbf16>
    %cst_21 = arith.constant dense<0.000000e+00> : vector<8x512xf32>
    %50 = tpu.matmul %48, %49, %cst_21 {dimension_numbers = #tpu.dot_dimension_numbers<[1], [0], [0], [1], [0, 0, 1, 1], [], []>} : vector<8x8xbf16>, vector<8x512xbf16>, vector<8x512xf32> -> vector<8x512xf32>
    %51 = arith.addf %46, %50 : vector<8x512xf32>
    %52 = vector.extract_strided_slice %37 {offsets = [3, 0, 0], sizes = [1, 8, 8], strides = [1, 1, 1]} : vector<27x8x8xbf16> to vector<1x8x8xbf16>
    %53 = vector.shape_cast %52 : vector<1x8x8xbf16> to vector<8x8xbf16>
    %54 = vector.extract_strided_slice %36 {offsets = [0, 27], sizes = [8, 512], strides = [1, 1]} : vector<8x768xbf16> to vector<8x512xbf16>
    %cst_22 = arith.constant dense<0.000000e+00> : vector<8x512xf32>
    %55 = tpu.matmul %53, %54, %cst_22 {dimension_numbers = #tpu.dot_dimension_numbers<[1], [0], [0], [1], [0, 0, 1, 1], [], []>} : vector<8x8xbf16>, vector<8x512xbf16>, vector<8x512xf32> -> vector<8x512xf32>
    %56 = arith.addf %51, %55 : vector<8x512xf32>
    %57 = vector.extract_strided_slice %37 {offsets = [4, 0, 0], sizes = [1, 8, 8], strides = [1, 1, 1]} : vector<27x8x8xbf16> to vector<1x8x8xbf16>
    %58 = vector.shape_cast %57 : vector<1x8x8xbf16> to vector<8x8xbf16>
    %59 = vector.extract_strided_slice %36 {offsets = [0, 28], sizes = [8, 512], strides = [1, 1]} : vector<8x768xbf16> to vector<8x512xbf16>
    %cst_23 = arith.constant dense<0.000000e+00> : vector<8x512xf32>
    %60 = tpu.matmul %58, %59, %cst_23 {dimension_numbers = #tpu.dot_dimension_numbers<[1], [0], [0], [1], [0, 0, 1, 1], [], []>} : vector<8x8xbf16>, vector<8x512xbf16>, vector<8x512xf32> -> vector<8x512xf32>
    %61 = arith.addf %56, %60 : vector<8x512xf32>
    %62 = vector.extract_strided_slice %37 {offsets = [5, 0, 0], sizes = [1, 8, 8], strides = [1, 1, 1]} : vector<27x8x8xbf16> to vector<1x8x8xbf16>
    %63 = vector.shape_cast %62 : vector<1x8x8xbf16> to vector<8x8xbf16>
    %64 = vector.extract_strided_slice %36 {offsets = [0, 29], sizes = [8, 512], strides = [1, 1]} : vector<8x768xbf16> to vector<8x512xbf16>
    %cst_24 = arith.constant dense<0.000000e+00> : vector<8x512xf32>
    %65 = tpu.matmul %63, %64, %cst_24 {dimension_numbers = #tpu.dot_dimension_numbers<[1], [0], [0], [1], [0, 0, 1, 1], [], []>} : vector<8x8xbf16>, vector<8x512xbf16>, vector<8x512xf32> -> vector<8x512xf32>
    %66 = arith.addf %61, %65 : vector<8x512xf32>
    %67 = vector.extract_strided_slice %37 {offsets = [6, 0, 0], sizes = [1, 8, 8], strides = [1, 1, 1]} : vector<27x8x8xbf16> to vector<1x8x8xbf16>
    %68 = vector.shape_cast %67 : vector<1x8x8xbf16> to vector<8x8xbf16>
    %69 = vector.extract_strided_slice %36 {offsets = [0, 37], sizes = [8, 512], strides = [1, 1]} : vector<8x768xbf16> to vector<8x512xbf16>
    %cst_25 = arith.constant dense<0.000000e+00> : vector<8x512xf32>
    %70 = tpu.matmul %68, %69, %cst_25 {dimension_numbers = #tpu.dot_dimension_numbers<[1], [0], [0], [1], [0, 0, 1, 1], [], []>} : vector<8x8xbf16>, vector<8x512xbf16>, vector<8x512xf32> -> vector<8x512xf32>
    %71 = arith.addf %66, %70 : vector<8x512xf32>
    %72 = vector.extract_strided_slice %37 {offsets = [7, 0, 0], sizes = [1, 8, 8], strides = [1, 1, 1]} : vector<27x8x8xbf16> to vector<1x8x8xbf16>
    %73 = vector.shape_cast %72 : vector<1x8x8xbf16> to vector<8x8xbf16>
    %74 = vector.extract_strided_slice %36 {offsets = [0, 38], sizes = [8, 512], strides = [1, 1]} : vector<8x768xbf16> to vector<8x512xbf16>
    %cst_26 = arith.constant dense<0.000000e+00> : vector<8x512xf32>
    %75 = tpu.matmul %73, %74, %cst_26 {dimension_numbers = #tpu.dot_dimension_numbers<[1], [0], [0], [1], [0, 0, 1, 1], [], []>} : vector<8x8xbf16>, vector<8x512xbf16>, vector<8x512xf32> -> vector<8x512xf32>
    %76 = arith.addf %71, %75 : vector<8x512xf32>
    %77 = vector.extract_strided_slice %37 {offsets = [8, 0, 0], sizes = [1, 8, 8], strides = [1, 1, 1]} : vector<27x8x8xbf16> to vector<1x8x8xbf16>
    %78 = vector.shape_cast %77 : vector<1x8x8xbf16> to vector<8x8xbf16>
    %79 = vector.extract_strided_slice %36 {offsets = [0, 39], sizes = [8, 512], strides = [1, 1]} : vector<8x768xbf16> to vector<8x512xbf16>
    %cst_27 = arith.constant dense<0.000000e+00> : vector<8x512xf32>
    %80 = tpu.matmul %78, %79, %cst_27 {dimension_numbers = #tpu.dot_dimension_numbers<[1], [0], [0], [1], [0, 0, 1, 1], [], []>} : vector<8x8xbf16>, vector<8x512xbf16>, vector<8x512xf32> -> vector<8x512xf32>
    %81 = arith.addf %76, %80 : vector<8x512xf32>
    %82 = vector.extract_strided_slice %37 {offsets = [9, 0, 0], sizes = [1, 8, 8], strides = [1, 1, 1]} : vector<27x8x8xbf16> to vector<1x8x8xbf16>
    %83 = vector.shape_cast %82 : vector<1x8x8xbf16> to vector<8x8xbf16>
    %84 = vector.extract_strided_slice %36 {offsets = [0, 117], sizes = [8, 512], strides = [1, 1]} : vector<8x768xbf16> to vector<8x512xbf16>
    %cst_28 = arith.constant dense<0.000000e+00> : vector<8x512xf32>
    %85 = tpu.matmul %83, %84, %cst_28 {dimension_numbers = #tpu.dot_dimension_numbers<[1], [0], [0], [1], [0, 0, 1, 1], [], []>} : vector<8x8xbf16>, vector<8x512xbf16>, vector<8x512xf32> -> vector<8x512xf32>
    %86 = arith.addf %81, %85 : vector<8x512xf32>
    %87 = vector.extract_strided_slice %37 {offsets = [10, 0, 0], sizes = [1, 8, 8], strides = [1, 1, 1]} : vector<27x8x8xbf16> to vector<1x8x8xbf16>
    %88 = vector.shape_cast %87 : vector<1x8x8xbf16> to vector<8x8xbf16>
    %89 = vector.extract_strided_slice %36 {offsets = [0, 118], sizes = [8, 512], strides = [1, 1]} : vector<8x768xbf16> to vector<8x512xbf16>
    %cst_29 = arith.constant dense<0.000000e+00> : vector<8x512xf32>
    %90 = tpu.matmul %88, %89, %cst_29 {dimension_numbers = #tpu.dot_dimension_numbers<[1], [0], [0], [1], [0, 0, 1, 1], [], []>} : vector<8x8xbf16>, vector<8x512xbf16>, vector<8x512xf32> -> vector<8x512xf32>
    %91 = arith.addf %86, %90 : vector<8x512xf32>
    %92 = vector.extract_strided_slice %37 {offsets = [11, 0, 0], sizes = [1, 8, 8], strides = [1, 1, 1]} : vector<27x8x8xbf16> to vector<1x8x8xbf16>
    %93 = vector.shape_cast %92 : vector<1x8x8xbf16> to vector<8x8xbf16>
    %94 = vector.extract_strided_slice %36 {offsets = [0, 119], sizes = [8, 512], strides = [1, 1]} : vector<8x768xbf16> to vector<8x512xbf16>
    %cst_30 = arith.constant dense<0.000000e+00> : vector<8x512xf32>
    %95 = tpu.matmul %93, %94, %cst_30 {dimension_numbers = #tpu.dot_dimension_numbers<[1], [0], [0], [1], [0, 0, 1, 1], [], []>} : vector<8x8xbf16>, vector<8x512xbf16>, vector<8x512xf32> -> vector<8x512xf32>
    %96 = arith.addf %91, %95 : vector<8x512xf32>
    %97 = vector.extract_strided_slice %37 {offsets = [12, 0, 0], sizes = [1, 8, 8], strides = [1, 1, 1]} : vector<27x8x8xbf16> to vector<1x8x8xbf16>
    %98 = vector.shape_cast %97 : vector<1x8x8xbf16> to vector<8x8xbf16>
    %99 = vector.extract_strided_slice %36 {offsets = [0, 127], sizes = [8, 512], strides = [1, 1]} : vector<8x768xbf16> to vector<8x512xbf16>
    %cst_31 = arith.constant dense<0.000000e+00> : vector<8x512xf32>
    %100 = tpu.matmul %98, %99, %cst_31 {dimension_numbers = #tpu.dot_dimension_numbers<[1], [0], [0], [1], [0, 0, 1, 1], [], []>} : vector<8x8xbf16>, vector<8x512xbf16>, vector<8x512xf32> -> vector<8x512xf32>
    %101 = arith.addf %96, %100 : vector<8x512xf32>
    %102 = vector.extract_strided_slice %37 {offsets = [13, 0, 0], sizes = [1, 8, 8], strides = [1, 1, 1]} : vector<27x8x8xbf16> to vector<1x8x8xbf16>
    %103 = vector.shape_cast %102 : vector<1x8x8xbf16> to vector<8x8xbf16>
    %104 = vector.extract_strided_slice %36 {offsets = [0, 128], sizes = [8, 512], strides = [1, 1]} : vector<8x768xbf16> to vector<8x512xbf16>
    %cst_32 = arith.constant dense<0.000000e+00> : vector<8x512xf32>
    %105 = tpu.matmul %103, %104, %cst_32 {dimension_numbers = #tpu.dot_dimension_numbers<[1], [0], [0], [1], [0, 0, 1, 1], [], []>} : vector<8x8xbf16>, vector<8x512xbf16>, vector<8x512xf32> -> vector<8x512xf32>
    %106 = arith.addf %101, %105 : vector<8x512xf32>
    %107 = vector.extract_strided_slice %37 {offsets = [14, 0, 0], sizes = [1, 8, 8], strides = [1, 1, 1]} : vector<27x8x8xbf16> to vector<1x8x8xbf16>
    %108 = vector.shape_cast %107 : vector<1x8x8xbf16> to vector<8x8xbf16>
    %109 = vector.extract_strided_slice %36 {offsets = [0, 129], sizes = [8, 512], strides = [1, 1]} : vector<8x768xbf16> to vector<8x512xbf16>
    %cst_33 = arith.constant dense<0.000000e+00> : vector<8x512xf32>
    %110 = tpu.matmul %108, %109, %cst_33 {dimension_numbers = #tpu.dot_dimension_numbers<[1], [0], [0], [1], [0, 0, 1, 1], [], []>} : vector<8x8xbf16>, vector<8x512xbf16>, vector<8x512xf32> -> vector<8x512xf32>
    %111 = arith.addf %106, %110 : vector<8x512xf32>
    %112 = vector.extract_strided_slice %37 {offsets = [15, 0, 0], sizes = [1, 8, 8], strides = [1, 1, 1]} : vector<27x8x8xbf16> to vector<1x8x8xbf16>
    %113 = vector.shape_cast %112 : vector<1x8x8xbf16> to vector<8x8xbf16>
    %114 = vector.extract_strided_slice %36 {offsets = [0, 137], sizes = [8, 512], strides = [1, 1]} : vector<8x768xbf16> to vector<8x512xbf16>
    %cst_34 = arith.constant dense<0.000000e+00> : vector<8x512xf32>
    %115 = tpu.matmul %113, %114, %cst_34 {dimension_numbers = #tpu.dot_dimension_numbers<[1], [0], [0], [1], [0, 0, 1, 1], [], []>} : vector<8x8xbf16>, vector<8x512xbf16>, vector<8x512xf32> -> vector<8x512xf32>
    %116 = arith.addf %111, %115 : vector<8x512xf32>
    %117 = vector.extract_strided_slice %37 {offsets = [16, 0, 0], sizes = [1, 8, 8], strides = [1, 1, 1]} : vector<27x8x8xbf16> to vector<1x8x8xbf16>
    %118 = vector.shape_cast %117 : vector<1x8x8xbf16> to vector<8x8xbf16>
    %119 = vector.extract_strided_slice %36 {offsets = [0, 138], sizes = [8, 512], strides = [1, 1]} : vector<8x768xbf16> to vector<8x512xbf16>
    %cst_35 = arith.constant dense<0.000000e+00> : vector<8x512xf32>
    %120 = tpu.matmul %118, %119, %cst_35 {dimension_numbers = #tpu.dot_dimension_numbers<[1], [0], [0], [1], [0, 0, 1, 1], [], []>} : vector<8x8xbf16>, vector<8x512xbf16>, vector<8x512xf32> -> vector<8x512xf32>
    %121 = arith.addf %116, %120 : vector<8x512xf32>
    %122 = vector.extract_strided_slice %37 {offsets = [17, 0, 0], sizes = [1, 8, 8], strides = [1, 1, 1]} : vector<27x8x8xbf16> to vector<1x8x8xbf16>
    %123 = vector.shape_cast %122 : vector<1x8x8xbf16> to vector<8x8xbf16>
    %124 = vector.extract_strided_slice %36 {offsets = [0, 139], sizes = [8, 512], strides = [1, 1]} : vector<8x768xbf16> to vector<8x512xbf16>
    %cst_36 = arith.constant dense<0.000000e+00> : vector<8x512xf32>
    %125 = tpu.matmul %123, %124, %cst_36 {dimension_numbers = #tpu.dot_dimension_numbers<[1], [0], [0], [1], [0, 0, 1, 1], [], []>} : vector<8x8xbf16>, vector<8x512xbf16>, vector<8x512xf32> -> vector<8x512xf32>
    %126 = arith.addf %121, %125 : vector<8x512xf32>
    %127 = vector.extract_strided_slice %37 {offsets = [18, 0, 0], sizes = [1, 8, 8], strides = [1, 1, 1]} : vector<27x8x8xbf16> to vector<1x8x8xbf16>
    %128 = vector.shape_cast %127 : vector<1x8x8xbf16> to vector<8x8xbf16>
    %129 = vector.extract_strided_slice %36 {offsets = [0, 217], sizes = [8, 512], strides = [1, 1]} : vector<8x768xbf16> to vector<8x512xbf16>
    %cst_37 = arith.constant dense<0.000000e+00> : vector<8x512xf32>
    %130 = tpu.matmul %128, %129, %cst_37 {dimension_numbers = #tpu.dot_dimension_numbers<[1], [0], [0], [1], [0, 0, 1, 1], [], []>} : vector<8x8xbf16>, vector<8x512xbf16>, vector<8x512xf32> -> vector<8x512xf32>
    %131 = arith.addf %126, %130 : vector<8x512xf32>
    %132 = vector.extract_strided_slice %37 {offsets = [19, 0, 0], sizes = [1, 8, 8], strides = [1, 1, 1]} : vector<27x8x8xbf16> to vector<1x8x8xbf16>
    %133 = vector.shape_cast %132 : vector<1x8x8xbf16> to vector<8x8xbf16>
    %134 = vector.extract_strided_slice %36 {offsets = [0, 218], sizes = [8, 512], strides = [1, 1]} : vector<8x768xbf16> to vector<8x512xbf16>
    %cst_38 = arith.constant dense<0.000000e+00> : vector<8x512xf32>
    %135 = tpu.matmul %133, %134, %cst_38 {dimension_numbers = #tpu.dot_dimension_numbers<[1], [0], [0], [1], [0, 0, 1, 1], [], []>} : vector<8x8xbf16>, vector<8x512xbf16>, vector<8x512xf32> -> vector<8x512xf32>
    %136 = arith.addf %131, %135 : vector<8x512xf32>
    %137 = vector.extract_strided_slice %37 {offsets = [20, 0, 0], sizes = [1, 8, 8], strides = [1, 1, 1]} : vector<27x8x8xbf16> to vector<1x8x8xbf16>
    %138 = vector.shape_cast %137 : vector<1x8x8xbf16> to vector<8x8xbf16>
    %139 = vector.extract_strided_slice %36 {offsets = [0, 219], sizes = [8, 512], strides = [1, 1]} : vector<8x768xbf16> to vector<8x512xbf16>
    %cst_39 = arith.constant dense<0.000000e+00> : vector<8x512xf32>
    %140 = tpu.matmul %138, %139, %cst_39 {dimension_numbers = #tpu.dot_dimension_numbers<[1], [0], [0], [1], [0, 0, 1, 1], [], []>} : vector<8x8xbf16>, vector<8x512xbf16>, vector<8x512xf32> -> vector<8x512xf32>
    %141 = arith.addf %136, %140 : vector<8x512xf32>
    %142 = vector.extract_strided_slice %37 {offsets = [21, 0, 0], sizes = [1, 8, 8], strides = [1, 1, 1]} : vector<27x8x8xbf16> to vector<1x8x8xbf16>
    %143 = vector.shape_cast %142 : vector<1x8x8xbf16> to vector<8x8xbf16>
    %144 = vector.extract_strided_slice %36 {offsets = [0, 227], sizes = [8, 512], strides = [1, 1]} : vector<8x768xbf16> to vector<8x512xbf16>
    %cst_40 = arith.constant dense<0.000000e+00> : vector<8x512xf32>
    %145 = tpu.matmul %143, %144, %cst_40 {dimension_numbers = #tpu.dot_dimension_numbers<[1], [0], [0], [1], [0, 0, 1, 1], [], []>} : vector<8x8xbf16>, vector<8x512xbf16>, vector<8x512xf32> -> vector<8x512xf32>
    %146 = arith.addf %141, %145 : vector<8x512xf32>
    %147 = vector.extract_strided_slice %37 {offsets = [22, 0, 0], sizes = [1, 8, 8], strides = [1, 1, 1]} : vector<27x8x8xbf16> to vector<1x8x8xbf16>
    %148 = vector.shape_cast %147 : vector<1x8x8xbf16> to vector<8x8xbf16>
    %149 = vector.extract_strided_slice %36 {offsets = [0, 228], sizes = [8, 512], strides = [1, 1]} : vector<8x768xbf16> to vector<8x512xbf16>
    %cst_41 = arith.constant dense<0.000000e+00> : vector<8x512xf32>
    %150 = tpu.matmul %148, %149, %cst_41 {dimension_numbers = #tpu.dot_dimension_numbers<[1], [0], [0], [1], [0, 0, 1, 1], [], []>} : vector<8x8xbf16>, vector<8x512xbf16>, vector<8x512xf32> -> vector<8x512xf32>
    %151 = arith.addf %146, %150 : vector<8x512xf32>
    %152 = vector.extract_strided_slice %37 {offsets = [23, 0, 0], sizes = [1, 8, 8], strides = [1, 1, 1]} : vector<27x8x8xbf16> to vector<1x8x8xbf16>
    %153 = vector.shape_cast %152 : vector<1x8x8xbf16> to vector<8x8xbf16>
    %154 = vector.extract_strided_slice %36 {offsets = [0, 229], sizes = [8, 512], strides = [1, 1]} : vector<8x768xbf16> to vector<8x512xbf16>
    %cst_42 = arith.constant dense<0.000000e+00> : vector<8x512xf32>
    %155 = tpu.matmul %153, %154, %cst_42 {dimension_numbers = #tpu.dot_dimension_numbers<[1], [0], [0], [1], [0, 0, 1, 1], [], []>} : vector<8x8xbf16>, vector<8x512xbf16>, vector<8x512xf32> -> vector<8x512xf32>
    %156 = arith.addf %151, %155 : vector<8x512xf32>
    %157 = vector.extract_strided_slice %37 {offsets = [24, 0, 0], sizes = [1, 8, 8], strides = [1, 1, 1]} : vector<27x8x8xbf16> to vector<1x8x8xbf16>
    %158 = vector.shape_cast %157 : vector<1x8x8xbf16> to vector<8x8xbf16>
    %159 = vector.extract_strided_slice %36 {offsets = [0, 237], sizes = [8, 512], strides = [1, 1]} : vector<8x768xbf16> to vector<8x512xbf16>
    %cst_43 = arith.constant dense<0.000000e+00> : vector<8x512xf32>
    %160 = tpu.matmul %158, %159, %cst_43 {dimension_numbers = #tpu.dot_dimension_numbers<[1], [0], [0], [1], [0, 0, 1, 1], [], []>} : vector<8x8xbf16>, vector<8x512xbf16>, vector<8x512xf32> -> vector<8x512xf32>
    %161 = arith.addf %156, %160 : vector<8x512xf32>
    %162 = vector.extract_strided_slice %37 {offsets = [25, 0, 0], sizes = [1, 8, 8], strides = [1, 1, 1]} : vector<27x8x8xbf16> to vector<1x8x8xbf16>
    %163 = vector.shape_cast %162 : vector<1x8x8xbf16> to vector<8x8xbf16>
    %164 = vector.extract_strided_slice %36 {offsets = [0, 238], sizes = [8, 512], strides = [1, 1]} : vector<8x768xbf16> to vector<8x512xbf16>
    %cst_44 = arith.constant dense<0.000000e+00> : vector<8x512xf32>
    %165 = tpu.matmul %163, %164, %cst_44 {dimension_numbers = #tpu.dot_dimension_numbers<[1], [0], [0], [1], [0, 0, 1, 1], [], []>} : vector<8x8xbf16>, vector<8x512xbf16>, vector<8x512xf32> -> vector<8x512xf32>
    %166 = arith.addf %161, %165 : vector<8x512xf32>
    %167 = vector.extract_strided_slice %37 {offsets = [26, 0, 0], sizes = [1, 8, 8], strides = [1, 1, 1]} : vector<27x8x8xbf16> to vector<1x8x8xbf16>
    %168 = vector.shape_cast %167 : vector<1x8x8xbf16> to vector<8x8xbf16>
    %169 = vector.extract_strided_slice %36 {offsets = [0, 239], sizes = [8, 512], strides = [1, 1]} : vector<8x768xbf16> to vector<8x512xbf16>
    %cst_45 = arith.constant dense<0.000000e+00> : vector<8x512xf32>
    %170 = tpu.matmul %168, %169, %cst_45 {dimension_numbers = #tpu.dot_dimension_numbers<[1], [0], [0], [1], [0, 0, 1, 1], [], []>} : vector<8x8xbf16>, vector<8x512xbf16>, vector<8x512xf32> -> vector<8x512xf32>
    %171 = arith.addf %166, %170 : vector<8x512xf32>
    %172 = vector.extract_strided_slice %20 {offsets = [0, 128], sizes = [1, 512], strides = [1, 1]} : vector<1x768xf32> to vector<1x512xf32>
    %cst_46 = arith.constant 5.000000e-01 : f32
    %173 = vector.broadcast %cst_46 : f32 to vector<1x512xf32>
    %174 = arith.cmpf ogt, %172, %173 : vector<1x512xf32>
    %cst_47 = arith.constant 0.000000e+00 : f32
    %175 = vector.shape_cast %174 : vector<1x512xi1> to vector<1x512xi1>
    %176 = vector.broadcast %175 : vector<1x512xi1> to vector<8x512xi1>
    %177 = vector.broadcast %cst_47 : f32 to vector<8x512xf32>
    %178 = arith.select %176, %171, %177 : vector<8x512xi1>, vector<8x512xf32>
    %179 = arith.truncf %178 : vector<8x512xf32> to vector<8x512xbf16>
    %c0_48 = arith.constant 0 : index
    %c0_49 = arith.constant 0 : index
    %c0_50 = arith.constant 0 : index
    %180 = vector.load %arg7[%c0_48, %c0_49, %c0_50] : memref<1x8x512xbf16, #tpu.memory_space<vmem>>, vector<1x8x512xbf16>
    %181 = vector.shape_cast %180 : vector<1x8x512xbf16> to vector<8x512xbf16>
    %182 = vector.shape_cast %179 : vector<8x512xbf16> to vector<1x8x512xbf16>
    tpu.vector_store %arg7[%c0_48, %c0_49, %c0_50], %182 {strides = array<i32>} : memref<1x8x512xbf16, #tpu.memory_space<vmem>>, vector<1x8x512xbf16>,
    %c0_i32_51 = arith.constant 0 : i32
    %183 = arith.cmpi eq, %arg1, %c0_i32_51 : i32
    %184 = arith.extui %183 : i1 to i32
    %c0_i32_52 = arith.constant 0 : i32
    %185 = arith.cmpi ne, %184, %c0_i32_52 : i32
    scf.if %185 {
      %cst_67 = arith.constant 0.000000e+00 : f32
      %216 = vector.broadcast %cst_67 : f32 to vector<8x128xf32>
      %c0_68 = arith.constant 0 : index
      %c0_69 = arith.constant 0 : index
      %c0_70 = arith.constant 0 : index
      %217 = vector.load %arg8[%c0_68, %c0_69, %c0_70] : memref<1x8x128xf32, #tpu.memory_space<vmem>>, vector<1x8x128xf32>
      %218 = vector.shape_cast %217 : vector<1x8x128xf32> to vector<8x128xf32>
      %219 = vector.shape_cast %216 : vector<8x128xf32> to vector<1x8x128xf32>
      tpu.vector_store %arg8[%c0_68, %c0_69, %c0_70], %219 {strides = array<i32>} : memref<1x8x128xf32, #tpu.memory_space<vmem>>, vector<1x8x128xf32>,
      %cst_71 = arith.constant 0.000000e+00 : f32
      %220 = vector.broadcast %cst_71 : f32 to vector<8x128xf32>
      %c0_72 = arith.constant 0 : index
      %c0_73 = arith.constant 0 : index
      %c0_74 = arith.constant 0 : index
      %221 = vector.load %arg9[%c0_72, %c0_73, %c0_74] : memref<1x8x128xf32, #tpu.memory_space<vmem>>, vector<1x8x128xf32>
      %222 = vector.shape_cast %221 : vector<1x8x128xf32> to vector<8x128xf32>
      %223 = vector.shape_cast %220 : vector<8x128xf32> to vector<1x8x128xf32>
      tpu.vector_store %arg9[%c0_72, %c0_73, %c0_74], %223 {strides = array<i32>} : memref<1x8x128xf32, #tpu.memory_space<vmem>>, vector<1x8x128xf32>,
    } else {
    }
    %cst_53 = arith.constant 0.000000e+00 : f32
    %186 = vector.broadcast %cst_53 : f32 to vector<8x128xf32>
    %cst_54 = arith.constant 0.000000e+00 : f32
    %187 = vector.broadcast %cst_54 : f32 to vector<8x128xf32>
    %188 = vector.extract_strided_slice %178 {offsets = [0, 0], sizes = [8, 128], strides = [1, 1]} : vector<8x512xf32> to vector<8x128xf32>
    %189 = arith.addf %186, %188 : vector<8x128xf32>
    %190 = arith.mulf %188, %188 : vector<8x128xf32>
    %191 = arith.addf %187, %190 : vector<8x128xf32>
    %192 = vector.extract_strided_slice %178 {offsets = [0, 128], sizes = [8, 128], strides = [1, 1]} : vector<8x512xf32> to vector<8x128xf32>
    %193 = arith.addf %189, %192 : vector<8x128xf32>
    %194 = arith.mulf %192, %192 : vector<8x128xf32>
    %195 = arith.addf %191, %194 : vector<8x128xf32>
    %196 = vector.extract_strided_slice %178 {offsets = [0, 256], sizes = [8, 128], strides = [1, 1]} : vector<8x512xf32> to vector<8x128xf32>
    %197 = arith.addf %193, %196 : vector<8x128xf32>
    %198 = arith.mulf %196, %196 : vector<8x128xf32>
    %199 = arith.addf %195, %198 : vector<8x128xf32>
    %200 = vector.extract_strided_slice %178 {offsets = [0, 384], sizes = [8, 128], strides = [1, 1]} : vector<8x512xf32> to vector<8x128xf32>
    %201 = arith.addf %197, %200 : vector<8x128xf32>
    %202 = arith.mulf %200, %200 : vector<8x128xf32>
    %203 = arith.addf %199, %202 : vector<8x128xf32>
    %c0_55 = arith.constant 0 : index
    %c0_56 = arith.constant 0 : index
    %c0_57 = arith.constant 0 : index
    %204 = vector.load %arg8[%c0_55, %c0_56, %c0_57] : memref<1x8x128xf32, #tpu.memory_space<vmem>>, vector<1x8x128xf32>
    %205 = vector.shape_cast %204 : vector<1x8x128xf32> to vector<8x128xf32>
    %206 = arith.addf %205, %201 : vector<8x128xf32>
    %c0_58 = arith.constant 0 : index
    %c0_59 = arith.constant 0 : index
    %c0_60 = arith.constant 0 : index
    %207 = vector.load %arg8[%c0_58, %c0_59, %c0_60] : memref<1x8x128xf32, #tpu.memory_space<vmem>>, vector<1x8x128xf32>
    %208 = vector.shape_cast %207 : vector<1x8x128xf32> to vector<8x128xf32>
    %209 = vector.shape_cast %206 : vector<8x128xf32> to vector<1x8x128xf32>
    tpu.vector_store %arg8[%c0_58, %c0_59, %c0_60], %209 {strides = array<i32>} : memref<1x8x128xf32, #tpu.memory_space<vmem>>, vector<1x8x128xf32>,
    %c0_61 = arith.constant 0 : index
    %c0_62 = arith.constant 0 : index
    %c0_63 = arith.constant 0 : index
    %210 = vector.load %arg9[%c0_61, %c0_62, %c0_63] : memref<1x8x128xf32, #tpu.memory_space<vmem>>, vector<1x8x128xf32>
    %211 = vector.shape_cast %210 : vector<1x8x128xf32> to vector<8x128xf32>
    %212 = arith.addf %211, %203 : vector<8x128xf32>
    %c0_64 = arith.constant 0 : index
    %c0_65 = arith.constant 0 : index
    %c0_66 = arith.constant 0 : index
    %213 = vector.load %arg9[%c0_64, %c0_65, %c0_66] : memref<1x8x128xf32, #tpu.memory_space<vmem>>, vector<1x8x128xf32>
    %214 = vector.shape_cast %213 : vector<1x8x128xf32> to vector<8x128xf32>
    %215 = vector.shape_cast %212 : vector<8x128xf32> to vector<1x8x128xf32>
    tpu.vector_store %arg9[%c0_64, %c0_65, %c0_66], %215 {strides = array<i32>} : memref<1x8x128xf32, #tpu.memory_space<vmem>>, vector<1x8x128xf32>,
    return
  }
  func.func @transform_1(%arg0: i32, %arg1: i32) -> (i32, i32, i32) {
    %c0_i32 = arith.constant 0 : i32
    %c0_i32_0 = arith.constant 0 : i32
    %c0_i32_1 = arith.constant 0 : i32
    return %arg1, %c0_i32, %c0_i32_0 : i32, i32, i32
  }
  func.func @transform_2(%arg0: i32, %arg1: i32) -> (i32, i32, i32) {
    %c0_i32 = arith.constant 0 : i32
    %c0_i32_0 = arith.constant 0 : i32
    %c0_i32_1 = arith.constant 0 : i32
    %c0_i32_2 = arith.constant 0 : i32
    return %c0_i32, %c0_i32_0, %c0_i32_1 : i32, i32, i32
  }
  func.func @transform_3(%arg0: i32, %arg1: i32) -> (i32, i32) {
    %c0_i32 = arith.constant 0 : i32
    %c0_i32_0 = arith.constant 0 : i32
    %c0_i32_1 = arith.constant 0 : i32
    return %c0_i32, %c0_i32_0 : i32, i32
  }
  func.func @transform_4(%arg0: i32, %arg1: i32) -> (i32, i32) {
    %c0_i32 = arith.constant 0 : i32
    %c0_i32_0 = arith.constant 0 : i32
    %c0_i32_1 = arith.constant 0 : i32
    return %c0_i32, %c0_i32_0 : i32, i32
  }
  func.func @transform_5(%arg0: i32, %arg1: i32) -> (i32, i32, i32) {
    %c1_i32 = arith.constant 1 : i32
    %0 = arith.addi %arg1, %c1_i32 : i32
    %c0_i32 = arith.constant 0 : i32
    %c0_i32_0 = arith.constant 0 : i32
    return %arg0, %c0_i32, %0 : i32, i32, i32
  }
  func.func @transform_6(%arg0: i32, %arg1: i32) -> (i32, i32, i32) {
    %c0_i32 = arith.constant 0 : i32
    %c0_i32_0 = arith.constant 0 : i32
    %c0_i32_1 = arith.constant 0 : i32
    return %arg0, %c0_i32, %c0_i32_0 : i32, i32, i32
  }
  func.func @transform_7(%arg0: i32, %arg1: i32) -> (i32, i32, i32) {
    %c0_i32 = arith.constant 0 : i32
    %c0_i32_0 = arith.constant 0 : i32
    %c0_i32_1 = arith.constant 0 : i32
    return %arg0, %c0_i32, %c0_i32_0 : i32, i32, i32
  }
}

</mosaic_0001>

<bundles_post_ra>
// kernel: double_conv_forward.5
= control target key start
LH: loop header
LB: loop body
LE: loop exit
PB: predicated region body
PF: predicated region fallthrough
CT: control target
= control target key end

     0   :  { %s459_s12 = smov 0   ;;  %s461_s13 = smov 0   ;;  %s516_s0 = inlined_call_operand.vmem [shape: bf16[2,8,2048], index: 0, kind: input, shape index: {}]   ;;  %s517_s1 = inlined_call_operand.vmem [shape: f32[8,1], index: 1, kind: input, shape index: {}]   ;;  %s518_s2 = inlined_call_operand.vmem [shape: f32[8,1], index: 2, kind: input, shape index: {}]   ;;  %s519_s3 = inlined_call_operand.vmem [shape: f32[2,8,1024], index: 3, kind: output, shape index: {}]  }
   0x1   :  { %s463_s14 = smov 0   ;;  %s465_s15 = smov 0  }
   0x2   :  { %s467_s16 = smov 0  }
   0x3 LB: > { %s22_s17 = sadd.s32 1, %s428_s14  ;;  %s25_s18 = sadd.s32 1, %s432_s15  ;;  %s436_s16 = sphi %s467_s16, %s13_s16   ;;  %s432_s15 = sphi %s465_s15, %s523_s15   ;;  %s428_s14 = sphi %s463_s14, %s522_s14   ;;  %s424_s13 = sphi %s461_s13, %s521_s13   ;;  %s420_s12 = sphi %s459_s12, %s520_s12  }
   0x4   : > { %p23_p0 = scmp.ge.s32.totalorder %s22_s17, 2  ;;  %p345_p1 = scmp.ge.s32.totalorder %s436_s16, 1 }
   0x5   : > { %p162_p2 = scmp.lt.s32.totalorder %s436_s16, 5 }
   0x6   : > { %s525_s17 = smov (%p23_p0, %s22_s17), 0  ;;  %s527_s18 = smov (!%p23_p0, %s25_s18), %s432_s15 }
   0x7   : > { %p163_p3 = pnand %p345_p1, %p162_p2  ;;  %p27_p4 = scmp.ge.s32.totalorder %s527_s18, 2 }
   0x8   : > { %s354_s23 = sshll.u32 (!%p163_p3), %s420_s12, 2  ;;  %p197_p5 = scmp.lt.s32.totalorder (!%p163_p3), %s424_s13, 1 }
   0x9   : > { %s529_s18 = smov (%p27_p4, %s527_s18), 0  ;;  %166 = sbr.rel (%p163_p3) target bundleno = 150 (0x96), region = 32 }
   0xa   : > { %s355_s24 = sadd.s32 (!%p163_p3), 4, %s354_s23  ;;  %p210_p7 = scmp.lt.s32.totalorder (!%p163_p3), %s354_s23, 7 }
   0xb   : > { %p199_p6 = scmp.lt.s32.totalorder (!%p163_p3), %s355_s24, 15 }
   0xe   : > { %v223_v0 = vld [vmem:[%s517_s1] sm:$0xff]  ;;  %v438_v1 = vmov 0   ;;  %s531_s13 = smov (!%p197_p5, %s424_s13), 1  ;;  %s533_s24 = smov (!%p199_p6, %s355_s24), 15 }
   0xf   : > { %397 = vset.pattern.permute.xlu0 %v438_v1  ;;  %v233_v2 = vld [vmem:[%s518_s2] sm:$0xff]  ;;  %s347_s25 = sshll.u32 %s531_s13, 4  ;;  %s535_s23 = smov (!%p210_p7, %s354_s23), 7 }
  0x10   : > { %226 = vperm.xlu0 %397, %v223_v0   ;;  %s202_s26 = sadd.s32 %s347_s25, %s533_s24  ;;  %s350_s4 = sshll.u32 %s531_s13, 3 }
  0x11   : > { %s348_s27 = sshll.u32 %s202_s26, 2  ;;  %s213_s5 = sadd.s32 %s350_s4, %s535_s23 }
  0x12   : > { %s204_s30 = scalar_lea.vmem %s516_s0, %s348_s27  ;;  %s351_s6 = sshll.u32 %s213_s5, 3 }
  0x13   : > { %v217_v3 = vld [vmem:[%s204_s30] sm:$0xff]  ;;  %v218_v4 = vld [vmem:[%s204_s30 + $0x8] sm:$0xff]  ;;  %s215_s9 = scalar_lea.vmem %s519_s3, %s351_s6 }
  0x14   : > { %236 = vperm.xlu0 %397, %v233_v2   ;;  %v219_v5 = vunpack.c.l.bf16 %v217_v3  ;;  %v220_v6 = vunpack.c.h.bf16 %v217_v3  ;;  %v221_v7 = vunpack.c.l.bf16 %v218_v4  ;;  %v222_v8 = vunpack.c.h.bf16 %v218_v4 }
  0x8b   : > { %v227_v9 = vpop.permute.xlu0 %226 }
  0x8c   : > { %v229_v10 = vmul.f32 %v227_v9, %v219_v5  ;;  %v230_v11 = vmul.f32 %v227_v9, %v220_v6  ;;  %v231_v12 = vmul.f32 %v227_v9, %v221_v7  ;;  %v232_v13 = vmul.f32 %v227_v9, %v222_v8 }
  0x8f   : > { %v237_v14 = vpop.permute.xlu0 %236 }
  0x90   : > { %v239_v15 = vadd.f32 %v237_v14, %v229_v10  ;;  %v240_v16 = vadd.f32 %v237_v14, %v230_v11  ;;  %v241_v17 = vadd.f32 %v237_v14, %v231_v12  ;;  %v242_v18 = vadd.f32 %v237_v14, %v232_v13 }
  0x92   : > { %v243_v19 = vmax.f32 %v239_v15, 0.0  ;;  %v244_v20 = vmax.f32 %v240_v16, 0.0  ;;  %v245_v21 = vmax.f32 %v241_v17, 0.0  ;;  %v246_v22 = vmax.f32 %v242_v18, 0.0 }
  0x94   : > { %247 = vst [vmem:[%s215_s9] sm:$0xff] %v243_v19  ;;  %248 = vst [vmem:[%s215_s9 + $0x8] sm:$0xff] %v244_v20 }
  0x95   : > { %249 = vst [vmem:[%s215_s9 + $0x10] sm:$0xff] %v245_v21  ;;  %250 = vst [vmem:[%s215_s9 + $0x18] sm:$0xff] %v246_v22 }
  0x96 PF: > { %s13_s16 = sadd.s32 1, %s436_s16   ;;  %s520_s12 = smov %s428_s14 }
  0x97   : > { %p10_p8 = scmp.ge.s32.totalorder %s13_s16, 6   ;;  %s521_s13 = smov %s432_s15 }
  0x98   : > { %s522_s14 = smov %s525_s17  ;;  %s523_s15 = smov %s529_s18 }
  0x99   :  { %12 = sbr.rel (!%p10_p8) target bundleno = 3 (0x3), region = 62 }

// kernel: double_conv_forward.3
= control target key start
LH: loop header
LB: loop body
LE: loop exit
PB: predicated region body
PF: predicated region fallthrough
CT: control target
= control target key end

     0   :  { %s4222_s24 = smov 0   ;;  %s4224_s25 = smov 0   ;;  %s4886_s0 = inlined_call_operand.vmem [shape: bf16[2,4,2048], index: 0, kind: input, shape index: {}]   ;;  %s4887_s1 = inlined_call_operand.vmem [shape: f32[2,1,768], index: 1, kind: input, shape index: {}]   ;;  %s4888_s2 = inlined_call_operand.vmem [shape: bf16[27,8,4], index: 2, kind: input, shape index: {}]   ;;  %s4889_s3 = inlined_call_operand.vmem [shape: f32[4,1], index: 3, kind: input, shape index: {}]   ;;  %s4890_s4 = inlined_call_operand.vmem [shape: f32[4,1], index: 4, kind: input, shape index: {}]   ;;  %s4891_s5 = inlined_call_operand.vmem [shape: bf16[2,8,2048], index: 5, kind: output, shape index: {0}]   ;;  %s4892_s6 = inlined_call_operand.vmem [shape: f32[2,8,128], index: 6, kind: output, shape index: {1}]   ;;  %s4893_s7 = inlined_call_operand.vmem [shape: f32[2,8,128], index: 7, kind: output, shape index: {2}]  }
   0x1   :  { %s4226_s26 = smov 0   ;;  %s4228_s27 = smov 0  }
   0x2   :  { %s4230_s3 = smov 0  }
   0x3 LB: > { %s27_s4 = sadd.s32 1, %s4143_s26  ;;  %s30_s28 = sadd.s32 1, %s4147_s27  ;;  %s4151_s3 = sphi %s4230_s3, %s18_s3   ;;  %s4147_s27 = sphi %s4228_s27, %s4899_s27   ;;  %s4143_s26 = sphi %s4226_s26, %s4898_s26   ;;  %s4139_s25 = sphi %s4224_s25, %s4897_s25   ;;  %s4135_s24 = sphi %s4222_s24, %s4896_s24  }
   0x4   : > { %p28_p0 = scmp.ge.s32.totalorder %s27_s4, 2  ;;  %p3894_p1 = scmp.ge.s32.totalorder %s4151_s3, 1 }
   0x5   : > { %p233_p2 = scmp.lt.s32.totalorder %s4151_s3, 5 }
   0x6   : > { %s4901_s4 = smov (%p28_p0, %s27_s4), 0  ;;  %s4903_s28 = smov (!%p28_p0, %s30_s28), %s4147_s27 }
   0x7   : > { %p234_p3 = pnand %p3894_p1, %p233_p2  ;;  %p32_p4 = scmp.ge.s32.totalorder %s4903_s28, 2 }
   0x8   : > { %p275_p5 = scmp.lt.s32.totalorder (!%p234_p3), %s4135_s24, 1  ;;  %s4031_s29 = sshll.u32 (!%p234_p3), %s4135_s24, 2 }
   0x9   : > { %s4905_s28 = smov (%p32_p4, %s4903_s28), 0  ;;  %237 = sbr.rel (%p234_p3) target bundleno = 644 (0x284), region = 36 }
   0xa   : > { %s4032_s30 = sadd.s32 (!%p234_p3), 4, %s4031_s29  ;;  %p281_p6 = scmp.lt.s32.totalorder (!%p234_p3), %s4139_s25, 1 }
   0xb   : > { %p283_p7 = scmp.lt.s32.totalorder (!%p234_p3), %s4032_s30, 15  ;;  %p3900_p8 = scmp.ne.s32.totalorder (!%p234_p3), %s4135_s24, 0 }
   0xe   : > { %s276_s8 = scalar_select %p275_p5, %s4135_s24, 1 }
   0xf   : > { %s282_s9 = scalar_select %p281_p6, %s4139_s25, 1 }
  0x10   : > { %s4040_s10 = smul.u32 6, %s276_s8  ;;  %s4907_s30 = smov (!%p283_p7, %s4032_s30), 15 }
  0x11   : > { %s3896_s11 = sshll.u32 %s282_s9, 4  ;;  %s3898_s12 = sshll.u32 %s282_s9, 3 }
  0x12   : > { %s4264_s15 = scalar_lea.vmem %s4887_s1, %s4040_s10  ;;  %s4269_s18 = scalar_lea.vmem %s4892_s6, %s3898_s12 }
  0x13   : > { %s4274_s21 = scalar_lea.vmem %s4893_s7, %s3898_s12  ;;  %s286_s23 = sadd.s32 %s3896_s11, %s4907_s30 }
  0x14   : > { %s3897_s29 = sshll.u32 %s286_s23, 2  ;;  %304 = sbr.rel (%p3900_p8) target bundleno = 28 (0x1c), region = 40 }
  0x15   : > { %s4280_s13 = scalar_lea.vmem %s4891_s5, %s3897_s29  ;;  %s4033_s10 = sshll.u32 (!%p3900_p8), %s4139_s25, 5 }
  0x16   : > { %s3783_s12 = scalar_lea.vmem (!%p3900_p8), %s4886_s0, %s4033_s10 }
  0x19   : > { %v3904_v0 = vld [vmem:[%s3783_s12 + $0x6] sm:$0xff]  ;;  %v3905_v1 = vld [vmem:[%s3783_s12 + $0xe] sm:$0xf] }
  0x1a   : > { %348 = vst [vmem:[#allocation2] sm:$0xff] %v3904_v0  ;;  %360 = vst [vmem:[#allocation2 + $0x8] sm:$0xf] %v3905_v1 }
  0x1b   : > { %364 = vsyncadd [#allocation3], 192 }
  0x1c PF: > { %s365_s30 = sadd.s32 1, %s4135_s24 }
  0x1d   : > { %p3907_p9 = scmp.ge.s32.totalorder %s365_s30, 2 }
  0x1e   : > { %s370_s11 = sand.u32 (!%p3907_p9), 1, %s365_s30  ;;  %s4034_s17 = sshll.u32 (!%p3907_p9), %s4135_s24, 9 }
  0x1f   : > { %369 = sbr.rel (%p3907_p9) target bundleno = 40 (0x28), region = 81  ;;  %s4035_s19 = sadd.s32 (!%p3907_p9), 512, %s4034_s17 }
  0x20   : > { %s3909_s20 = sshll.u32 (!%p3907_p9), %s4139_s25, 4  ;;  %s372_s23 = sadd.s32 (!%p3907_p9), 384, %s4035_s19 }
  0x21   : > { %s4036_s29 = smul.u32 (!%p3907_p9), 12, %s370_s11  ;;  %s373_s8 = sshra.s32 (!%p3907_p9), %s372_s23, 7 }
  0x22   : > { %s376_s9 = sadd.s32 (!%p3907_p9), %s3909_s20, %s373_s8  ;;  %s382_s30 = scalar_lea.sflag (!%p3907_p9), [#allocation3], %s370_s11 }
  0x23   : > { %s3910_s10 = sshll.u32 (!%p3907_p9), %s376_s9, 1  ;;  %s381_s22 = scalar_lea.vmem (!%p3907_p9), [#allocation2], %s4036_s29 }
  0x24   : > { %s378_s12 = scalar_lea.vmem %s4886_s0, %s3910_s10 }
  0x25   : > { %v421_v2 = vld [vmem:[%s378_s12] sm:$0xff]  ;;  %v3912_v3 = vld [vmem:[%s378_s12 + $0x8] sm:$0xf] }
  0x26   : > { %422 = vst [vmem:[%s381_s22] sm:$0xff] %v421_v2  ;;  %3913 = vst [vmem:[%s381_s22 + $0x8] sm:$0xf] %v3912_v3 }
  0x27   : > { %438 = vsyncadd %s382_s30, 192 }
  0x28 PF: > { %s4894_s17 = sand.u32 1, %s4135_s24 }
  0x29   : > { %s4037_s25 = smul.u32 12, %s4894_s17  ;;  %s4895_s23 = smov %s4894_s17 }
  0x2a   : > { %s442_s20 = scalar_lea.sflag [#allocation3], %s4895_s23 }
  0x2b   : > { %s441_s19 = scalar_lea.vmem [#allocation2], %s4037_s25 }
  0x2c   : > { %4131 = dma.done.wait %s442_s20, 192 }
  0x2d   : > { %4132 = vsyncadd %s442_s20, 4294967104  ;;  %v483_v4 = vlaneseq  ;;  %v4153_v5 = vmov 1983009808   ;;  %v447_v11 = vld [vmem:[%s441_s19] sm:$0xff]  ;;  %s4154_s22 = smov 110   ;;  %v4155_v14 = vmov 0  }
  0x2e   : > { %v481_v6 = vunpack.c.l.s4 %v4153_v5  ;;  %v4302_v10 = vld.sshfl [vmem:[%s441_s19 + $0x8] sm:$0x33 pattern:$0x76325410]  ;;  %v479_v13 = vcombine.high %v447_v11, %v447_v11  ;;  %567 = vmatprep.mubr.bf16.mxu0 %v4155_v14  ;;  %608 = vmatprep.mubr.bf16.mxu1 %v4155_v14  ;;  %s4156_s11 = smov 111   ;;  %s4157_s29 = smov 109  }
  0x2f   : > { %v4299_v7 = vshrl.u32 %v483_v4, 7  ;;  %511 = vrot.lane.b32.xlu0 %v4302_v10, %s4154_s22  ;;  %s4158_s8 = smov 101   ;;  %s4159_s9 = smov 100   ;;  %vm513_vm0 = vcmask 900096   ;;  %vm522_vm1 = vcmask 1041408   ;;  %vm627_vm2 = vcmask 908288  }
  0x30   : > { %v482_v8 = vunpack.c.0.s8 %v481_v6  ;;  %s4160_s10 = smov 99   ;;  %s4161_s14 = smov 91   ;;  %v451_v28 = vld [vmem:[%s4888_s2 + $0x4] sm:$0xf]  ;;  %vm518_vm3 = vcmask 31744   ;;  %vm739_vm4 = vcmask 891904   ;;  %v4408_v41 = vcombine.high %v4302_v10, %v4302_v10 }
  0x31   : > { %s4162_s16 = smov 90   ;;  %s4163_s12 = smov 89   ;;  %v450_v42 = vld [vmem:[%s4888_s2] sm:$0xf]  ;;  %v452_v52 = vld [vmem:[%s4888_s2 + $0x8] sm:$0xf] }
  0x32   : > { %v485_v9 = vsub.s32 %v482_v8, %v4299_v7  ;;  %s4164_s30 = smov 11   ;;  %s4165_s17 = smov 10   ;;  %vm855_vm5 = vcmask 826368   ;;  %v453_v0 = vld [vmem:[%s4888_s2 + $0xc] sm:$0xf]  ;;  %vm971_vm6 = vcmask 818176  }
  0x33   : > { %s4166_s25 = smov 9   ;;  %s4167_s19 = smov 1   ;;  %vm1087_vm7 = vcmask 809984   ;;  %vm1203_vm8 = vcmask 744448   ;;  %vm1319_vm9 = vcmask 736256   ;;  %vm1435_vm10 = vcmask 728064  }
  0x34   : > { %v4305_v12 = vrot.slane %v447_v11, %v485_v9  ;;  %v4310_v15 = vrot.slane %v479_v13, %v485_v9  ;;  %vm1551_vm11 = vcmask 89088   ;;  %vm1667_vm12 = vcmask 80896  }
  0x35   : > { %vm1783_vm13 = vcmask 72704   ;;  %vm1899_vm14 = vcmask 7168   ;;  %vm2117_vm15 = vcmask 1039360  }
  0x36   : > { %617 = vrot.lane.b32.xlu1 %v4305_v12, %s4156_s11  ;;  %v4314_v16 = vcombine.high %v4305_v12, %v4305_v12  ;;  %503 = vrot.lane.b32.xlu0 %v4305_v12, %s4154_s22  ;;  %v4322_v17 = vcombine.high %v4310_v15, %v4310_v15 }
  0x3a   : > { %507 = vrot.lane.b32.xlu1 %v4310_v15, %s4154_s22  ;;  %505 = vrot.lane.b32.xlu0 %v4314_v16, %s4154_s22 }
  0x3e   : > { %621 = vrot.lane.b32.xlu1 %v4310_v15, %s4156_s11  ;;  %619 = vrot.lane.b32.xlu0 %v4314_v16, %s4156_s11 }
  0x42   : > { %509 = vrot.lane.b32.xlu1 %v4322_v17, %s4154_s22  ;;  %623 = vrot.lane.b32.xlu0 %v4322_v17, %s4156_s11  ;;  %s4168_s22 = smov 127  }
  0x46   : > { %625 = vrot.lane.b32.xlu1 %v4302_v10, %s4156_s11  ;;  %729 = vrot.lane.b32.xlu0 %v4305_v12, %s4157_s29 }
  0x4a   : > { %731 = vrot.lane.b32.xlu1 %v4314_v16, %s4157_s29  ;;  %733 = vrot.lane.b32.xlu0 %v4310_v15, %s4157_s29 }
  0x4e   : > { %735 = vrot.lane.b32.xlu1 %v4322_v17, %s4157_s29  ;;  %737 = vrot.lane.b32.xlu0 %v4302_v10, %s4157_s29 }
  0x52   : > { %845 = vrot.lane.b32.xlu1 %v4305_v12, %s4158_s8  ;;  %847 = vrot.lane.b32.xlu0 %v4314_v16, %s4158_s8 }
  0x56   : > { %849 = vrot.lane.b32.xlu1 %v4310_v15, %s4158_s8  ;;  %851 = vrot.lane.b32.xlu0 %v4322_v17, %s4158_s8 }
  0x5a   : > { %853 = vrot.lane.b32.xlu1 %v4302_v10, %s4158_s8  ;;  %961 = vrot.lane.b32.xlu0 %v4305_v12, %s4159_s9  ;;  %s4169_s8 = smov 119  }
  0x5e   : > { %963 = vrot.lane.b32.xlu1 %v4314_v16, %s4159_s9  ;;  %965 = vrot.lane.b32.xlu0 %v4310_v15, %s4159_s9 }
  0x62   : > { %967 = vrot.lane.b32.xlu1 %v4322_v17, %s4159_s9  ;;  %969 = vrot.lane.b32.xlu0 %v4302_v10, %s4159_s9 }
  0x66   : > { %1077 = vrot.lane.b32.xlu1 %v4305_v12, %s4160_s10  ;;  %1079 = vrot.lane.b32.xlu0 %v4314_v16, %s4160_s10 }
  0x6a   : > { %1081 = vrot.lane.b32.xlu1 %v4310_v15, %s4160_s10  ;;  %1083 = vrot.lane.b32.xlu0 %v4322_v17, %s4160_s10 }
  0x6e   : > { %1085 = vrot.lane.b32.xlu1 %v4302_v10, %s4160_s10  ;;  %1193 = vrot.lane.b32.xlu0 %v4305_v12, %s4161_s14 }
  0x72   : > { %1195 = vrot.lane.b32.xlu1 %v4314_v16, %s4161_s14  ;;  %1197 = vrot.lane.b32.xlu0 %v4310_v15, %s4161_s14 }
  0x76   : > { %1199 = vrot.lane.b32.xlu1 %v4322_v17, %s4161_s14  ;;  %1201 = vrot.lane.b32.xlu0 %v4302_v10, %s4161_s14  ;;  %s4170_s14 = smov 118  }
  0x7a   : > { %1309 = vrot.lane.b32.xlu1 %v4305_v12, %s4162_s16  ;;  %1311 = vrot.lane.b32.xlu0 %v4314_v16, %s4162_s16 }
  0x7e   : > { %1313 = vrot.lane.b32.xlu1 %v4310_v15, %s4162_s16  ;;  %1315 = vrot.lane.b32.xlu0 %v4322_v17, %s4162_s16 }
  0x82   : > { %1317 = vrot.lane.b32.xlu1 %v4302_v10, %s4162_s16  ;;  %1425 = vrot.lane.b32.xlu0 %v4305_v12, %s4163_s12 }
  0x86   : > { %1427 = vrot.lane.b32.xlu1 %v4314_v16, %s4163_s12  ;;  %1429 = vrot.lane.b32.xlu0 %v4310_v15, %s4163_s12 }
  0x8a   : > { %1431 = vrot.lane.b32.xlu1 %v4322_v17, %s4163_s12  ;;  %1433 = vrot.lane.b32.xlu0 %v4302_v10, %s4163_s12  ;;  %s4180_s12 = smov 17  }
  0x8e   : > { %1541 = vrot.lane.b32.xlu1 %v4305_v12, %s4164_s30  ;;  %1543 = vrot.lane.b32.xlu0 %v4314_v16, %s4164_s30 }
  0x92   : > { %1545 = vrot.lane.b32.xlu1 %v4310_v15, %s4164_s30  ;;  %1547 = vrot.lane.b32.xlu0 %v4322_v17, %s4164_s30 }
  0x96   : > { %1549 = vrot.lane.b32.xlu1 %v4302_v10, %s4164_s30  ;;  %1657 = vrot.lane.b32.xlu0 %v4305_v12, %s4165_s17  ;;  %s4171_s30 = smov 117  }
  0x9a   : > { %1659 = vrot.lane.b32.xlu1 %v4314_v16, %s4165_s17  ;;  %1661 = vrot.lane.b32.xlu0 %v4310_v15, %s4165_s17 }
  0x9e   : > { %1663 = vrot.lane.b32.xlu1 %v4322_v17, %s4165_s17  ;;  %1665 = vrot.lane.b32.xlu0 %v4302_v10, %s4165_s17 }
  0xa1   : > { %v512_v18 = vpop.permute.xlu0 %511 }
  0xa2   : > { %1773 = vrot.lane.b32.xlu1 %v4305_v12, %s4166_s25  ;;  %1775 = vrot.lane.b32.xlu0 %v4314_v16, %s4166_s25 }
  0xa6   : > { %1777 = vrot.lane.b32.xlu1 %v4310_v15, %s4166_s25  ;;  %1779 = vrot.lane.b32.xlu0 %v4322_v17, %s4166_s25 }
  0xa8   : > { %v618_v19 = vpop.permute.xlu1 %617  ;;  %v504_v20 = vpop.permute.xlu0 %503 }
  0xaa   : > { %1781 = vrot.lane.b32.xlu1 %v4302_v10, %s4166_s25  ;;  %1889 = vrot.lane.b32.xlu0 %v4305_v12, %s4167_s19 }
  0xac   : > { %v508_v21 = vpop.permute.xlu1 %507  ;;  %v506_v22 = vpop.permute.xlu0 %505 }
  0xad   : > { %v515_v23 = vsel %vm513_vm0, %v506_v22, %v508_v21  ;;  %v514_v24 = vsel %vm513_vm0, %v504_v20, %v506_v22 }
  0xae   : > { %1891 = vrot.lane.b32.xlu1 %v4314_v16, %s4167_s19  ;;  %3916 = vmatprep.subr.msk.bf16.mxu0 %vm522_vm1, %v515_v23  ;;  %v524_v26 = vsel %vm522_vm1, %v514_v24, 0 }
  0xaf   : > { %1893 = vrot.lane.b32.xlu0 %v4310_v15, %s4167_s19  ;;  %550 = vmatpush1.bf16.msra.mxu0 %v524_v26 }
  0xb0   : > { %v622_v25 = vpop.permute.xlu1 %621  ;;  %v620_v27 = vpop.permute.xlu0 %619 }
  0xb1   : > { %v628_v29 = vsel %vm627_vm2, %v618_v19, %v620_v27  ;;  %v629_v30 = vsel %vm627_vm2, %v620_v27, %v622_v25 }
  0xb2   : > { %1895 = vrot.lane.b32.xlu1 %v4322_v17, %s4167_s19  ;;  %3920 = vmatprep.subr.msk.bf16.mxu0 %vm522_vm1, %v629_v30  ;;  %v636_v32 = vsel %vm522_vm1, %v628_v29, 0  ;;  %v455_v30 = vld [vmem:[%s4888_s2 + $0x14] sm:$0xf] }
  0xb3   : > { %1897 = vrot.lane.b32.xlu0 %v4302_v10, %s4167_s19  ;;  %3917 = vmatmul.mubr.msk.bf16.vlgmr.msra.gmra.mxu0 %vm518_vm3, %v451_v28  ;;  %s4172_s19 = smov 39  }
  0xb4   : > { %v510_v31 = vpop.permute.xlu1 %509  ;;  %662 = vmatpush1.bf16.msra.mxu0 %v636_v32  ;;  %v624_v35 = vpop.permute.xlu0 %623  ;;  %679 = vmatprep.mubr.bf16.mxu0 %v4155_v14 }
  0xb5   : > { %v517_v33 = vsel %vm513_vm0, %v510_v31, %v512_v18  ;;  %v516_v34 = vsel %vm513_vm0, %v508_v21, %v510_v31  ;;  %v630_v37 = vsel %vm627_vm2, %v622_v25, %v624_v35  ;;  %v454_v18 = vld [vmem:[%s4888_s2 + $0x10] sm:$0xf]  ;;  %vm2233_vm0 = vcmask 973824  }
  0xb6   : > { %2107 = vrot.lane.b32.xlu1 %v4314_v16, %s4168_s22  ;;  %v530_v36 = vsel %vm522_vm1, %v516_v34, 0  ;;  %3918 = vmatprep.subr.msk.bf16.mxu1 %vm522_vm1, %v517_v33  ;;  %v642_v43 = vsel %vm522_vm1, %v630_v37, 0 }
  0xb7   : > { %591 = vmatpush1.bf16.msra.mxu1 %v530_v36  ;;  %2109 = vrot.lane.b32.xlu0 %v4310_v15, %s4168_s22 }
  0xb8   : > { %v626_v38 = vpop.permute.xlu1 %625  ;;  %v730_v40 = vpop.permute.xlu0 %729 }
  0xb9   : > { %v631_v39 = vsel %vm627_vm2, %v624_v35, %v626_v38  ;;  %vm2349_vm2 = vcmask 965632  }
  0xba   : > { %2111 = vrot.lane.b32.xlu1 %v4322_v17, %s4168_s22  ;;  %3922 = vmatprep.subr.msk.bf16.mxu1 %vm522_vm1, %v631_v39 }
  0xbb   : > { %3919 = vmatmul.mubr.msk.bf16.vlgmr.msra.gmra.mxu1 %vm518_vm3, %v451_v28  ;;  %2113 = vrot.lane.b32.xlu0 %v4302_v10, %s4168_s22 }
  0xbc   : > { %703 = vmatpush1.bf16.msra.mxu1 %v642_v43  ;;  %v732_v44 = vpop.permute.xlu1 %731  ;;  %3921 = vmatmul.mubr.msk.bf16.vlgmr.msra.gmra.mxu0 %vm518_vm3, %v450_v42  ;;  %v734_v46 = vpop.permute.xlu0 %733 }
  0xbd   : > { %v740_v45 = vsel %vm739_vm4, %v730_v40, %v732_v44  ;;  %720 = vmatprep.mubr.bf16.mxu1 %v4155_v14  ;;  %791 = vmatprep.mubr.bf16.mxu0 %v4155_v14  ;;  %v741_v47 = vsel %vm739_vm4, %v732_v44, %v734_v46  ;;  %v456_v40 = vld [vmem:[%s4888_s2 + $0x18] sm:$0xf] }
  0xbe   : > { %2115 = vrot.lane.b32.xlu1 %v4408_v41, %s4168_s22  ;;  %3924 = vmatprep.subr.msk.bf16.mxu0 %vm522_vm1, %v741_v47  ;;  %v748_v49 = vsel %vm522_vm1, %v740_v45, 0  ;;  %s4173_s22 = smov 38  }
  0xbf   : > { %2223 = vrot.lane.b32.xlu0 %v4314_v16, %s4169_s8  ;;  %774 = vmatpush1.bf16.msra.mxu0 %v748_v49 }
  0xc0   : > { %v736_v48 = vpop.permute.xlu1 %735  ;;  %v738_v51 = vpop.permute.xlu0 %737 }
  0xc1   : > { %v742_v50 = vsel %vm739_vm4, %v734_v46, %v736_v48  ;;  %v743_v53 = vsel %vm739_vm4, %v736_v48, %v738_v51  ;;  %vm2465_vm4 = vcmask 957440  }
  0xc2   : > { %2225 = vrot.lane.b32.xlu1 %v4310_v15, %s4169_s8  ;;  %3926 = vmatprep.subr.msk.bf16.mxu1 %vm522_vm1, %v743_v53  ;;  %v754_v55 = vsel %vm522_vm1, %v742_v50, 0  ;;  %v457_v53 = vld [vmem:[%s4888_s2 + $0x1c] sm:$0xf] }
  0xc3   : > { %3923 = vmatmul.mubr.msk.bf16.vlgmr.msra.gmra.mxu1 %vm518_vm3, %v450_v42  ;;  %2227 = vrot.lane.b32.xlu0 %v4322_v17, %s4169_s8 }
  0xc4   : > { %v846_v54 = vpop.permute.xlu1 %845  ;;  %815 = vmatpush1.bf16.msra.mxu1 %v754_v55  ;;  %3925 = vmatmul.mubr.msk.bf16.vlgmr.msra.gmra.mxu0 %vm518_vm3, %v452_v52  ;;  %v848_v56 = vpop.permute.xlu0 %847 }
  0xc5   : > { %832 = vmatprep.mubr.bf16.mxu1 %v4155_v14  ;;  %v856_v57 = vsel %vm855_vm5, %v846_v54, %v848_v56  ;;  %907 = vmatprep.mubr.bf16.mxu0 %v4155_v14 }
  0xc6   : > { %2229 = vrot.lane.b32.xlu1 %v4302_v10, %s4169_s8  ;;  %v864_v61 = vsel %vm522_vm1, %v856_v57, 0 }
  0xc7   : > { %2231 = vrot.lane.b32.xlu0 %v4408_v41, %s4169_s8  ;;  %s4174_s8 = smov 37  }
  0xc8   : > { %v850_v58 = vpop.permute.xlu1 %849  ;;  %v852_v60 = vpop.permute.xlu0 %851 }
  0xc9   : > { %v857_v59 = vsel %vm855_vm5, %v848_v56, %v850_v58  ;;  %v858_v62 = vsel %vm855_vm5, %v850_v58, %v852_v60 }
  0xca   : > { %2339 = vrot.lane.b32.xlu1 %v4314_v16, %s4170_s14  ;;  %3928 = vmatprep.subr.msk.bf16.mxu0 %vm522_vm1, %v857_v59  ;;  %v870_v3 = vsel %vm522_vm1, %v858_v62, 0 }
  0xcb   : > { %890 = vmatpush1.bf16.msra.mxu0 %v864_v61  ;;  %3927 = vmatmul.mubr.msk.bf16.vlgmr.msra.gmra.mxu1 %vm518_vm3, %v452_v52 }
  0xcc   : > { %2341 = vrot.lane.b32.xlu0 %v4310_v15, %s4170_s14  ;;  %v854_v63 = vpop.permute.xlu1 %853  ;;  %948 = vmatprep.mubr.bf16.mxu1 %v4155_v14  ;;  %v962_v2 = vpop.permute.xlu0 %961 }
  0xcd   : > { %v859_v1 = vsel %vm855_vm5, %v852_v60, %v854_v63  ;;  %vm2581_vm5 = vcmask 318464  }
  0xce   : > { %2343 = vrot.lane.b32.xlu1 %v4322_v17, %s4170_s14  ;;  %3930 = vmatprep.subr.msk.bf16.mxu1 %vm522_vm1, %v859_v1  ;;  %v458_v1 = vld [vmem:[%s4888_s2 + $0x20] sm:$0xf] }
  0xcf   : > { %931 = vmatpush1.bf16.msra.mxu1 %v870_v3  ;;  %3929 = vmatmul.mubr.msk.bf16.vlgmr.msra.gmra.mxu0 %vm518_vm3, %v453_v0 }
  0xd0   : > { %2345 = vrot.lane.b32.xlu0 %v4302_v10, %s4170_s14  ;;  %v964_v4 = vpop.permute.xlu1 %963  ;;  %1023 = vmatprep.mubr.bf16.mxu0 %v4155_v14  ;;  %v966_v6 = vpop.permute.xlu0 %965 }
  0xd1   : > { %v972_v5 = vsel %vm971_vm6, %v962_v2, %v964_v4  ;;  %v973_v8 = vsel %vm971_vm6, %v964_v4, %v966_v6 }
  0xd2   : > { %2347 = vrot.lane.b32.xlu1 %v4408_v41, %s4170_s14  ;;  %3932 = vmatprep.subr.msk.bf16.mxu0 %vm522_vm1, %v973_v8  ;;  %v980_v11 = vsel %vm522_vm1, %v972_v5, 0  ;;  %s4175_s14 = smov 29  }
  0xd3   : > { %3931 = vmatmul.mubr.msk.bf16.vlgmr.msra.gmra.mxu1 %vm518_vm3, %v453_v0  ;;  %1006 = vmatpush1.bf16.msra.mxu0 %v980_v11 }
  0xd4   : > { %2455 = vrot.lane.b32.xlu0 %v4314_v16, %s4171_s30  ;;  %v968_v9 = vpop.permute.xlu1 %967  ;;  %1064 = vmatprep.mubr.bf16.mxu1 %v4155_v14  ;;  %v970_v13 = vpop.permute.xlu0 %969 }
  0xd5   : > { %v974_v12 = vsel %vm971_vm6, %v966_v6, %v968_v9  ;;  %v975_v19 = vsel %vm971_vm6, %v968_v9, %v970_v13  ;;  %vm2697_vm6 = vcmask 310272  }
  0xd6   : > { %2457 = vrot.lane.b32.xlu1 %v4310_v15, %s4171_s30  ;;  %3934 = vmatprep.subr.msk.bf16.mxu1 %vm522_vm1, %v975_v19  ;;  %v986_v21 = vsel %vm522_vm1, %v974_v12, 0  ;;  %v459_v19 = vld [vmem:[%s4888_s2 + $0x24] sm:$0xf] }
  0xd7   : > { %1047 = vmatpush1.bf16.msra.mxu1 %v986_v21  ;;  %3933 = vmatmul.mubr.msk.bf16.vlgmr.msra.gmra.mxu0 %vm518_vm3, %v454_v18 }
  0xd8   : > { %2459 = vrot.lane.b32.xlu0 %v4322_v17, %s4171_s30  ;;  %v1078_v20 = vpop.permute.xlu1 %1077  ;;  %v1080_v22 = vpop.permute.xlu0 %1079  ;;  %1139 = vmatprep.mubr.bf16.mxu0 %v4155_v14 }
  0xd9   : > { %v1088_v23 = vsel %vm1087_vm7, %v1078_v20, %v1080_v22 }
  0xda   : > { %2461 = vrot.lane.b32.xlu1 %v4302_v10, %s4171_s30  ;;  %v1096_v27 = vsel %vm522_vm1, %v1088_v23, 0 }
  0xdb   : > { %3935 = vmatmul.mubr.msk.bf16.vlgmr.msra.gmra.mxu1 %vm518_vm3, %v454_v18 }
  0xdc   : > { %2463 = vrot.lane.b32.xlu0 %v4408_v41, %s4171_s30  ;;  %v1082_v24 = vpop.permute.xlu1 %1081  ;;  %1180 = vmatprep.mubr.bf16.mxu1 %v4155_v14  ;;  %v1084_v26 = vpop.permute.xlu0 %1083  ;;  %s4176_s30 = smov 28  }
  0xdd   : > { %v1089_v25 = vsel %vm1087_vm7, %v1080_v22, %v1082_v24  ;;  %v1090_v28 = vsel %vm1087_vm7, %v1082_v24, %v1084_v26 }
  0xde   : > { %2571 = vrot.lane.b32.xlu1 %v4314_v16, %s4172_s19  ;;  %3936 = vmatprep.subr.msk.bf16.mxu0 %vm522_vm1, %v1089_v25  ;;  %v1102_v33 = vsel %vm522_vm1, %v1090_v28, 0 }
  0xdf   : > { %1122 = vmatpush1.bf16.msra.mxu0 %v1096_v27 }
  0xe0   : > { %2573 = vrot.lane.b32.xlu0 %v4310_v15, %s4172_s19  ;;  %v1086_v29 = vpop.permute.xlu1 %1085  ;;  %v1194_v32 = vpop.permute.xlu0 %1193 }
  0xe1   : > { %v1091_v31 = vsel %vm1087_vm7, %v1084_v26, %v1086_v29  ;;  %vm2813_vm7 = vcmask 302080  }
  0xe2   : > { %2575 = vrot.lane.b32.xlu1 %v4322_v17, %s4172_s19  ;;  %3938 = vmatprep.subr.msk.bf16.mxu1 %vm522_vm1, %v1091_v31  ;;  %v460_v31 = vld [vmem:[%s4888_s2 + $0x28] sm:$0xf] }
  0xe3   : > { %1163 = vmatpush1.bf16.msra.mxu1 %v1102_v33  ;;  %3937 = vmatmul.mubr.msk.bf16.vlgmr.msra.gmra.mxu0 %vm518_vm3, %v455_v30 }
  0xe4   : > { %2577 = vrot.lane.b32.xlu0 %v4302_v10, %s4172_s19  ;;  %v1196_v34 = vpop.permute.xlu1 %1195  ;;  %1255 = vmatprep.mubr.bf16.mxu0 %v4155_v14  ;;  %v1198_v36 = vpop.permute.xlu0 %1197 }
  0xe5   : > { %v1204_v35 = vsel %vm1203_vm8, %v1194_v32, %v1196_v34  ;;  %v1205_v37 = vsel %vm1203_vm8, %v1196_v34, %v1198_v36 }
  0xe6   : > { %2579 = vrot.lane.b32.xlu1 %v4408_v41, %s4172_s19  ;;  %3939 = vmatmul.mubr.msk.bf16.vlgmr.msra.gmra.mxu1 %vm518_vm3, %v455_v30  ;;  %v1212_v39 = vsel %vm522_vm1, %v1204_v35, 0  ;;  %s4177_s19 = smov 27  }
  0xe7   : > { %1296 = vmatprep.mubr.bf16.mxu1 %v4155_v14  ;;  %3940 = vmatprep.subr.msk.bf16.mxu0 %vm522_vm1, %v1205_v37 }
  0xe8   : > { %2687 = vrot.lane.b32.xlu0 %v4314_v16, %s4173_s22  ;;  %v1200_v38 = vpop.permute.xlu1 %1199  ;;  %1238 = vmatpush1.bf16.msra.mxu0 %v1212_v39  ;;  %v1202_v43 = vpop.permute.xlu0 %1201 }
  0xe9   : > { %v1206_v42 = vsel %vm1203_vm8, %v1198_v36, %v1200_v38  ;;  %v1207_v44 = vsel %vm1203_vm8, %v1200_v38, %v1202_v43  ;;  %vm2929_vm8 = vcmask 236544  }
  0xea   : > { %2689 = vrot.lane.b32.xlu1 %v4310_v15, %s4173_s22  ;;  %v1218_v46 = vsel %vm522_vm1, %v1206_v42, 0  ;;  %3942 = vmatprep.subr.msk.bf16.mxu1 %vm522_vm1, %v1207_v44  ;;  %v461_v44 = vld [vmem:[%s4888_s2 + $0x2c] sm:$0xf] }
  0xeb   : > { %3941 = vmatmul.mubr.msk.bf16.vlgmr.msra.gmra.mxu0 %vm518_vm3, %v456_v40  ;;  %1279 = vmatpush1.bf16.msra.mxu1 %v1218_v46 }
  0xec   : > { %2691 = vrot.lane.b32.xlu0 %v4322_v17, %s4173_s22  ;;  %v1310_v45 = vpop.permute.xlu1 %1309  ;;  %1371 = vmatprep.mubr.bf16.mxu0 %v4155_v14  ;;  %v1312_v47 = vpop.permute.xlu0 %1311 }
  0xed   : > { %v1320_v48 = vsel %vm1319_vm9, %v1310_v45, %v1312_v47 }
  0xee   : > { %2693 = vrot.lane.b32.xlu1 %v4302_v10, %s4173_s22  ;;  %3943 = vmatmul.mubr.msk.bf16.vlgmr.msra.gmra.mxu1 %vm518_vm3, %v456_v40  ;;  %v1328_v51 = vsel %vm522_vm1, %v1320_v48, 0 }
  0xef   : > { %1412 = vmatprep.mubr.bf16.mxu1 %v4155_v14 }
  0xf0   : > { %2695 = vrot.lane.b32.xlu0 %v4408_v41, %s4173_s22  ;;  %v1314_v49 = vpop.permute.xlu1 %1313  ;;  %v1316_v52 = vpop.permute.xlu0 %1315  ;;  %s4178_s22 = smov 19  }
  0xf1   : > { %v1321_v50 = vsel %vm1319_vm9, %v1312_v47, %v1314_v49  ;;  %v1322_v54 = vsel %vm1319_vm9, %v1314_v49, %v1316_v52 }
  0xf2   : > { %2803 = vrot.lane.b32.xlu1 %v4314_v16, %s4174_s8  ;;  %3944 = vmatprep.subr.msk.bf16.mxu0 %vm522_vm1, %v1321_v50  ;;  %v1334_v58 = vsel %vm522_vm1, %v1322_v54, 0 }
  0xf3   : > { %1354 = vmatpush1.bf16.msra.mxu0 %v1328_v51 }
  0xf4   : > { %2805 = vrot.lane.b32.xlu0 %v4310_v15, %s4174_s8  ;;  %v1318_v55 = vpop.permute.xlu1 %1317  ;;  %v1426_v57 = vpop.permute.xlu0 %1425 }
  0xf5   : > { %v1323_v56 = vsel %vm1319_vm9, %v1316_v52, %v1318_v55  ;;  %vm3045_vm9 = vcmask 228352  }
  0xf6   : > { %2807 = vrot.lane.b32.xlu1 %v4322_v17, %s4174_s8  ;;  %3945 = vmatmul.mubr.msk.bf16.vlgmr.msra.gmra.mxu0 %vm518_vm3, %v457_v53 }
  0xf7   : > { %3946 = vmatprep.subr.msk.bf16.mxu1 %vm522_vm1, %v1323_v56  ;;  %1487 = vmatprep.mubr.bf16.mxu0 %v4155_v14  ;;  %v462_v56 = vld [vmem:[%s4888_s2 + $0x30] sm:$0xf] }
  0xf8   : > { %1395 = vmatpush1.bf16.msra.mxu1 %v1334_v58  ;;  %2809 = vrot.lane.b32.xlu0 %v4302_v10, %s4174_s8  ;;  %v1428_v59 = vpop.permute.xlu1 %1427  ;;  %v1430_v61 = vpop.permute.xlu0 %1429 }
  0xf9   : > { %v1436_v60 = vsel %vm1435_vm10, %v1426_v57, %v1428_v59  ;;  %v1437_v62 = vsel %vm1435_vm10, %v1428_v59, %v1430_v61  ;;  %v2009_v59 = vsel %vm522_vm1, %v4314_v16, 0 }
  0xfa   : > { %2811 = vrot.lane.b32.xlu1 %v4408_v41, %s4174_s8  ;;  %v1444_v63 = vsel %vm522_vm1, %v1436_v60, 0  ;;  %3948 = vmatprep.subr.msk.bf16.mxu0 %vm522_vm1, %v1437_v62  ;;  %s4179_s8 = smov 18  }
  0xfb   : > { %3947 = vmatmul.mubr.msk.bf16.vlgmr.msra.gmra.mxu1 %vm518_vm3, %v457_v53  ;;  %1470 = vmatpush1.bf16.msra.mxu0 %v1444_v63 }
  0xfc   : > { %2919 = vrot.lane.b32.xlu0 %v4314_v16, %s4175_s14  ;;  %v1432_v0 = vpop.permute.xlu1 %1431  ;;  %1528 = vmatprep.mubr.bf16.mxu1 %v4155_v14  ;;  %v1434_v3 = vpop.permute.xlu0 %1433 }
  0xfd   : > { %v1438_v2 = vsel %vm1435_vm10, %v1430_v61, %v1432_v0  ;;  %v1439_v4 = vsel %vm1435_vm10, %v1432_v0, %v1434_v3  ;;  %vm3161_vm10 = vcmask 220160  }
  0xfe   : > { %2921 = vrot.lane.b32.xlu1 %v4310_v15, %s4175_s14  ;;  %3949 = vmatmul.mubr.msk.bf16.vlgmr.msra.gmra.mxu0 %vm518_vm3, %v458_v1  ;;  %v1450_v6 = vsel %vm522_vm1, %v1438_v2, 0 }
  0xff   : > { %3950 = vmatprep.subr.msk.bf16.mxu1 %vm522_vm1, %v1439_v4  ;;  %1603 = vmatprep.mubr.bf16.mxu0 %v4155_v14  ;;  %v463_v4 = vld [vmem:[%s4888_s2 + $0x34] sm:$0xf] }
 0x100   : > { %2923 = vrot.lane.b32.xlu0 %v4322_v17, %s4175_s14  ;;  %v1542_v5 = vpop.permute.xlu1 %1541  ;;  %1511 = vmatpush1.bf16.msra.mxu1 %v1450_v6  ;;  %v1544_v8 = vpop.permute.xlu0 %1543 }
 0x101   : > { %v1552_v9 = vsel %vm1551_vm11, %v1542_v5, %v1544_v8 }
 0x102   : > { %2925 = vrot.lane.b32.xlu1 %v4302_v10, %s4175_s14  ;;  %v1560_v13 = vsel %vm522_vm1, %v1552_v9, 0 }
 0x103   : > { %3951 = vmatmul.mubr.msk.bf16.vlgmr.msra.gmra.mxu1 %vm518_vm3, %v458_v1  ;;  %v2015_v1 = vsel %vm522_vm1, %v4322_v17, 0 }
 0x104   : > { %2927 = vrot.lane.b32.xlu0 %v4408_v41, %s4175_s14  ;;  %v1546_v11 = vpop.permute.xlu1 %1545  ;;  %v1548_v18 = vpop.permute.xlu0 %1547  ;;  %1644 = vmatprep.mubr.bf16.mxu1 %v4155_v14 }
 0x105   : > { %v1553_v12 = vsel %vm1551_vm11, %v1544_v8, %v1546_v11  ;;  %v1554_v20 = vsel %vm1551_vm11, %v1546_v11, %v1548_v18 }
 0x106   : > { %3035 = vrot.lane.b32.xlu1 %v4314_v16, %s4176_s30  ;;  %3952 = vmatprep.subr.msk.bf16.mxu0 %vm522_vm1, %v1553_v12  ;;  %v1566_v24 = vsel %vm522_vm1, %v1554_v20, 0 }
 0x107   : > { %1586 = vmatpush1.bf16.msra.mxu0 %v1560_v13 }
 0x108   : > { %3037 = vrot.lane.b32.xlu0 %v4310_v15, %s4176_s30  ;;  %v1550_v21 = vpop.permute.xlu1 %1549  ;;  %v1658_v23 = vpop.permute.xlu0 %1657 }
 0x109   : > { %v1555_v22 = vsel %vm1551_vm11, %v1548_v18, %v1550_v21  ;;  %v464_v18 = vld [vmem:[%s4888_s2 + $0x38] sm:$0xf]  ;;  %vm3277_vm11 = vcmask 154624  }
 0x10a   : > { %3039 = vrot.lane.b32.xlu1 %v4322_v17, %s4176_s30  ;;  %3953 = vmatmul.mubr.msk.bf16.vlgmr.msra.gmra.mxu0 %vm518_vm3, %v459_v19 }
 0x10b   : > { %3954 = vmatprep.subr.msk.bf16.mxu1 %vm522_vm1, %v1555_v22  ;;  %1719 = vmatprep.mubr.bf16.mxu0 %v4155_v14 }
 0x10c   : > { %1627 = vmatpush1.bf16.msra.mxu1 %v1566_v24  ;;  %3041 = vrot.lane.b32.xlu0 %v4302_v10, %s4176_s30  ;;  %v1660_v25 = vpop.permute.xlu1 %1659  ;;  %v1662_v27 = vpop.permute.xlu0 %1661 }
 0x10d   : > { %v1668_v26 = vsel %vm1667_vm12, %v1658_v23, %v1660_v25  ;;  %v1669_v28 = vsel %vm1667_vm12, %v1660_v25, %v1662_v27  ;;  %v465_v25 = vld [vmem:[%s4888_s2 + $0x3c] sm:$0xf] }
 0x10e   : > { %3043 = vrot.lane.b32.xlu1 %v4408_v41, %s4176_s30  ;;  %v1676_v29 = vsel %vm522_vm1, %v1668_v26, 0  ;;  %3956 = vmatprep.subr.msk.bf16.mxu0 %vm522_vm1, %v1669_v28 }
 0x10f   : > { %3955 = vmatmul.mubr.msk.bf16.vlgmr.msra.gmra.mxu1 %vm518_vm3, %v459_v19  ;;  %1702 = vmatpush1.bf16.msra.mxu0 %v1676_v29 }
 0x110   : > { %3151 = vrot.lane.b32.xlu0 %v4314_v16, %s4177_s19  ;;  %v1664_v30 = vpop.permute.xlu1 %1663  ;;  %1760 = vmatprep.mubr.bf16.mxu1 %v4155_v14  ;;  %v1666_v33 = vpop.permute.xlu0 %1665 }
 0x111   : > { %v1670_v32 = vsel %vm1667_vm12, %v1662_v27, %v1664_v30  ;;  %v1671_v34 = vsel %vm1667_vm12, %v1664_v30, %v1666_v33  ;;  %vm3393_vm12 = vcmask 146432  }
 0x112   : > { %3153 = vrot.lane.b32.xlu1 %v4310_v15, %s4177_s19  ;;  %3957 = vmatmul.mubr.msk.bf16.vlgmr.msra.gmra.mxu0 %vm518_vm3, %v460_v31  ;;  %v1682_v36 = vsel %vm522_vm1, %v1670_v32, 0 }
 0x113   : > { %3958 = vmatprep.subr.msk.bf16.mxu1 %vm522_vm1, %v1671_v34  ;;  %1835 = vmatprep.mubr.bf16.mxu0 %v4155_v14 }
 0x114   : > { %3155 = vrot.lane.b32.xlu0 %v4322_v17, %s4177_s19  ;;  %v1774_v35 = vpop.permute.xlu1 %1773  ;;  %1743 = vmatpush1.bf16.msra.mxu1 %v1682_v36  ;;  %v1776_v37 = vpop.permute.xlu0 %1775 }
 0x115   : > { %v1784_v38 = vsel %vm1783_vm13, %v1774_v35, %v1776_v37  ;;  %v466_v35 = vld [vmem:[%s4888_s2 + $0x40] sm:$0xf] }
 0x116   : > { %3157 = vrot.lane.b32.xlu1 %v4302_v10, %s4177_s19  ;;  %v1792_v42 = vsel %vm522_vm1, %v1784_v38, 0 }
 0x117   : > { %3959 = vmatmul.mubr.msk.bf16.vlgmr.msra.gmra.mxu1 %vm518_vm3, %v460_v31 }
 0x118   : > { %3159 = vrot.lane.b32.xlu0 %v4408_v41, %s4177_s19  ;;  %v1778_v39 = vpop.permute.xlu1 %1777  ;;  %v1780_v43 = vpop.permute.xlu0 %1779  ;;  %1876 = vmatprep.mubr.bf16.mxu1 %v4155_v14 }
 0x119   : > { %v1785_v40 = vsel %vm1783_vm13, %v1776_v37, %v1778_v39  ;;  %v1786_v45 = vsel %vm1783_vm13, %v1778_v39, %v1780_v43 }
 0x11a   : > { %3267 = vrot.lane.b32.xlu1 %v4314_v16, %s4178_s22  ;;  %3960 = vmatprep.subr.msk.bf16.mxu0 %vm522_vm1, %v1785_v40  ;;  %v1798_v49 = vsel %vm522_vm1, %v1786_v45, 0 }
 0x11b   : > { %1818 = vmatpush1.bf16.msra.mxu0 %v1792_v42 }
 0x11c   : > { %3269 = vrot.lane.b32.xlu0 %v4310_v15, %s4178_s22  ;;  %v1782_v46 = vpop.permute.xlu1 %1781  ;;  %v1890_v48 = vpop.permute.xlu0 %1889 }
 0x11d   : > { %v1787_v47 = vsel %vm1783_vm13, %v1780_v43, %v1782_v46  ;;  %v467_v46 = vld [vmem:[%s4888_s2 + $0x44] sm:$0xf]  ;;  %vm3509_vm13 = vcmask 138240  }
 0x11e   : > { %3271 = vrot.lane.b32.xlu1 %v4322_v17, %s4178_s22  ;;  %3961 = vmatmul.mubr.msk.bf16.vlgmr.msra.gmra.mxu0 %vm518_vm3, %v461_v44 }
 0x11f   : > { %3962 = vmatprep.subr.msk.bf16.mxu1 %vm522_vm1, %v1787_v47  ;;  %1951 = vmatprep.mubr.bf16.mxu0 %v4155_v14 }
 0x120   : > { %1859 = vmatpush1.bf16.msra.mxu1 %v1798_v49  ;;  %3273 = vrot.lane.b32.xlu0 %v4302_v10, %s4178_s22  ;;  %v1892_v50 = vpop.permute.xlu1 %1891 }
 0x121   : > { %v1900_v51 = vsel %vm1899_vm14, %v1890_v48, %v1892_v50  ;;  %v1894_v52 = vpop.permute.xlu0 %1893 }
 0x122   : > { %3275 = vrot.lane.b32.xlu1 %v4408_v41, %s4178_s22  ;;  %v1901_v53 = vsel %vm1899_vm14, %v1892_v50, %v1894_v52  ;;  %v1908_v54 = vsel %vm522_vm1, %v1900_v51, 0 }
 0x123   : > { %3963 = vmatmul.mubr.msk.bf16.vlgmr.msra.gmra.mxu1 %vm518_vm3, %v461_v44  ;;  %3964 = vmatprep.subr.msk.bf16.mxu0 %vm522_vm1, %v1901_v53 }
 0x124   : > { %3383 = vrot.lane.b32.xlu0 %v4314_v16, %s4179_s8  ;;  %v1896_v55 = vpop.permute.xlu1 %1895  ;;  %1934 = vmatpush1.bf16.msra.mxu0 %v1908_v54 }
 0x125   : > { %1992 = vmatprep.mubr.bf16.mxu1 %v4155_v14  ;;  %v1902_v57 = vsel %vm1899_vm14, %v1894_v52, %v1896_v55  ;;  %v1898_v58 = vpop.permute.xlu0 %1897  ;;  %3968 = vmatprep.subr.msk.bf16.mxu0 %vm522_vm1, %v4310_v15 }
 0x126   : > { %3385 = vrot.lane.b32.xlu1 %v4310_v15, %s4179_s8  ;;  %v1903_v60 = vsel %vm1899_vm14, %v1896_v55, %v1898_v58  ;;  %v1914_v62 = vsel %vm522_vm1, %v1902_v57, 0  ;;  %v468_v58 = vld [vmem:[%s4888_s2 + $0x48] sm:$0xf] }
 0x127   : > { %3965 = vmatmul.mubr.msk.bf16.vlgmr.msra.gmra.mxu0 %vm518_vm3, %v462_v56  ;;  %3966 = vmatprep.subr.msk.bf16.mxu1 %vm522_vm1, %v1903_v60 }
 0x128   : > { %3387 = vrot.lane.b32.xlu0 %v4322_v17, %s4179_s8  ;;  %v2108_v61 = vpop.permute.xlu1 %2107  ;;  %2035 = vmatpush1.bf16.msra.mxu0 %v2009_v59 }
 0x129   : > { %1975 = vmatpush1.bf16.msra.mxu1 %v1914_v62  ;;  %v2110_v63 = vpop.permute.xlu0 %2109  ;;  %2052 = vmatprep.mubr.bf16.mxu0 %v4155_v14 }
 0x12a   : > { %3389 = vrot.lane.b32.xlu1 %v4302_v10, %s4179_s8  ;;  %3970 = vmatprep.subr.msk.bf16.mxu1 %vm522_vm1, %v4302_v10  ;;  %v2118_v2 = vsel %vm2117_vm15, %v2108_v61, %v2110_v63 }
 0x12b   : > { %v2126_v6 = vsel %vm522_vm1, %v2118_v2, 0 }
 0x12c   : > { %3391 = vrot.lane.b32.xlu0 %v4408_v41, %s4179_s8  ;;  %v2112_v0 = vpop.permute.xlu1 %2111  ;;  %3967 = vmatmul.mubr.msk.bf16.vlgmr.msra.gmra.mxu1 %vm518_vm3, %v462_v56 }
 0x12d   : > { %v2119_v3 = vsel %vm2117_vm15, %v2110_v63, %v2112_v0  ;;  %v2114_v5 = vpop.permute.xlu0 %2113  ;;  %2076 = vmatpush1.bf16.msra.mxu1 %v2015_v1  ;;  %2093 = vmatprep.mubr.bf16.mxu1 %v4155_v14 }
 0x12e   : > { %3499 = vrot.lane.b32.xlu1 %v4314_v16, %s4180_s12  ;;  %3972 = vmatprep.subr.msk.bf16.mxu0 %vm522_vm1, %v2119_v3  ;;  %v2120_v11 = vsel %vm2117_vm15, %v2112_v0, %v2114_v5 }
 0x12f   : > { %3969 = vmatmul.mubr.msk.bf16.vlgmr.msra.gmra.mxu0 %vm518_vm3, %v463_v4 }
 0x130   : > { %3501 = vrot.lane.b32.xlu0 %v4310_v15, %s4180_s12  ;;  %v2116_v8 = vpop.permute.xlu1 %2115  ;;  %2152 = vmatpush1.bf16.msra.mxu0 %v2126_v6  ;;  %v2132_v15 = vsel %vm522_vm1, %v2120_v11, 0  ;;  %v469_v6 = vld [vmem:[%s4888_s2 + $0x4c] sm:$0xf] }
 0x131   : > { %v2121_v9 = vsel %vm2117_vm15, %v2114_v5, %v2116_v8  ;;  %2169 = vmatprep.mubr.bf16.mxu0 %v4155_v14  ;;  %v2224_v16 = vpop.permute.xlu0 %2223 }
 0x132   : > { %3503 = vrot.lane.b32.xlu1 %v4322_v17, %s4180_s12  ;;  %3974 = vmatprep.subr.msk.bf16.mxu1 %vm522_vm1, %v2121_v9 }
 0x134   : > { %3505 = vrot.lane.b32.xlu0 %v4302_v10, %s4180_s12  ;;  %v2226_v12 = vpop.permute.xlu1 %2225  ;;  %3971 = vmatmul.mubr.msk.bf16.vlgmr.msra.gmra.mxu1 %vm518_vm3, %v463_v4 }
 0x135   : > { %v2234_v13 = vsel %vm2233_vm0, %v2224_v16, %v2226_v12  ;;  %2193 = vmatpush1.bf16.msra.mxu1 %v2132_v15  ;;  %v2228_v19 = vpop.permute.xlu0 %2227  ;;  %2210 = vmatprep.mubr.bf16.mxu1 %v4155_v14 }
 0x136   : > { %3507 = vrot.lane.b32.xlu1 %v4408_v41, %s4180_s12  ;;  %v2235_v17 = vsel %vm2233_vm0, %v2226_v12, %v2228_v19  ;;  %v2242_v10 = vsel %vm522_vm1, %v2234_v13, 0 }
 0x137   : > { %3973 = vmatmul.mubr.msk.bf16.vlgmr.msra.gmra.mxu0 %vm518_vm3, %v464_v18  ;;  %3976 = vmatprep.subr.msk.bf16.mxu0 %vm522_vm1, %v2235_v17 }
 0x138   : > { %v2230_v20 = vpop.permute.xlu1 %2229  ;;  %2268 = vmatpush1.bf16.msra.mxu0 %v2242_v10  ;;  %2285 = vmatprep.mubr.bf16.mxu0 %v4155_v14 }
 0x139   : > { %v2236_v21 = vsel %vm2233_vm0, %v2228_v19, %v2230_v20  ;;  %v2232_v22 = vpop.permute.xlu0 %2231 }
 0x13a   : > { %v2237_v23 = vsel %vm2233_vm0, %v2230_v20, %v2232_v22  ;;  %v2248_v24 = vsel %vm522_vm1, %v2236_v21, 0  ;;  %v470_v20 = vld [vmem:[%s4888_s2 + $0x50] sm:$0xf] }
 0x13b   : > { %3978 = vmatprep.subr.msk.bf16.mxu1 %vm522_vm1, %v2237_v23 }
 0x13c   : > { %v2340_v41 = vpop.permute.xlu1 %2339  ;;  %3975 = vmatmul.mubr.msk.bf16.vlgmr.msra.gmra.mxu1 %vm518_vm3, %v464_v18 }
 0x13d   : > { %2309 = vmatpush1.bf16.msra.mxu1 %v2248_v24  ;;  %2326 = vmatprep.mubr.bf16.mxu1 %v4155_v14 }
 0x13e   : > { %v2342_v26 = vpop.permute.xlu0 %2341 }
 0x13f   : > { %v2350_v27 = vsel %vm2349_vm2, %v2340_v41, %v2342_v26  ;;  %3977 = vmatmul.mubr.msk.bf16.vlgmr.msra.gmra.mxu0 %vm518_vm3, %v465_v25 }
 0x140   : > { %v2344_v28 = vpop.permute.xlu1 %2343  ;;  %2401 = vmatprep.mubr.bf16.mxu0 %v4155_v14  ;;  %v2358_v30 = vsel %vm522_vm1, %v2350_v27, 0 }
 0x141   : > { %v2351_v29 = vsel %vm2349_vm2, %v2342_v26, %v2344_v28 }
 0x142   : > { %v2346_v31 = vpop.permute.xlu0 %2345  ;;  %3980 = vmatprep.subr.msk.bf16.mxu0 %vm522_vm1, %v2351_v29 }
 0x143   : > { %v2352_v32 = vsel %vm2349_vm2, %v2344_v28, %v2346_v31  ;;  %2384 = vmatpush1.bf16.msra.mxu0 %v2358_v30 }
 0x144   : > { %v2348_v33 = vpop.permute.xlu1 %2347  ;;  %3979 = vmatmul.mubr.msk.bf16.vlgmr.msra.gmra.mxu1 %vm518_vm3, %v465_v25  ;;  %v2364_v36 = vsel %vm522_vm1, %v2352_v32, 0 }
 0x145   : > { %v2353_v34 = vsel %vm2349_vm2, %v2346_v31, %v2348_v33  ;;  %2442 = vmatprep.mubr.bf16.mxu1 %v4155_v14  ;;  %v471_v31 = vld [vmem:[%s4888_s2 + $0x54] sm:$0xf] }
 0x146   : > { %v2456_v37 = vpop.permute.xlu0 %2455  ;;  %3982 = vmatprep.subr.msk.bf16.mxu1 %vm522_vm1, %v2353_v34 }
 0x147   : > { %2425 = vmatpush1.bf16.msra.mxu1 %v2364_v36  ;;  %3981 = vmatmul.mubr.msk.bf16.vlgmr.msra.gmra.mxu0 %vm518_vm3, %v466_v35 }
 0x148   : > { %v2458_v38 = vpop.permute.xlu1 %2457  ;;  %2517 = vmatprep.mubr.bf16.mxu0 %v4155_v14 }
 0x149   : > { %v2466_v39 = vsel %vm2465_vm4, %v2456_v37, %v2458_v38 }
 0x14a   : > { %v2460_v40 = vpop.permute.xlu0 %2459  ;;  %v2474_v43 = vsel %vm522_vm1, %v2466_v39, 0 }
 0x14b   : > { %v2467_v42 = vsel %vm2465_vm4, %v2458_v38, %v2460_v40 }
 0x14c   : > { %3984 = vmatprep.subr.msk.bf16.mxu0 %vm522_vm1, %v2467_v42  ;;  %v2462_v44 = vpop.permute.xlu1 %2461  ;;  %3983 = vmatmul.mubr.msk.bf16.vlgmr.msra.gmra.mxu1 %vm518_vm3, %v466_v35 }
 0x14d   : > { %v2468_v45 = vsel %vm2465_vm4, %v2460_v40, %v2462_v44  ;;  %2500 = vmatpush1.bf16.msra.mxu0 %v2474_v43  ;;  %2558 = vmatprep.mubr.bf16.mxu1 %v4155_v14 }
 0x14e   : > { %v2464_v47 = vpop.permute.xlu0 %2463  ;;  %v2480_v49 = vsel %vm522_vm1, %v2468_v45, 0 }
 0x14f   : > { %v2469_v48 = vsel %vm2465_vm4, %v2462_v44, %v2464_v47 }
 0x150   : > { %3985 = vmatmul.mubr.msk.bf16.vlgmr.msra.gmra.mxu0 %vm518_vm3, %v467_v46  ;;  %v2572_v50 = vpop.permute.xlu1 %2571  ;;  %3986 = vmatprep.subr.msk.bf16.mxu1 %vm522_vm1, %v2469_v48 }
 0x151   : > { %2541 = vmatpush1.bf16.msra.mxu1 %v2480_v49  ;;  %2633 = vmatprep.mubr.bf16.mxu0 %v4155_v14 }
 0x152   : > { %v2574_v51 = vpop.permute.xlu0 %2573 }
 0x153   : > { %v2582_v52 = vsel %vm2581_vm5, %v2572_v50, %v2574_v51 }
 0x154   : > { %v2576_v53 = vpop.permute.xlu1 %2575  ;;  %3987 = vmatmul.mubr.msk.bf16.vlgmr.msra.gmra.mxu1 %vm518_vm3, %v467_v46  ;;  %v2590_v55 = vsel %vm522_vm1, %v2582_v52, 0  ;;  %v472_v52 = vld [vmem:[%s4888_s2 + $0x58] sm:$0xf] }
 0x155   : > { %v2583_v54 = vsel %vm2581_vm5, %v2574_v51, %v2576_v53  ;;  %2674 = vmatprep.mubr.bf16.mxu1 %v4155_v14 }
 0x156   : > { %v2578_v56 = vpop.permute.xlu0 %2577  ;;  %3988 = vmatprep.subr.msk.bf16.mxu0 %vm522_vm1, %v2583_v54 }
 0x157   : > { %v2584_v57 = vsel %vm2581_vm5, %v2576_v53, %v2578_v56  ;;  %2616 = vmatpush1.bf16.msra.mxu0 %v2590_v55 }
 0x158   : > { %v2580_v59 = vpop.permute.xlu1 %2579  ;;  %v2596_v61 = vsel %vm522_vm1, %v2584_v57, 0 }
 0x159   : > { %v2585_v60 = vsel %vm2581_vm5, %v2578_v56, %v2580_v59 }
 0x15a   : > { %v2688_v62 = vpop.permute.xlu0 %2687  ;;  %3989 = vmatmul.mubr.msk.bf16.vlgmr.msra.gmra.mxu0 %vm518_vm3, %v468_v58  ;;  %3990 = vmatprep.subr.msk.bf16.mxu1 %vm522_vm1, %v2585_v60 }
 0x15b   : > { %2657 = vmatpush1.bf16.msra.mxu1 %v2596_v61  ;;  %2749 = vmatprep.mubr.bf16.mxu0 %v4155_v14 }
 0x15c   : > { %v2690_v63 = vpop.permute.xlu1 %2689 }
 0x15d   : > { %v2698_v0 = vsel %vm2697_vm6, %v2688_v62, %v2690_v63 }
 0x15e   : > { %v2692_v1 = vpop.permute.xlu0 %2691  ;;  %3991 = vmatmul.mubr.msk.bf16.vlgmr.msra.gmra.mxu1 %vm518_vm3, %v468_v58  ;;  %v2706_v3 = vsel %vm522_vm1, %v2698_v0, 0 }
 0x15f   : > { %v2699_v2 = vsel %vm2697_vm6, %v2690_v63, %v2692_v1  ;;  %2790 = vmatprep.mubr.bf16.mxu1 %v4155_v14 }
 0x160   : > { %3992 = vmatprep.subr.msk.bf16.mxu0 %vm522_vm1, %v2699_v2  ;;  %v2694_v4 = vpop.permute.xlu1 %2693 }
 0x161   : > { %v2700_v5 = vsel %vm2697_vm6, %v2692_v1, %v2694_v4  ;;  %2732 = vmatpush1.bf16.msra.mxu0 %v2706_v3 }
 0x162   : > { %v2696_v8 = vpop.permute.xlu0 %2695  ;;  %v2712_v11 = vsel %vm522_vm1, %v2700_v5, 0 }
 0x163   : > { %v2701_v9 = vsel %vm2697_vm6, %v2694_v4, %v2696_v8 }
 0x164   : > { %3993 = vmatmul.mubr.msk.bf16.vlgmr.msra.gmra.mxu0 %vm518_vm3, %v469_v6  ;;  %v2804_v16 = vpop.permute.xlu1 %2803  ;;  %3994 = vmatprep.subr.msk.bf16.mxu1 %vm522_vm1, %v2701_v9 }
 0x165   : > { %2773 = vmatpush1.bf16.msra.mxu1 %v2712_v11  ;;  %2865 = vmatprep.mubr.bf16.mxu0 %v4155_v14 }
 0x166   : > { %v2806_v12 = vpop.permute.xlu0 %2805 }
 0x167   : > { %v2814_v15 = vsel %vm2813_vm7, %v2804_v16, %v2806_v12 }
 0x168   : > { %v2808_v13 = vpop.permute.xlu1 %2807  ;;  %3995 = vmatmul.mubr.msk.bf16.vlgmr.msra.gmra.mxu1 %vm518_vm3, %v469_v6  ;;  %v2822_v19 = vsel %vm522_vm1, %v2814_v15, 0 }
 0x169   : > { %v2815_v18 = vsel %vm2813_vm7, %v2806_v12, %v2808_v13  ;;  %2906 = vmatprep.mubr.bf16.mxu1 %v4155_v14 }
 0x16a   : > { %v2810_v17 = vpop.permute.xlu0 %2809  ;;  %3996 = vmatprep.subr.msk.bf16.mxu0 %vm522_vm1, %v2815_v18 }
 0x16b   : > { %v2816_v10 = vsel %vm2813_vm7, %v2808_v13, %v2810_v17  ;;  %2848 = vmatpush1.bf16.msra.mxu0 %v2822_v19  ;;  %v473_v19 = vld [vmem:[%s4888_s2 + $0x5c] sm:$0xf] }
 0x16c   : > { %v2812_v21 = vpop.permute.xlu1 %2811  ;;  %v2828_v23 = vsel %vm522_vm1, %v2816_v10, 0 }
 0x16d   : > { %v2817_v22 = vsel %vm2813_vm7, %v2810_v17, %v2812_v21 }
 0x16e   : > { %v2920_v41 = vpop.permute.xlu0 %2919  ;;  %3997 = vmatmul.mubr.msk.bf16.vlgmr.msra.gmra.mxu0 %vm518_vm3, %v470_v20  ;;  %3998 = vmatprep.subr.msk.bf16.mxu1 %vm522_vm1, %v2817_v22 }
 0x16f   : > { %2889 = vmatpush1.bf16.msra.mxu1 %v2828_v23  ;;  %2981 = vmatprep.mubr.bf16.mxu0 %v4155_v14 }
 0x170   : > { %v2922_v24 = vpop.permute.xlu1 %2921 }
 0x171   : > { %v2930_v25 = vsel %vm2929_vm8, %v2920_v41, %v2922_v24 }
 0x172   : > { %v2924_v26 = vpop.permute.xlu0 %2923  ;;  %3999 = vmatmul.mubr.msk.bf16.vlgmr.msra.gmra.mxu1 %vm518_vm3, %v470_v20  ;;  %v2938_v28 = vsel %vm522_vm1, %v2930_v25, 0 }
 0x173   : > { %v2931_v27 = vsel %vm2929_vm8, %v2922_v24, %v2924_v26  ;;  %3022 = vmatprep.mubr.bf16.mxu1 %v4155_v14  ;;  %v569_v32 = vpop.f32.mrf.mxu0 }
 0x174   : > { %4000 = vmatprep.subr.msk.bf16.mxu0 %vm522_vm1, %v2931_v27  ;;  %v2926_v29 = vpop.permute.xlu1 %2925 }
 0x175   : > { %v2932_v30 = vsel %vm2929_vm8, %v2924_v26, %v2926_v29  ;;  %2964 = vmatpush1.bf16.msra.mxu0 %v2938_v28  ;;  %v571_v35 = vpop.f32.mrf.mxu0 }
 0x176   : > { %v2928_v33 = vpop.permute.xlu0 %2927  ;;  %v2944_v36 = vsel %vm522_vm1, %v2932_v30, 0 }
 0x177   : > { %v2933_v34 = vsel %vm2929_vm8, %v2926_v29, %v2928_v33  ;;  %v573_v38 = vpop.f32.mrf.mxu0 }
 0x178   : > { %4001 = vmatmul.mubr.msk.bf16.vlgmr.msra.gmra.mxu0 %vm518_vm3, %v471_v31  ;;  %v3036_v37 = vpop.permute.xlu1 %3035  ;;  %4002 = vmatprep.subr.msk.bf16.mxu1 %vm522_vm1, %v2933_v34 }
 0x179   : > { %3005 = vmatpush1.bf16.msra.mxu1 %v2944_v36  ;;  %3097 = vmatprep.mubr.bf16.mxu0 %v4155_v14  ;;  %v574_v43 = vpop.f32.mrf.mxu0 }
 0x17a   : > { %v3038_v39 = vpop.permute.xlu0 %3037 }
 0x17b   : > { %v3046_v40 = vsel %vm3045_vm9, %v3036_v37, %v3038_v39  ;;  %v610_v42 = vpop.f32.mrf.mxu1 }
 0x17c   : > { %v3040_v44 = vpop.permute.xlu1 %3039  ;;  %4003 = vmatmul.mubr.msk.bf16.vlgmr.msra.gmra.mxu1 %vm518_vm3, %v471_v31  ;;  %v681_v47 = vpop.f32.mrf.mxu0  ;;  %v3054_v48 = vsel %vm522_vm1, %v3046_v40, 0 }
 0x17d   : > { %v3047_v45 = vsel %vm3045_vm9, %v3038_v39, %v3040_v44  ;;  %v612_v46 = vpop.f32.mrf.mxu1  ;;  %3138 = vmatprep.mubr.bf16.mxu1 %v4155_v14  ;;  %v682_v50 = vadd.f32 %v681_v47, %v569_v32 }
 0x17e   : > { %v3042_v49 = vpop.permute.xlu0 %3041  ;;  %4004 = vmatprep.subr.msk.bf16.mxu0 %vm522_vm1, %v3047_v45  ;;  %v683_v54 = vpop.f32.mrf.mxu0 }
 0x17f   : > { %v3048_v51 = vsel %vm3045_vm9, %v3040_v44, %v3042_v49  ;;  %3080 = vmatpush1.bf16.msra.mxu0 %v3054_v48  ;;  %v614_v53 = vpop.f32.mrf.mxu1  ;;  %v684_v56 = vadd.f32 %v683_v54, %v571_v35 }
 0x180   : > { %v3044_v55 = vpop.permute.xlu1 %3043  ;;  %v685_v59 = vpop.f32.mrf.mxu0  ;;  %v3060_v60 = vsel %vm522_vm1, %v3048_v51, 0 }
 0x181   : > { %v3049_v57 = vsel %vm3045_vm9, %v3042_v49, %v3044_v55  ;;  %v615_v58 = vpop.f32.mrf.mxu1 }
 0x182   : > { %v3152_v61 = vpop.permute.xlu0 %3151  ;;  %4005 = vmatmul.mubr.msk.bf16.vlgmr.msra.gmra.mxu0 %vm518_vm3, %v472_v52  ;;  %4006 = vmatprep.subr.msk.bf16.mxu1 %vm522_vm1, %v3049_v57  ;;  %v686_v63 = vpop.f32.mrf.mxu0 }
 0x183   : > { %3121 = vmatpush1.bf16.msra.mxu1 %v3060_v60  ;;  %v722_v62 = vpop.f32.mrf.mxu1  ;;  %3213 = vmatprep.mubr.bf16.mxu0 %v4155_v14 }
 0x184   : > { %v3154_v0 = vpop.permute.xlu1 %3153  ;;  %v723_v1 = vadd.f32 %v722_v62, %v610_v42  ;;  %v793_v4 = vpop.f32.mrf.mxu0  ;;  %v474_v42 = vld [vmem:[%s4888_s2 + $0x60] sm:$0xf] }
 0x185   : > { %v3162_v2 = vsel %vm3161_vm10, %v3152_v61, %v3154_v0  ;;  %v724_v3 = vpop.f32.mrf.mxu1  ;;  %v841_v8 = vadd.f32 %v793_v4, %v682_v50 }
 0x186   : > { %v3156_v5 = vpop.permute.xlu0 %3155  ;;  %4007 = vmatmul.mubr.msk.bf16.vlgmr.msra.gmra.mxu1 %vm518_vm3, %v472_v52  ;;  %v725_v6 = vadd.f32 %v724_v3, %v612_v46  ;;  %v795_v16 = vpop.f32.mrf.mxu0  ;;  %v3170_v12 = vsel %vm522_vm1, %v3162_v2, 0 }
 0x187   : > { %v3163_v9 = vsel %vm3161_vm10, %v3154_v0, %v3156_v5  ;;  %v726_v11 = vpop.f32.mrf.mxu1  ;;  %3254 = vmatprep.mubr.bf16.mxu1 %v4155_v14  ;;  %v842_v13 = vadd.f32 %v795_v16, %v684_v56 }
 0x188   : > { %4008 = vmatprep.subr.msk.bf16.mxu0 %vm522_vm1, %v3163_v9  ;;  %v3158_v15 = vpop.permute.xlu1 %3157  ;;  %v797_v10 = vpop.f32.mrf.mxu0 }
 0x189   : > { %v3164_v18 = vsel %vm3161_vm10, %v3156_v5, %v3158_v15  ;;  %3196 = vmatpush1.bf16.msra.mxu0 %v3170_v12  ;;  %v727_v17 = vpop.f32.mrf.mxu1  ;;  %v475_v5 = vld [vmem:[%s4888_s2 + $0x64] sm:$0xf] }
 0x18a   : > { %v3160_v20 = vpop.permute.xlu0 %3159  ;;  %v798_v23 = vpop.f32.mrf.mxu0  ;;  %v3176_v41 = vsel %vm522_vm1, %v3164_v18, 0 }
 0x18b   : > { %v3165_v21 = vsel %vm3161_vm10, %v3158_v15, %v3160_v20  ;;  %v834_v22 = vpop.f32.mrf.mxu1 }
 0x18c   : > { %4009 = vmatmul.mubr.msk.bf16.vlgmr.msra.gmra.mxu0 %vm518_vm3, %v473_v19  ;;  %v3268_v24 = vpop.permute.xlu1 %3267  ;;  %4010 = vmatprep.subr.msk.bf16.mxu1 %vm522_vm1, %v3165_v21  ;;  %v843_v25 = vadd.f32 %v834_v22, %v723_v1 }
 0x18d   : > { %3237 = vmatpush1.bf16.msra.mxu1 %v3176_v41  ;;  %v836_v26 = vpop.f32.mrf.mxu1  ;;  %3329 = vmatprep.mubr.bf16.mxu0 %v4155_v14 }
 0x18e   : > { %v3270_v27 = vpop.permute.xlu0 %3269  ;;  %v844_v28 = vadd.f32 %v836_v26, %v725_v6 }
 0x18f   : > { %v3278_v29 = vsel %vm3277_vm11, %v3268_v24, %v3270_v27  ;;  %v838_v30 = vpop.f32.mrf.mxu1  ;;  %v909_v31 = vpop.f32.mrf.mxu0 }
 0x190   : > { %v3272_v32 = vpop.permute.xlu1 %3271  ;;  %4011 = vmatmul.mubr.msk.bf16.vlgmr.msra.gmra.mxu1 %vm518_vm3, %v473_v19  ;;  %v957_v33 = vadd.f32 %v909_v31, %v841_v8  ;;  %v3286_v37 = vsel %vm522_vm1, %v3278_v29, 0  ;;  %v476_v30 = vld [vmem:[%s4888_s2 + $0x68] sm:$0xf] }
 0x191   : > { %v3279_v34 = vsel %vm3277_vm11, %v3270_v27, %v3272_v32  ;;  %v839_v35 = vpop.f32.mrf.mxu1  ;;  %v911_v36 = vpop.f32.mrf.mxu0  ;;  %3370 = vmatprep.mubr.bf16.mxu1 %v4155_v14 }
 0x192   : > { %v3274_v38 = vpop.permute.xlu0 %3273  ;;  %4012 = vmatprep.subr.msk.bf16.mxu0 %vm522_vm1, %v3279_v34  ;;  %v958_v39 = vadd.f32 %v911_v36, %v842_v13 }
 0x193   : > { %v3280_v40 = vsel %vm3277_vm11, %v3272_v32, %v3274_v38  ;;  %3312 = vmatpush1.bf16.msra.mxu0 %v3286_v37  ;;  %v913_v43 = vpop.f32.mrf.mxu0  ;;  %v950_v44 = vpop.f32.mrf.mxu1 }
 0x194   : > { %v3276_v45 = vpop.permute.xlu1 %3275  ;;  %v959_v46 = vadd.f32 %v950_v44, %v843_v25  ;;  %v3292_v50 = vsel %vm522_vm1, %v3280_v40, 0 }
 0x195   : > { %v3281_v47 = vsel %vm3277_vm11, %v3274_v38, %v3276_v45  ;;  %v914_v48 = vpop.f32.mrf.mxu0  ;;  %v952_v49 = vpop.f32.mrf.mxu1 }
 0x196   : > { %v3384_v51 = vpop.permute.xlu0 %3383  ;;  %4013 = vmatmul.mubr.msk.bf16.vlgmr.msra.gmra.mxu0 %vm518_vm3, %v474_v42  ;;  %4014 = vmatprep.subr.msk.bf16.mxu1 %vm522_vm1, %v3281_v47  ;;  %v960_v52 = vadd.f32 %v952_v49, %v844_v28 }
 0x197   : > { %3353 = vmatpush1.bf16.msra.mxu1 %v3292_v50  ;;  %v954_v53 = vpop.f32.mrf.mxu1  ;;  %3445 = vmatprep.mubr.bf16.mxu0 %v4155_v14  ;;  %v1025_v56 = vpop.f32.mrf.mxu0 }
 0x198   : > { %v3386_v54 = vpop.permute.xlu1 %3385  ;;  %v1073_v59 = vadd.f32 %v1025_v56, %v957_v33 }
 0x199   : > { %v3394_v55 = vsel %vm3393_vm12, %v3384_v51, %v3386_v54  ;;  %v955_v57 = vpop.f32.mrf.mxu1  ;;  %v1027_v61 = vpop.f32.mrf.mxu0 }
 0x19a   : > { %v3388_v58 = vpop.permute.xlu0 %3387  ;;  %4015 = vmatmul.mubr.msk.bf16.vlgmr.msra.gmra.mxu1 %vm518_vm3, %v474_v42  ;;  %v3402_v62 = vsel %vm522_vm1, %v3394_v55, 0  ;;  %v1074_v0 = vadd.f32 %v1027_v61, %v958_v39 }
 0x19b   : > { %v3395_v60 = vsel %vm3393_vm12, %v3386_v54, %v3388_v58  ;;  %3486 = vmatprep.mubr.bf16.mxu1 %v4155_v14  ;;  %v1066_v1 = vpop.f32.mrf.mxu1  ;;  %v1029_v3 = vpop.f32.mrf.mxu0 }
 0x19c   : > { %4016 = vmatprep.subr.msk.bf16.mxu0 %vm522_vm1, %v3395_v60  ;;  %v3390_v63 = vpop.permute.xlu1 %3389  ;;  %v1075_v4 = vadd.f32 %v1066_v1, %v959_v46 }
 0x19d   : > { %v3396_v2 = vsel %vm3393_vm12, %v3388_v58, %v3390_v63  ;;  %3428 = vmatpush1.bf16.msra.mxu0 %v3402_v62  ;;  %v1068_v8 = vpop.f32.mrf.mxu1  ;;  %v1030_v11 = vpop.f32.mrf.mxu0 }
 0x19e   : > { %v3392_v6 = vpop.permute.xlu0 %3391  ;;  %v1076_v16 = vadd.f32 %v1068_v8, %v960_v52  ;;  %v3408_v12 = vsel %vm522_vm1, %v3396_v2, 0 }
 0x19f   : > { %v3397_v9 = vsel %vm3393_vm12, %v3390_v63, %v3392_v6  ;;  %v1070_v13 = vpop.f32.mrf.mxu1 }
 0x1a0   : > { %4017 = vmatmul.mubr.msk.bf16.vlgmr.msra.gmra.mxu0 %vm518_vm3, %v475_v5  ;;  %v3500_v15 = vpop.permute.xlu1 %3499  ;;  %4018 = vmatprep.subr.msk.bf16.mxu1 %vm522_vm1, %v3397_v9 }
 0x1a1   : > { %3469 = vmatpush1.bf16.msra.mxu1 %v3408_v12  ;;  %3561 = vmatprep.mubr.bf16.mxu0 %v4155_v14  ;;  %v1071_v19 = vpop.f32.mrf.mxu1 }
 0x1a2   : > { %v3502_v18 = vpop.permute.xlu0 %3501 }
 0x1a3   : > { %v3510_v17 = vsel %vm3509_vm13, %v3500_v15, %v3502_v18  ;;  %v1141_v10 = vpop.f32.mrf.mxu0 }
 0x1a4   : > { %v1189_v20 = vadd.f32 %v1141_v10, %v1073_v59  ;;  %v3504_v21 = vpop.permute.xlu1 %3503  ;;  %4019 = vmatmul.mubr.msk.bf16.vlgmr.msra.gmra.mxu1 %vm518_vm3, %v475_v5  ;;  %v3518_v41 = vsel %vm522_vm1, %v3510_v17, 0 }
 0x1a5   : > { %v3511_v22 = vsel %vm3509_vm13, %v3502_v18, %v3504_v21  ;;  %v1143_v23 = vpop.f32.mrf.mxu0  ;;  %3602 = vmatprep.mubr.bf16.mxu1 %v4155_v14 }
 0x1a6   : > { %v3506_v24 = vpop.permute.xlu0 %3505  ;;  %v1190_v25 = vadd.f32 %v1143_v23, %v1074_v0  ;;  %4020 = vmatprep.subr.msk.bf16.mxu0 %vm522_vm1, %v3511_v22  ;;  %v1182_v26 = vpop.f32.mrf.mxu1 }
 0x1a7   : > { %v3512_v27 = vsel %vm3509_vm13, %v3504_v21, %v3506_v24  ;;  %3544 = vmatpush1.bf16.msra.mxu0 %v3518_v41  ;;  %v1145_v28 = vpop.f32.mrf.mxu0  ;;  %v1191_v29 = vadd.f32 %v1182_v26, %v1075_v4 }
 0x1a8   : > { %v3508_v31 = vpop.permute.xlu1 %3507  ;;  %v1184_v32 = vpop.f32.mrf.mxu1  ;;  %v3524_v36 = vsel %vm522_vm1, %v3512_v27, 0 }
 0x1a9   : > { %v3513_v33 = vsel %vm3509_vm13, %v3506_v24, %v3508_v31  ;;  %v1146_v34 = vpop.f32.mrf.mxu0  ;;  %v1192_v35 = vadd.f32 %v1184_v32, %v1076_v16 }
 0x1aa   : > { %4021 = vmatmul.mubr.msk.bf16.vlgmr.msra.gmra.mxu0 %vm518_vm3, %v476_v30  ;;  %4022 = vmatprep.subr.msk.bf16.mxu1 %vm522_vm1, %v3513_v33  ;;  %v1186_v37 = vpop.f32.mrf.mxu1 }
 0x1ab   : > { %3585 = vmatpush1.bf16.msra.mxu1 %v3524_v36  ;;  %v1257_v38 = vpop.f32.mrf.mxu0 }
 0x1ac   : > { %v1187_v39 = vpop.f32.mrf.mxu1  ;;  %v1305_v40 = vadd.f32 %v1257_v38, %v1189_v20 }
 0x1ad   : > { %v1259_v42 = vpop.f32.mrf.mxu0 }
 0x1ae   : > { %4023 = vmatmul.mubr.msk.bf16.vlgmr.msra.gmra.mxu1 %vm518_vm3, %v476_v30  ;;  %v1306_v43 = vadd.f32 %v1259_v42, %v1190_v25  ;;  %v1298_v45 = vpop.f32.mrf.mxu1 }
 0x1af   : > { %v1261_v44 = vpop.f32.mrf.mxu0  ;;  %v1307_v46 = vadd.f32 %v1298_v45, %v1191_v29 }
 0x1b0   : > { %v1300_v48 = vpop.f32.mrf.mxu1 }
 0x1b1   : > { %v1262_v47 = vpop.f32.mrf.mxu0  ;;  %v1308_v49 = vadd.f32 %v1300_v48, %v1192_v35 }
 0x1b2   : > { %v1302_v50 = vpop.f32.mrf.mxu1 }
 0x1b4   : > { %v1303_v53 = vpop.f32.mrf.mxu1 }
 0x1b6   : > { %v1373_v51 = vpop.f32.mrf.mxu0 }
 0x1b7   : > { %v1421_v52 = vadd.f32 %v1373_v51, %v1305_v40 }
 0x1b8   : > { %v1375_v54 = vpop.f32.mrf.mxu0 }
 0x1b9   : > { %v1422_v55 = vadd.f32 %v1375_v54, %v1306_v43 }
 0x1ba   : > { %v1377_v56 = vpop.f32.mrf.mxu0 }
 0x1bb   : > { %v1414_v57 = vpop.f32.mrf.mxu1 }
 0x1bc   : > { %v1423_v58 = vadd.f32 %v1414_v57, %v1307_v46  ;;  %v1378_v59 = vpop.f32.mrf.mxu0 }
 0x1bd   : > { %v1416_v60 = vpop.f32.mrf.mxu1 }
 0x1be   : > { %v1424_v61 = vadd.f32 %v1416_v60, %v1308_v49  ;;  %v1489_v63 = vpop.f32.mrf.mxu0 }
 0x1bf   : > { %v1418_v62 = vpop.f32.mrf.mxu1  ;;  %v1537_v0 = vadd.f32 %v1489_v63, %v1421_v52 }
 0x1c0   : > { %v1491_v2 = vpop.f32.mrf.mxu0 }
 0x1c1   : > { %v1419_v1 = vpop.f32.mrf.mxu1  ;;  %v1538_v3 = vadd.f32 %v1491_v2, %v1422_v55 }
 0x1c2   : > { %v1493_v4 = vpop.f32.mrf.mxu0 }
 0x1c3   : > { %v1530_v5 = vpop.f32.mrf.mxu1 }
 0x1c4   : > { %v1539_v6 = vadd.f32 %v1530_v5, %v1423_v58  ;;  %v1494_v8 = vpop.f32.mrf.mxu0 }
 0x1c5   : > { %v1532_v9 = vpop.f32.mrf.mxu1 }
 0x1c6   : > { %v1540_v11 = vadd.f32 %v1532_v9, %v1424_v61 }
 0x1c7   : > { %v1534_v16 = vpop.f32.mrf.mxu1 }
 0x1c9   : > { %v1535_v13 = vpop.f32.mrf.mxu1 }
 0x1ca   : > { %v1605_v12 = vpop.f32.mrf.mxu0 }
 0x1cb   : > { %v1653_v15 = vadd.f32 %v1605_v12, %v1537_v0 }
 0x1cc   : > { %v1607_v18 = vpop.f32.mrf.mxu0 }
 0x1cd   : > { %v1654_v19 = vadd.f32 %v1607_v18, %v1538_v3 }
 0x1ce   : > { %v1609_v17 = vpop.f32.mrf.mxu0 }
 0x1cf   : > { %v1646_v10 = vpop.f32.mrf.mxu1 }
 0x1d0   : > { %v1655_v20 = vadd.f32 %v1646_v10, %v1539_v6  ;;  %v1610_v21 = vpop.f32.mrf.mxu0 }
 0x1d1   : > { %v1648_v22 = vpop.f32.mrf.mxu1 }
 0x1d2   : > { %v1656_v23 = vadd.f32 %v1648_v22, %v1540_v11  ;;  %v1721_v24 = vpop.f32.mrf.mxu0 }
 0x1d3   : > { %v1650_v41 = vpop.f32.mrf.mxu1  ;;  %v1769_v25 = vadd.f32 %v1721_v24, %v1653_v15 }
 0x1d4   : > { %v1723_v27 = vpop.f32.mrf.mxu0 }
 0x1d5   : > { %v1651_v26 = vpop.f32.mrf.mxu1  ;;  %v1770_v28 = vadd.f32 %v1723_v27, %v1654_v19 }
 0x1d6   : > { %v1725_v29 = vpop.f32.mrf.mxu0 }
 0x1d7   : > { %v1762_v30 = vpop.f32.mrf.mxu1 }
 0x1d8   : > { %v1771_v31 = vadd.f32 %v1762_v30, %v1655_v20  ;;  %v1726_v32 = vpop.f32.mrf.mxu0 }
 0x1d9   : > { %v1764_v33 = vpop.f32.mrf.mxu1 }
 0x1da   : > { %v1772_v34 = vadd.f32 %v1764_v33, %v1656_v23 }
 0x1db   : > { %v1766_v35 = vpop.f32.mrf.mxu1 }
 0x1dd   : > { %v1767_v38 = vpop.f32.mrf.mxu1 }
 0x1de   : > { %v1837_v36 = vpop.f32.mrf.mxu0 }
 0x1df   : > { %v1885_v37 = vadd.f32 %v1837_v36, %v1769_v25 }
 0x1e0   : > { %v1839_v39 = vpop.f32.mrf.mxu0 }
 0x1e1   : > { %v1886_v40 = vadd.f32 %v1839_v39, %v1770_v28 }
 0x1e2   : > { %v1841_v42 = vpop.f32.mrf.mxu0 }
 0x1e3   : > { %v1878_v43 = vpop.f32.mrf.mxu1 }
 0x1e4   : > { %v1887_v44 = vadd.f32 %v1878_v43, %v1771_v31  ;;  %v1842_v45 = vpop.f32.mrf.mxu0 }
 0x1e5   : > { %v1880_v46 = vpop.f32.mrf.mxu1 }
 0x1e6   : > { %v1888_v47 = vadd.f32 %v1880_v46, %v1772_v34 }
 0x1e7   : > { %v1882_v48 = vpop.f32.mrf.mxu1  ;;  %v1953_v49 = vpop.f32.mrf.mxu0 }
 0x1e8   : > { %v2001_v50 = vadd.f32 %v1953_v49, %v1885_v37 }
 0x1e9   : > { %v1883_v51 = vpop.f32.mrf.mxu1  ;;  %v1955_v52 = vpop.f32.mrf.mxu0 }
 0x1ea   : > { %v2002_v53 = vadd.f32 %v1955_v52, %v1886_v40 }
 0x1eb   : > { %v1957_v54 = vpop.f32.mrf.mxu0 }
 0x1ec   : > { %v1994_v55 = vpop.f32.mrf.mxu1 }
 0x1ed   : > { %v2003_v56 = vadd.f32 %v1994_v55, %v1887_v44  ;;  %v1958_v57 = vpop.f32.mrf.mxu0 }
 0x1ee   : > { %v1996_v58 = vpop.f32.mrf.mxu1 }
 0x1ef   : > { %v2004_v59 = vadd.f32 %v1996_v58, %v1888_v47  ;;  %v2054_v60 = vpop.f32.mrf.mxu0 }
 0x1f0   : > { %v1998_v61 = vpop.f32.mrf.mxu1  ;;  %v2102_v62 = vadd.f32 %v2054_v60, %v2001_v50 }
 0x1f1   : > { %v2056_v63 = vpop.f32.mrf.mxu0 }
 0x1f2   : > { %v1999_v0 = vpop.f32.mrf.mxu1  ;;  %v2103_v1 = vadd.f32 %v2056_v63, %v2002_v53 }
 0x1f3   : > { %v2058_v2 = vpop.f32.mrf.mxu0 }
 0x1f4   : > { %v2095_v3 = vpop.f32.mrf.mxu1 }
 0x1f5   : > { %v2104_v4 = vadd.f32 %v2095_v3, %v2003_v56  ;;  %v2059_v5 = vpop.f32.mrf.mxu0 }
 0x1f6   : > { %v2097_v6 = vpop.f32.mrf.mxu1 }
 0x1f7   : > { %v2105_v8 = vadd.f32 %v2097_v6, %v2004_v59  ;;  %v2171_v9 = vpop.f32.mrf.mxu0 }
 0x1f8   : > { %v2099_v11 = vpop.f32.mrf.mxu1  ;;  %v2219_v16 = vadd.f32 %v2171_v9, %v2102_v62 }
 0x1f9   : > { %v2173_v12 = vpop.f32.mrf.mxu0 }
 0x1fa   : > { %v2100_v15 = vpop.f32.mrf.mxu1  ;;  %v2220_v13 = vadd.f32 %v2173_v12, %v2103_v1 }
 0x1fb   : > { %v2175_v18 = vpop.f32.mrf.mxu0 }
 0x1fc   : > { %v2212_v19 = vpop.f32.mrf.mxu1 }
 0x1fd   : > { %v2221_v17 = vadd.f32 %v2212_v19, %v2104_v4  ;;  %v2176_v10 = vpop.f32.mrf.mxu0 }
 0x1fe   : > { %v2214_v20 = vpop.f32.mrf.mxu1 }
 0x1ff   : > { %v2222_v21 = vadd.f32 %v2214_v20, %v2105_v8  ;;  %v2287_v22 = vpop.f32.mrf.mxu0 }
 0x200   : > { %v2216_v23 = vpop.f32.mrf.mxu1  ;;  %v2335_v41 = vadd.f32 %v2287_v22, %v2219_v16 }
 0x201   : > { %v2289_v24 = vpop.f32.mrf.mxu0 }
 0x202   : > { %v2217_v25 = vpop.f32.mrf.mxu1  ;;  %v2336_v26 = vadd.f32 %v2289_v24, %v2220_v13 }
 0x203   : > { %v2291_v27 = vpop.f32.mrf.mxu0 }
 0x204   : > { %v2328_v28 = vpop.f32.mrf.mxu1 }
 0x205   : > { %v2337_v29 = vadd.f32 %v2328_v28, %v2221_v17  ;;  %v2292_v30 = vpop.f32.mrf.mxu0 }
 0x206   : > { %v2330_v31 = vpop.f32.mrf.mxu1 }
 0x207   : > { %v2338_v32 = vadd.f32 %v2330_v31, %v2222_v21  ;;  %v2403_v33 = vpop.f32.mrf.mxu0 }
 0x208   : > { %v2332_v34 = vpop.f32.mrf.mxu1  ;;  %v2451_v35 = vadd.f32 %v2403_v33, %v2335_v41 }
 0x209   : > { %v2405_v36 = vpop.f32.mrf.mxu0 }
 0x20a   : > { %v2333_v37 = vpop.f32.mrf.mxu1  ;;  %v2452_v38 = vadd.f32 %v2405_v36, %v2336_v26 }
 0x20b   : > { %v2407_v39 = vpop.f32.mrf.mxu0 }
 0x20c   : > { %v2444_v40 = vpop.f32.mrf.mxu1 }
 0x20d   : > { %v2453_v42 = vadd.f32 %v2444_v40, %v2337_v29  ;;  %v2408_v43 = vpop.f32.mrf.mxu0 }
 0x20e   : > { %v2446_v44 = vpop.f32.mrf.mxu1 }
 0x20f   : > { %v2454_v45 = vadd.f32 %v2446_v44, %v2338_v32 }
 0x210   : > { %v2519_v46 = vpop.f32.mrf.mxu0  ;;  %v2448_v47 = vpop.f32.mrf.mxu1 }
 0x211   : > { %v2567_v48 = vadd.f32 %v2519_v46, %v2451_v35 }
 0x212   : > { %v2521_v49 = vpop.f32.mrf.mxu0  ;;  %v2449_v50 = vpop.f32.mrf.mxu1 }
 0x213   : > { %v2568_v51 = vadd.f32 %v2521_v49, %v2452_v38 }
 0x214   : > { %v2523_v52 = vpop.f32.mrf.mxu0  ;;  %v2560_v53 = vpop.f32.mrf.mxu1 }
 0x215   : > { %v2569_v54 = vadd.f32 %v2560_v53, %v2453_v42 }
 0x216   : > { %v2524_v55 = vpop.f32.mrf.mxu0  ;;  %v2562_v56 = vpop.f32.mrf.mxu1 }
 0x217   : > { %v2570_v57 = vadd.f32 %v2562_v56, %v2454_v45 }
 0x218   : > { %v2564_v58 = vpop.f32.mrf.mxu1 }
 0x21a   : > { %v2635_v59 = vpop.f32.mrf.mxu0  ;;  %v2565_v61 = vpop.f32.mrf.mxu1 }
 0x21b   : > { %v2683_v60 = vadd.f32 %v2635_v59, %v2567_v48 }
 0x21c   : > { %v2637_v62 = vpop.f32.mrf.mxu0 }
 0x21d   : > { %v2684_v63 = vadd.f32 %v2637_v62, %v2568_v51 }
 0x21e   : > { %v2676_v0 = vpop.f32.mrf.mxu1  ;;  %v2639_v1 = vpop.f32.mrf.mxu0 }
 0x21f   : > { %v2685_v2 = vadd.f32 %v2676_v0, %v2569_v54  ;;  %v449_v54 = vld [vmem:[%s4264_s15] sm:$0x3f] }
 0x220   : > { %v2678_v3 = vpop.f32.mrf.mxu1  ;;  %v2640_v4 = vpop.f32.mrf.mxu0  ;;  %v3616_v58 = vrot.slane %v449_v54, 1 }
 0x221   : > { %v2686_v5 = vadd.f32 %v2678_v3, %v2570_v57 }
 0x222   : > { %v2680_v6 = vpop.f32.mrf.mxu1  ;;  %vm3618_vm1 = vcmp.gt.f32.partialorder %v3616_v58, 0.5 }
 0x224   : > { %v2751_v8 = vpop.f32.mrf.mxu0  ;;  %v2681_v9 = vpop.f32.mrf.mxu1 }
 0x225   : > { %v2799_v57 = vadd.f32 %v2751_v8, %v2683_v60  ;;  %v3622_v60 = vsub.s32 0, %v4299_v7 }
 0x226   : > { %v2753_v11 = vpop.f32.mrf.mxu0 }
 0x227   : > { %v2800_v61 = vadd.f32 %v2753_v11, %v2684_v63  ;;  %v3626_v63 = vsub.s32 1, %v4299_v7 }
 0x228   : > { %v2792_v16 = vpop.f32.mrf.mxu1  ;;  %v2755_v12 = vpop.f32.mrf.mxu0 }
 0x229   : > { %v2801_v3 = vadd.f32 %v2792_v16, %v2685_v2 }
 0x22a   : > { %v2794_v15 = vpop.f32.mrf.mxu1  ;;  %v2756_v13 = vpop.f32.mrf.mxu0 }
 0x22b   : > { %v2802_v12 = vadd.f32 %v2794_v15, %v2686_v5 }
 0x22c   : > { %v2796_v18 = vpop.f32.mrf.mxu1 }
 0x22e   : > { %v2867_v19 = vpop.f32.mrf.mxu0  ;;  %v2797_v17 = vpop.f32.mrf.mxu1 }
 0x22f   : > { %v2915_v62 = vadd.f32 %v2867_v19, %v2799_v57 }
 0x230   : > { %v2869_v10 = vpop.f32.mrf.mxu0 }
 0x231   : > { %v2916_v4 = vadd.f32 %v2869_v10, %v2800_v61 }
 0x232   : > { %v2908_v20 = vpop.f32.mrf.mxu1  ;;  %v2871_v21 = vpop.f32.mrf.mxu0 }
 0x233   : > { %v2917_v13 = vadd.f32 %v2908_v20, %v2801_v3 }
 0x234   : > { %v2910_v22 = vpop.f32.mrf.mxu1  ;;  %v2872_v23 = vpop.f32.mrf.mxu0 }
 0x235   : > { %v2918_v8 = vadd.f32 %v2910_v22, %v2802_v12 }
 0x236   : > { %v2912_v41 = vpop.f32.mrf.mxu1 }
 0x237   : > { %v3619_v41 = vsel %vm3618_vm1, 1, %v4155_v14  ;;  %v3634_v14 = vsub.s32 3, %v4299_v7 }
 0x238   : > { %v2983_v24 = vpop.f32.mrf.mxu0  ;;  %v2913_v25 = vpop.f32.mrf.mxu1 }
 0x239   : > { %v3031_v6 = vadd.f32 %v2983_v24, %v2915_v62 }
 0x23a   : > { %v2985_v26 = vpop.f32.mrf.mxu0 }
 0x23b   : > { %v3032_v18 = vadd.f32 %v2985_v26, %v2916_v4  ;;  %v3623_v26 = vrot.slane %v3619_v41, %v3622_v60 }
 0x23c   : > { %v3024_v27 = vpop.f32.mrf.mxu1  ;;  %v2987_v28 = vpop.f32.mrf.mxu0 }
 0x23d   : > { %v3033_v11 = vadd.f32 %v3024_v27, %v2917_v13  ;;  %v3627_v28 = vrot.slane %v3619_v41, %v3626_v63  ;;  %vm3636_vm3 = vcmp.eq.s32.totalorder %v3623_v26, 1 }
 0x23e   : > { %v3026_v29 = vpop.f32.mrf.mxu1  ;;  %v2988_v30 = vpop.f32.mrf.mxu0 }
 0x23f   : > { %v3034_v24 = vadd.f32 %v3026_v29, %v2918_v8  ;;  %v3630_v30 = vsub.s32 2, %v4299_v7  ;;  %vm3637_vm14 = vcmp.eq.s32.totalorder %v3627_v28, 1 }
 0x240   : > { %v3028_v31 = vpop.f32.mrf.mxu1 }
 0x242   : > { %v3099_v32 = vpop.f32.mrf.mxu0  ;;  %v3029_v33 = vpop.f32.mrf.mxu1 }
 0x243   : > { %v3147_v17 = vadd.f32 %v3099_v32, %v3031_v6 }
 0x244   : > { %v3101_v34 = vpop.f32.mrf.mxu0 }
 0x245   : > { %v3148_v19 = vadd.f32 %v3101_v34, %v3032_v18 }
 0x246   : > { %v3140_v35 = vpop.f32.mrf.mxu1  ;;  %v3103_v36 = vpop.f32.mrf.mxu0 }
 0x247   : > { %v3149_v25 = vadd.f32 %v3140_v35, %v3033_v11 }
 0x248   : > { %v3142_v37 = vpop.f32.mrf.mxu1  ;;  %v3104_v38 = vpop.f32.mrf.mxu0 }
 0x249   : > { %v3150_v31 = vadd.f32 %v3142_v37, %v3034_v24 }
 0x24a   : > { %v3144_v39 = vpop.f32.mrf.mxu1 }
 0x24c   : > { %v3215_v40 = vpop.f32.mrf.mxu0  ;;  %v3145_v42 = vpop.f32.mrf.mxu1 }
 0x24d   : > { %v3263_v2 = vadd.f32 %v3215_v40, %v3147_v17  ;;  %v3631_v40 = vrot.slane %v3619_v41, %v3630_v30  ;;  %v3635_v42 = vrot.slane %v3619_v41, %v3634_v14 }
 0x24e   : > { %v3217_v43 = vpop.f32.mrf.mxu0 }
 0x24f   : > { %v3264_v5 = vadd.f32 %v3217_v43, %v3148_v19  ;;  %vm3638_vm15 = vcmp.eq.s32.totalorder %v3631_v40, 1  ;;  %vm3639_vm0 = vcmp.eq.s32.totalorder %v3635_v42, 1 }
 0x250   : > { %v3256_v44 = vpop.f32.mrf.mxu1  ;;  %v3219_v45 = vpop.f32.mrf.mxu0 }
 0x251   : > { %v3265_v32 = vadd.f32 %v3256_v44, %v3149_v25 }
 0x252   : > { %v3258_v46 = vpop.f32.mrf.mxu1  ;;  %v3220_v47 = vpop.f32.mrf.mxu0 }
 0x253   : > { %v3266_v36 = vadd.f32 %v3258_v46, %v3150_v31 }
 0x254   : > { %v3260_v48 = vpop.f32.mrf.mxu1 }
 0x256   : > { %v3331_v49 = vpop.f32.mrf.mxu0  ;;  %v3261_v50 = vpop.f32.mrf.mxu1 }
 0x257   : > { %v3379_v15 = vadd.f32 %v3331_v49, %v3263_v2 }
 0x258   : > { %v3333_v51 = vpop.f32.mrf.mxu0 }
 0x259   : > { %v3380_v33 = vadd.f32 %v3333_v51, %v3264_v5 }
 0x25a   : > { %v3372_v52 = vpop.f32.mrf.mxu1  ;;  %v3335_v53 = vpop.f32.mrf.mxu0 }
 0x25b   : > { %v3381_v38 = vadd.f32 %v3372_v52, %v3265_v32 }
 0x25c   : > { %v3374_v55 = vpop.f32.mrf.mxu1  ;;  %v3336_v56 = vpop.f32.mrf.mxu0 }
 0x25d   : > { %v3382_v43 = vadd.f32 %v3374_v55, %v3266_v36 }
 0x25e   : > { %v3376_v59 = vpop.f32.mrf.mxu1 }
 0x260   : > { %v3447_v0 = vpop.f32.mrf.mxu0  ;;  %v3377_v1 = vpop.f32.mrf.mxu1 }
 0x261   : > { %v3495_v22 = vadd.f32 %v3447_v0, %v3379_v15 }
 0x262   : > { %v3449_v9 = vpop.f32.mrf.mxu0 }
 0x263   : > { %v3496_v39 = vadd.f32 %v3449_v9, %v3380_v33 }
 0x264   : > { %v3488_v21 = vpop.f32.mrf.mxu1  ;;  %v3451_v23 = vpop.f32.mrf.mxu0 }
 0x265   : > { %v3497_v45 = vadd.f32 %v3488_v21, %v3381_v38 }
 0x266   : > { %v3490_v16 = vpop.f32.mrf.mxu1  ;;  %v3452_v10 = vpop.f32.mrf.mxu0 }
 0x267   : > { %v3498_v44 = vadd.f32 %v3490_v16, %v3382_v43 }
 0x268   : > { %v3492_v20 = vpop.f32.mrf.mxu1 }
 0x26a   : > { %v3563_v27 = vpop.f32.mrf.mxu0  ;;  %v3493_v34 = vpop.f32.mrf.mxu1 }
 0x26b   : > { %v3611_v29 = vadd.f32 %v3563_v27, %v3495_v22 }
 0x26c   : > { %v3565_v35 = vpop.f32.mrf.mxu0 }
 0x26d   : > { %v3612_v47 = vadd.f32 %v3565_v35, %v3496_v39  ;;  %v3640_v48 = vsel %vm3636_vm3, %v3611_v29, 0.0 }
 0x26e   : > { %v3604_v7 = vpop.f32.mrf.mxu1  ;;  %v3567_v37 = vpop.f32.mrf.mxu0 }
 0x26f   : > { %v3641_v49 = vsel %vm3637_vm14, %v3612_v47, 0.0  ;;  %v3613_v50 = vadd.f32 %v3604_v7, %v3497_v45 }
 0x270   : > { %v4038_v46 = vpack.c.bf16 %v3641_v49, %v3640_v48  ;;  %v3606_v51 = vpop.f32.mrf.mxu1  ;;  %v3568_v52 = vpop.f32.mrf.mxu0 }
 0x271   : > { %v3614_v53 = vadd.f32 %v3606_v51, %v3498_v44  ;;  %v3642_v56 = vsel %vm3638_vm15, %v3613_v50, 0.0 }
 0x272   : > { %3660 = vst [vmem:[%s4280_s13] sm:$0xff] %v4038_v46  ;;  %v3608_v54 = vpop.f32.mrf.mxu1  ;;  %3664 = sbr.rel (%p3900_p8) target bundleno = 633 (0x279), region = 122 }
 0x273   : > { %v3643_v57 = vsel %vm3639_vm0, %v3614_v53, 0.0 }
 0x274   : > { %v4039_v55 = vpack.c.bf16 %v3643_v57, %v3642_v56  ;;  %v3609_v58 = vpop.f32.mrf.mxu1 }
 0x276   : > { %3661 = vst [vmem:[%s4280_s13 + $0x8] sm:$0xff] %v4039_v55 }
 0x277   : > { %v4181_v59 = vmov 0.0  }
 0x278   : > { %3665 = vst [vmem:[%s4269_s18] sm:$0xff] %v4181_v59  ;;  %3666 = vst [vmem:[%s4274_s21] sm:$0xff] %v4181_v59 }
 0x279 PF: > { %v3670_v61 = vadd.f32 %v3641_v49, %v3640_v48  ;;  %v3668_v62 = vmul.f32 %v3640_v48, %v3640_v48  ;;  %v3671_v0 = vmul.f32 %v3641_v49, %v3641_v49  ;;  %v3674_v1 = vmul.f32 %v3642_v56, %v3642_v56 }
 0x27a   : > { %v3677_v6 = vmul.f32 %v3643_v57, %v3643_v57 }
 0x27b   : > { %v3673_v3 = vadd.f32 %v3670_v61, %v3642_v56  ;;  %v3672_v4 = vadd.f32 %v3671_v0, %v3668_v62 }
 0x27d   : > { %v3676_v12 = vadd.f32 %v3673_v3, %v3643_v57  ;;  %v3675_v13 = vadd.f32 %v3674_v1, %v3672_v4 }
 0x27f   : > { %v3679_v9 = vld [vmem:[%s4269_s18] sm:$0xff]  ;;  %v3678_v21 = vadd.f32 %v3677_v6, %v3675_v13 }
 0x280   : > { %v3682_v18 = vld [vmem:[%s4274_s21] sm:$0xff]  ;;  %v3680_v17 = vadd.f32 %v3679_v9, %v3676_v12 }
 0x281   : > { %v3683_v23 = vadd.f32 %v3682_v18, %v3678_v21 }
 0x282   : > { %3681 = vst [vmem:[%s4269_s18] sm:$0xff] %v3680_v17 }
 0x283   : > { %3684 = vst [vmem:[%s4274_s21] sm:$0xff] %v3683_v23 }
 0x284 PF: > { %s18_s3 = sadd.s32 1, %s4151_s3   ;;  %s4896_s24 = smov %s4143_s26 }
 0x285   : > { %p15_p10 = scmp.ge.s32.totalorder %s18_s3, 6   ;;  %s4897_s25 = smov %s4147_s27 }
 0x286   : > { %s4898_s26 = smov %s4901_s4  ;;  %s4899_s27 = smov %s4905_s28 }
 0x287   :  { %17 = sbr.rel (!%p15_p10) target bundleno = 3 (0x3), region = 211 }
 0x28c   :  { %3746 = vsyncmov [#allocation3] }
 0x28f   :  { %s3747_s15 = vpop.sfrf %3746 }
 0x290   :  { %p4029_p11 = scmp.ne.s32.totalorder %s3747_s15, 0 }
 0x292   :  { %3751 = shalt.err (%p4029_p11)  }
 0x293   :  { %3753 = vsyncmov [#allocation3 + $0x1] }
 0x296   :  { %s3754_s18 = vpop.sfrf %3753 }
 0x297   :  { %p4030_p12 = scmp.ne.s32.totalorder %s3754_s18, 0 }
 0x299   :  { %3758 = shalt.err (%p4030_p12)  }

// kernel: double_conv_forward.4
= control target key start
LH: loop header
LB: loop body
LE: loop exit
PB: predicated region body
PF: predicated region fallthrough
CT: control target
= control target key end

     0   :  { %s4247_s24 = smov 0   ;;  %s4249_s25 = smov 0   ;;  %s4989_s0 = inlined_call_operand.vmem [shape: bf16[2,8,2048], index: 0, kind: input, shape index: {}]   ;;  %s4990_s1 = inlined_call_operand.vmem [shape: f32[2,1,768], index: 1, kind: input, shape index: {}]   ;;  %s4991_s2 = inlined_call_operand.vmem [shape: bf16[27,8,8], index: 2, kind: input, shape index: {}]   ;;  %s4992_s3 = inlined_call_operand.vmem [shape: f32[8,1], index: 3, kind: input, shape index: {}]   ;;  %s4993_s4 = inlined_call_operand.vmem [shape: f32[8,1], index: 4, kind: input, shape index: {}]   ;;  %s4994_s5 = inlined_call_operand.vmem [shape: bf16[2,8,2048], index: 5, kind: output, shape index: {0}]   ;;  %s4995_s6 = inlined_call_operand.vmem [shape: f32[2,8,128], index: 6, kind: output, shape index: {1}]   ;;  %s4996_s7 = inlined_call_operand.vmem [shape: f32[2,8,128], index: 7, kind: output, shape index: {2}]  }
   0x1   :  { %s4251_s26 = smov 0   ;;  %s4253_s27 = smov 0  }
   0x2   :  { %s4255_s28 = smov 0  }
   0x3 LB: > { %s27_s29 = sadd.s32 1, %s4169_s26  ;;  %s30_s30 = sadd.s32 1, %s4173_s27  ;;  %s4177_s28 = sphi %s4255_s28, %s18_s28   ;;  %s4173_s27 = sphi %s4253_s27, %s5006_s27   ;;  %s4169_s26 = sphi %s4251_s26, %s5005_s26   ;;  %s4165_s25 = sphi %s4249_s25, %s5004_s25   ;;  %s4161_s24 = sphi %s4247_s24, %s5003_s24  }
   0x4   : > { %p28_p0 = scmp.ge.s32.totalorder %s27_s29, 2  ;;  %p3923_p1 = scmp.ge.s32.totalorder %s4177_s28, 1 }
   0x5   : > { %p233_p2 = scmp.lt.s32.totalorder %s4177_s28, 5 }
   0x6   : > { %s5008_s29 = smov (%p28_p0, %s27_s29), 0  ;;  %s5010_s30 = smov (!%p28_p0, %s30_s30), %s4173_s27 }
   0x7   : > { %4997 = sst [smem:[#allocation7_spill]] %s5008_s29  ;;  %p234_p3 = pnand %p3923_p1, %p233_p2 }
   0x8   : > { %p32_p4 = scmp.ge.s32.totalorder %s5010_s30, 2  ;;  %p275_p5 = scmp.lt.s32.totalorder (!%p234_p3), %s4161_s24, 1 }
   0x9   : > { %237 = sbr.rel (%p234_p3) target bundleno = 778 (0x30a), region = 36  ;;  %s4057_s8 = sshll.u32 (!%p234_p3), %s4161_s24, 2 }
   0xa   : > { %s5012_s30 = smov (%p32_p4, %s5010_s30), 0  ;;  %s4058_s9 = sadd.s32 (!%p234_p3), 4, %s4057_s8 }
   0xb   : > { %4998 = sst [smem:[#allocation8_spill]] %s5012_s30  ;;  %p281_p6 = scmp.lt.s32.totalorder (!%p234_p3), %s4165_s25, 1 }
   0xc   : > { %p283_p7 = scmp.lt.s32.totalorder (!%p234_p3), %s4058_s9, 15  ;;  %p3929_p8 = scmp.ne.s32.totalorder (!%p234_p3), %s4161_s24, 0 }
   0xe   : > { %s276_s10 = scalar_select %p275_p5, %s4161_s24, 1 }
   0xf   : > { %s282_s11 = scalar_select %p281_p6, %s4165_s25, 1 }
  0x10   : > { %s4066_s12 = smul.u32 6, %s276_s10  ;;  %s5014_s9 = smov (!%p283_p7, %s4058_s9), 15 }
  0x11   : > { %s3925_s13 = sshll.u32 %s282_s11, 4  ;;  %s3927_s14 = sshll.u32 %s282_s11, 3 }
  0x12   : > { %s4289_s17 = scalar_lea.vmem %s4990_s1, %s4066_s12  ;;  %s4294_s20 = scalar_lea.vmem %s4995_s6, %s3927_s14 }
  0x13   : > { %s4299_s23 = scalar_lea.vmem %s4996_s7, %s3927_s14  ;;  %s286_s10 = sadd.s32 %s3925_s13, %s5014_s9 }
  0x14   : > { %s3926_s30 = sshll.u32 %s286_s10, 2  ;;  %304 = sbr.rel (%p3929_p8) target bundleno = 29 (0x1d), region = 40 }
  0x15   : > { %s4305_s15 = scalar_lea.vmem %s4994_s5, %s3926_s30  ;;  %s4059_s12 = sshll.u32 (!%p3929_p8), %s4165_s25, 6 }
  0x16   : > { %s3825_s14 = scalar_lea.vmem (!%p3929_p8), %s4989_s0, %s4059_s12 }
  0x19   : > { %v3932_v0 = vld [vmem:[%s3825_s14 + $0xc] sm:$0xff]  ;;  %v3933_v1 = vld [vmem:[%s3825_s14 + $0x14] sm:$0xff]  ;;  %v3934_v2 = vld [vmem:[%s3825_s14 + $0x1c] sm:$0xff] }
  0x1a   : > { %343 = vst [vmem:[#allocation2] sm:$0xff] %v3932_v0  ;;  %345 = vst [vmem:[#allocation2 + $0x8] sm:$0xff] %v3933_v1 }
  0x1b   : > { %347 = vst [vmem:[#allocation2 + $0x10] sm:$0xff] %v3934_v2 }
  0x1c   : > { %355 = vsyncadd [#allocation3], 384 }
  0x1d PF: > { %s356_s29 = sadd.s32 1, %s4161_s24 }
  0x1e   : > { %p3936_p9 = scmp.ge.s32.totalorder %s356_s29, 2 }
  0x1f   : > { %s361_s30 = sand.u32 (!%p3936_p9), 1, %s356_s29  ;;  %s4060_s9 = sshll.u32 (!%p3936_p9), %s4161_s24, 9 }
  0x20   : > { %360 = sbr.rel (%p3936_p9) target bundleno = 42 (0x2a), region = 78  ;;  %s4061_s13 = sadd.s32 (!%p3936_p9), 512, %s4060_s9 }
  0x21   : > { %s3938_s19 = sshll.u32 (!%p3936_p9), %s4165_s25, 4  ;;  %s363_s21 = sadd.s32 (!%p3936_p9), 384, %s4061_s13 }
  0x22   : > { %s4062_s22 = smul.u32 (!%p3936_p9), 24, %s361_s30  ;;  %s364_s10 = sshra.s32 (!%p3936_p9), %s363_s21, 7 }
  0x23   : > { %s367_s11 = sadd.s32 (!%p3936_p9), %s3938_s19, %s364_s10  ;;  %s373_s29 = scalar_lea.sflag (!%p3936_p9), [#allocation3], %s361_s30 }
  0x24   : > { %s3939_s12 = sshll.u32 (!%p3936_p9), %s367_s11, 2  ;;  %s372_s8 = scalar_lea.vmem (!%p3936_p9), [#allocation2], %s4062_s22 }
  0x25   : > { %s369_s14 = scalar_lea.vmem %s4989_s0, %s3939_s12 }
  0x26   : > { %v407_v3 = vld [vmem:[%s369_s14] sm:$0xff]  ;;  %v409_v4 = vld [vmem:[%s369_s14 + $0x8] sm:$0xff]  ;;  %v411_v5 = vld [vmem:[%s369_s14 + $0x10] sm:$0xff] }
  0x27   : > { %408 = vst [vmem:[%s372_s8] sm:$0xff] %v407_v3  ;;  %410 = vst [vmem:[%s372_s8 + $0x8] sm:$0xff] %v409_v4 }
  0x28   : > { %412 = vst [vmem:[%s372_s8 + $0x10] sm:$0xff] %v411_v5 }
  0x29   : > { %420 = vsyncadd %s373_s29, 384 }
  0x2a PF: > { %s4999_s25 = sand.u32 1, %s4161_s24 }
  0x2b   : > { %s4063_s9 = smul.u32 24, %s4999_s25  ;;  %s5000_s19 = smov %s4999_s25 }
  0x2c   : > { %s424_s21 = scalar_lea.sflag [#allocation3], %s5000_s19 }
  0x2d   : > { %s423_s13 = scalar_lea.vmem [#allocation2], %s4063_s9 }
  0x2e   : > { %4157 = dma.done.wait %s424_s21, 384 }
  0x2f   : > { %4158 = vsyncadd %s424_s21, 4294966912  ;;  %v4179_v6 = vmov 0   ;;  %v471_v7 = vlaneseq  ;;  %v439_v9 = vld [vmem:[%s4992_s3] sm:$0xff]  ;;  %v431_v18 = vld [vmem:[%s423_s13 + $0x10] sm:$0xff]  ;;  %s4180_s11 = smov 110   ;;  %s4181_s12 = smov 111  }
  0x30   : > { %4135 = vset.pattern.permute.xlu0 %v4179_v6  ;;  %609 = vmatprep.mubr.bf16.mxu0 %v4179_v6  ;;  %v432_v10 = vld [vmem:[%s4289_s17] sm:$0x3f]  ;;  %v437_v25 = vunpack.c.l.bf16 %v431_v18  ;;  %v438_v26 = vunpack.c.h.bf16 %v431_v18  ;;  %s4182_s16 = smov 109   ;;  %s4183_s18 = smov 101   ;;  %vm555_vm7 = vcmask 900096   ;;  %vm564_vm8 = vcmask 1043456  }
  0x31   : > { %650 = vmatprep.mubr.bf16.mxu1 %v4179_v6  ;;  %v4327_v8 = vshrl.u32 %v471_v7, 7  ;;  %442 = vperm.xlu0 %4135, %v439_v9   ;;  %v451_v11 = vld [vmem:[%s4993_s4] sm:$0xff]  ;;  %vm469_vm0 = vcmp.gt.f32.partialorder %v432_v10, 0.5  ;;  %s4184_s14 = smov 100   ;;  %s4185_s29 = smov 99   ;;  %vm560_vm9 = vcmask 64512  }
  0x32   : > { %v470_v13 = vsel %vm469_vm0, 1, %v4179_v6  ;;  %v429_v15 = vld [vmem:[%s423_s13] sm:$0xff]  ;;  %v430_v16 = vld [vmem:[%s423_s13 + $0x8] sm:$0xff]  ;;  %s4186_s25 = smov 91   ;;  %s4187_s9 = smov 90   ;;  %vm669_vm10 = vcmask 908288  }
  0x33   : > { %v493_v12 = vsub.s32 5, %v4327_v8  ;;  %v473_v17 = vsub.s32 0, %v4327_v8  ;;  %v481_v19 = vsub.s32 2, %v4327_v8  ;;  %v433_v20 = vunpack.c.l.bf16 %v429_v15  ;;  %s4188_s13 = smov 89   ;;  %s4189_s19 = smov 11  }
  0x34   : > { %v434_v21 = vunpack.c.h.bf16 %v429_v15  ;;  %v435_v22 = vunpack.c.l.bf16 %v430_v16  ;;  %v477_v23 = vsub.s32 1, %v4327_v8  ;;  %v489_v27 = vsub.s32 4, %v4327_v8  ;;  %s4190_s21 = smov 10   ;;  %s4191_s8 = smov 9  }
  0x35   : > { %454 = vperm.xlu0 %4135, %v451_v11   ;;  %v494_v14 = vrot.slane %v470_v13, %v493_v12  ;;  %v474_v28 = vrot.slane %v470_v13, %v473_v17  ;;  %v436_v29 = vunpack.c.h.bf16 %v430_v16  ;;  %v485_v30 = vsub.s32 3, %v4327_v8  ;;  %s4192_s30 = smov 1  }
  0x36   : > { %v482_v31 = vrot.slane %v470_v13, %v481_v19  ;;  %v478_v35 = vrot.slane %v470_v13, %v477_v23  ;;  %v490_v39 = vrot.slane %v470_v13, %v489_v27  ;;  %vm781_vm11 = vcmask 891904  }
  0x37   : > { %vm495_vm1 = vcmp.eq.s32.totalorder %v474_v28, 1  ;;  %vm500_vm3 = vcmp.eq.s32.totalorder %v494_v14, 1  ;;  %v486_v52 = vrot.slane %v470_v13, %v485_v30  ;;  %v514_v14 = vld [vmem:[%s4991_s2 + $0x4] sm:$0xf]  ;;  %vm897_vm12 = vcmask 826368  }
  0x38   : > { %vm497_vm2 = vcmp.eq.s32.totalorder %v482_v31, 1  ;;  %vm496_vm4 = vcmp.eq.s32.totalorder %v478_v35, 1  ;;  %vm499_vm5 = vcmp.eq.s32.totalorder %v490_v39, 1  ;;  %v513_v31 = vld [vmem:[%s4991_s2] sm:$0xf]  ;;  %vm1013_vm13 = vcmask 818176  }
  0x39   : > { %vm498_vm6 = vcmp.eq.s32.totalorder %v486_v52, 1  ;;  %vm1129_vm14 = vcmask 809984   ;;  %vm1245_vm15 = vcmask 744448   ;;  %vm1361_vm0 = vcmask 736256  }
  0xac   : > { %v443_v24 = vpop.permute.xlu0 %442 }
  0xad   : > { %v445_v32 = vmul.f32 %v443_v24, %v433_v20  ;;  %v446_v33 = vmul.f32 %v443_v24, %v434_v21  ;;  %v447_v34 = vmul.f32 %v443_v24, %v435_v22  ;;  %v449_v36 = vmul.f32 %v443_v24, %v437_v25 }
  0xae   : > { %v450_v37 = vmul.f32 %v443_v24, %v438_v26  ;;  %v448_v40 = vmul.f32 %v443_v24, %v436_v29 }
  0xb0   : > { %v455_v38 = vpop.permute.xlu0 %454 }
  0xb1   : > { %v457_v41 = vadd.f32 %v455_v38, %v445_v32  ;;  %v458_v42 = vadd.f32 %v455_v38, %v446_v33  ;;  %v459_v43 = vadd.f32 %v455_v38, %v447_v34  ;;  %v461_v44 = vadd.f32 %v455_v38, %v449_v36 }
  0xb2   : > { %v462_v45 = vadd.f32 %v455_v38, %v450_v37  ;;  %v460_v46 = vadd.f32 %v455_v38, %v448_v40 }
  0xb3   : > { %v463_v47 = vmax.f32 %v457_v41, 0.0  ;;  %v464_v48 = vmax.f32 %v458_v42, 0.0  ;;  %v465_v49 = vmax.f32 %v459_v43, 0.0  ;;  %v467_v50 = vmax.f32 %v461_v44, 0.0  ;;  %v515_v43 = vld [vmem:[%s4991_s2 + $0x8] sm:$0xf] }
  0xb4   : > { %v468_v51 = vmax.f32 %v462_v45, 0.0  ;;  %v466_v57 = vmax.f32 %v460_v46, 0.0 }
  0xb5   : > { %v501_v53 = vsel %vm495_vm1, %v463_v47, 0.0  ;;  %v503_v54 = vsel %vm497_vm2, %v465_v49, 0.0  ;;  %v502_v58 = vsel %vm496_vm4, %v464_v48, 0.0  ;;  %v505_v60 = vsel %vm499_vm5, %v467_v50, 0.0 }
  0xb6   : > { %v4352_v55 = vsel %vm500_vm3, %v468_v51, 0.0  ;;  %v4354_v56 = vpack.c.bf16 %v501_v53, %v501_v53  ;;  %v4356_v59 = vpack.c.bf16 %v503_v54, %v503_v54  ;;  %v4360_v61 = vpack.c.bf16 %v502_v58, %v502_v58 }
  0xb7   : > { %v504_v62 = vsel %vm498_vm6, %v466_v57, 0.0  ;;  %v4362_v63 = vpack.c.bf16 %v505_v60, %v505_v60  ;;  %v4463_v33 = vpack.c.bf16 %v4352_v55, %v4352_v55  ;;  %vm1477_vm1 = vcmask 728064  }
  0xb8   : > { %545 = vrot.lane.b32.xlu1 %v4354_v56, %s4180_s11  ;;  %549 = vrot.lane.b32.xlu0 %v4356_v59, %s4180_s11  ;;  %v4366_v0 = vpack.c.bf16 %v504_v62, %v504_v62  ;;  %vm1593_vm2 = vcmask 89088   ;;  %vm1709_vm3 = vcmask 80896   ;;  %vm1825_vm4 = vcmask 72704  }
  0xb9   : > { %vm1941_vm5 = vcmask 7168   ;;  %vm2159_vm6 = vcmask 1039360  }
  0xbc   : > { %547 = vrot.lane.b32.xlu1 %v4360_v61, %s4180_s11  ;;  %553 = vrot.lane.b32.xlu0 %v4362_v63, %s4180_s11 }
  0xc0   : > { %551 = vrot.lane.b32.xlu1 %v4366_v0, %s4180_s11  ;;  %661 = vrot.lane.b32.xlu0 %v4360_v61, %s4181_s12  ;;  %s4193_s11 = smov 127  }
  0xc4   : > { %659 = vrot.lane.b32.xlu1 %v4354_v56, %s4181_s12  ;;  %665 = vrot.lane.b32.xlu0 %v4366_v0, %s4181_s12 }
  0xc8   : > { %663 = vrot.lane.b32.xlu1 %v4356_v59, %s4181_s12  ;;  %771 = vrot.lane.b32.xlu0 %v4354_v56, %s4182_s16 }
  0xcc   : > { %667 = vrot.lane.b32.xlu1 %v4362_v63, %s4181_s12  ;;  %775 = vrot.lane.b32.xlu0 %v4356_v59, %s4182_s16 }
  0xd0   : > { %773 = vrot.lane.b32.xlu1 %v4360_v61, %s4182_s16  ;;  %779 = vrot.lane.b32.xlu0 %v4362_v63, %s4182_s16 }
  0xd4   : > { %777 = vrot.lane.b32.xlu1 %v4366_v0, %s4182_s16  ;;  %889 = vrot.lane.b32.xlu0 %v4360_v61, %s4183_s18 }
  0xd8   : > { %887 = vrot.lane.b32.xlu1 %v4354_v56, %s4183_s18  ;;  %893 = vrot.lane.b32.xlu0 %v4366_v0, %s4183_s18 }
  0xdc   : > { %891 = vrot.lane.b32.xlu1 %v4356_v59, %s4183_s18  ;;  %1003 = vrot.lane.b32.xlu0 %v4354_v56, %s4184_s14 }
  0xe0   : > { %895 = vrot.lane.b32.xlu1 %v4362_v63, %s4183_s18  ;;  %1007 = vrot.lane.b32.xlu0 %v4356_v59, %s4184_s14  ;;  %s4194_s18 = smov 119  }
  0xe4   : > { %1005 = vrot.lane.b32.xlu1 %v4360_v61, %s4184_s14  ;;  %1011 = vrot.lane.b32.xlu0 %v4362_v63, %s4184_s14 }
  0xe8   : > { %1009 = vrot.lane.b32.xlu1 %v4366_v0, %s4184_s14  ;;  %1121 = vrot.lane.b32.xlu0 %v4360_v61, %s4185_s29 }
  0xec   : > { %1119 = vrot.lane.b32.xlu1 %v4354_v56, %s4185_s29  ;;  %1125 = vrot.lane.b32.xlu0 %v4366_v0, %s4185_s29 }
  0xf0   : > { %1123 = vrot.lane.b32.xlu1 %v4356_v59, %s4185_s29  ;;  %1235 = vrot.lane.b32.xlu0 %v4354_v56, %s4186_s25 }
  0xf4   : > { %1127 = vrot.lane.b32.xlu1 %v4362_v63, %s4185_s29  ;;  %1239 = vrot.lane.b32.xlu0 %v4356_v59, %s4186_s25 }
  0xf8   : > { %1237 = vrot.lane.b32.xlu1 %v4360_v61, %s4186_s25  ;;  %1243 = vrot.lane.b32.xlu0 %v4362_v63, %s4186_s25 }
  0xfc   : > { %1241 = vrot.lane.b32.xlu1 %v4366_v0, %s4186_s25  ;;  %1353 = vrot.lane.b32.xlu0 %v4360_v61, %s4187_s9  ;;  %s4195_s25 = smov 118  }
 0x100   : > { %1351 = vrot.lane.b32.xlu1 %v4354_v56, %s4187_s9  ;;  %1357 = vrot.lane.b32.xlu0 %v4366_v0, %s4187_s9 }
 0x104   : > { %1355 = vrot.lane.b32.xlu1 %v4356_v59, %s4187_s9  ;;  %1467 = vrot.lane.b32.xlu0 %v4354_v56, %s4188_s13 }
 0x108   : > { %1359 = vrot.lane.b32.xlu1 %v4362_v63, %s4187_s9  ;;  %1471 = vrot.lane.b32.xlu0 %v4356_v59, %s4188_s13 }
 0x10c   : > { %1469 = vrot.lane.b32.xlu1 %v4360_v61, %s4188_s13  ;;  %1475 = vrot.lane.b32.xlu0 %v4362_v63, %s4188_s13 }
 0x110   : > { %1473 = vrot.lane.b32.xlu1 %v4366_v0, %s4188_s13  ;;  %1585 = vrot.lane.b32.xlu0 %v4360_v61, %s4189_s19 }
 0x114   : > { %1583 = vrot.lane.b32.xlu1 %v4354_v56, %s4189_s19  ;;  %1589 = vrot.lane.b32.xlu0 %v4366_v0, %s4189_s19 }
 0x118   : > { %1587 = vrot.lane.b32.xlu1 %v4356_v59, %s4189_s19  ;;  %1699 = vrot.lane.b32.xlu0 %v4354_v56, %s4190_s21 }
 0x11c   : > { %1591 = vrot.lane.b32.xlu1 %v4362_v63, %s4189_s19  ;;  %1703 = vrot.lane.b32.xlu0 %v4356_v59, %s4190_s21  ;;  %s4196_s19 = smov 117  }
 0x120   : > { %1701 = vrot.lane.b32.xlu1 %v4360_v61, %s4190_s21  ;;  %1707 = vrot.lane.b32.xlu0 %v4362_v63, %s4190_s21 }
 0x124   : > { %1705 = vrot.lane.b32.xlu1 %v4366_v0, %s4190_s21  ;;  %1817 = vrot.lane.b32.xlu0 %v4360_v61, %s4191_s8 }
 0x128   : > { %1815 = vrot.lane.b32.xlu1 %v4354_v56, %s4191_s8  ;;  %1821 = vrot.lane.b32.xlu0 %v4366_v0, %s4191_s8 }
 0x12a   : > { %v546_v1 = vpop.permute.xlu1 %545  ;;  %v550_v2 = vpop.permute.xlu0 %549 }
 0x12c   : > { %1819 = vrot.lane.b32.xlu1 %v4356_v59, %s4191_s8  ;;  %1931 = vrot.lane.b32.xlu0 %v4354_v56, %s4192_s30  ;;  %v516_v56 = vld [vmem:[%s4991_s2 + $0xc] sm:$0xf] }
 0x12e   : > { %v548_v3 = vpop.permute.xlu1 %547  ;;  %v554_v4 = vpop.permute.xlu0 %553 }
 0x12f   : > { %v557_v5 = vsel %vm555_vm7, %v548_v3, %v550_v2  ;;  %v556_v7 = vsel %vm555_vm7, %v546_v1, %v548_v3 }
 0x130   : > { %1823 = vrot.lane.b32.xlu1 %v4362_v63, %s4191_s8  ;;  %3942 = vmatprep.subr.msk.bf16.mxu0 %vm564_vm8, %v557_v5  ;;  %v566_v9 = vsel %vm564_vm8, %v556_v7, 0 }
 0x131   : > { %1935 = vrot.lane.b32.xlu0 %v4356_v59, %s4192_s30  ;;  %592 = vmatpush1.bf16.msra.mxu0 %v566_v9  ;;  %v517_v9 = vld [vmem:[%s4991_s2 + $0x10] sm:$0xf] }
 0x132   : > { %v552_v10 = vpop.permute.xlu1 %551  ;;  %v662_v11 = vpop.permute.xlu0 %661 }
 0x133   : > { %v559_v12 = vsel %vm555_vm7, %v552_v10, %v554_v4  ;;  %v558_v13 = vsel %vm555_vm7, %v550_v2, %v552_v10  ;;  %vm2275_vm7 = vcmask 973824  }
 0x134   : > { %1933 = vrot.lane.b32.xlu1 %v4360_v61, %s4192_s30  ;;  %3944 = vmatprep.subr.msk.bf16.mxu1 %vm564_vm8, %v559_v12  ;;  %v572_v15 = vsel %vm564_vm8, %v558_v13, 0 }
 0x135   : > { %1939 = vrot.lane.b32.xlu0 %v4362_v63, %s4192_s30  ;;  %633 = vmatpush1.bf16.msra.mxu1 %v572_v15 }
 0x136   : > { %v660_v16 = vpop.permute.xlu1 %659  ;;  %3943 = vmatmul.mubr.msk.bf16.vlgmr.msra.gmra.mxu0 %vm560_vm9, %v514_v14  ;;  %v666_v18 = vpop.permute.xlu0 %665 }
 0x137   : > { %721 = vmatprep.mubr.bf16.mxu0 %v4179_v6  ;;  %v670_v20 = vsel %vm669_vm10, %v660_v16, %v662_v11 }
 0x138   : > { %1937 = vrot.lane.b32.xlu1 %v4366_v0, %s4192_s30  ;;  %3945 = vmatmul.mubr.msk.bf16.vlgmr.msra.gmra.mxu1 %vm560_vm9, %v514_v14  ;;  %v678_v25 = vsel %vm564_vm8, %v670_v20, 0  ;;  %s4197_s30 = smov 39  }
 0x139   : > { %2151 = vrot.lane.b32.xlu0 %v4356_v59, %s4193_s11  ;;  %762 = vmatprep.mubr.bf16.mxu1 %v4179_v6 }
 0x13a   : > { %v664_v21 = vpop.permute.xlu1 %663  ;;  %v772_v22 = vpop.permute.xlu0 %771 }
 0x13b   : > { %v671_v24 = vsel %vm669_vm10, %v662_v11, %v664_v21  ;;  %v672_v26 = vsel %vm669_vm10, %v664_v21, %v666_v18 }
 0x13c   : > { %2149 = vrot.lane.b32.xlu1 %v4360_v61, %s4193_s11  ;;  %3946 = vmatprep.subr.msk.bf16.mxu0 %vm564_vm8, %v671_v24  ;;  %v684_v32 = vsel %vm564_vm8, %v672_v26, 0 }
 0x13d   : > { %2155 = vrot.lane.b32.xlu0 %v4362_v63, %s4193_s11  ;;  %704 = vmatpush1.bf16.msra.mxu0 %v678_v25 }
 0x13e   : > { %v668_v27 = vpop.permute.xlu1 %667  ;;  %v776_v28 = vpop.permute.xlu0 %775 }
 0x13f   : > { %v673_v29 = vsel %vm669_vm10, %v666_v18, %v668_v27  ;;  %vm2391_vm10 = vcmask 965632  }
 0x140   : > { %2153 = vrot.lane.b32.xlu1 %v4366_v0, %s4193_s11  ;;  %3948 = vmatprep.subr.msk.bf16.mxu1 %vm564_vm8, %v673_v29 }
 0x141   : > { %2265 = vrot.lane.b32.xlu0 %v4360_v61, %s4194_s18  ;;  %745 = vmatpush1.bf16.msra.mxu1 %v684_v32 }
 0x142   : > { %v774_v34 = vpop.permute.xlu1 %773  ;;  %3947 = vmatmul.mubr.msk.bf16.vlgmr.msra.gmra.mxu0 %vm560_vm9, %v513_v31  ;;  %v780_v35 = vpop.permute.xlu0 %779 }
 0x143   : > { %v782_v36 = vsel %vm781_vm11, %v772_v22, %v774_v34  ;;  %v783_v37 = vsel %vm781_vm11, %v774_v34, %v776_v28  ;;  %833 = vmatprep.mubr.bf16.mxu0 %v4179_v6  ;;  %v518_v22 = vld [vmem:[%s4991_s2 + $0x14] sm:$0xf] }
 0x144   : > { %2157 = vrot.lane.b32.xlu1 %v4463_v33, %s4193_s11  ;;  %3950 = vmatprep.subr.msk.bf16.mxu0 %vm564_vm8, %v783_v37  ;;  %v790_v38 = vsel %vm564_vm8, %v782_v36, 0  ;;  %s4198_s11 = smov 38  }
 0x145   : > { %2269 = vrot.lane.b32.xlu0 %v4366_v0, %s4194_s18  ;;  %816 = vmatpush1.bf16.msra.mxu0 %v790_v38 }
 0x146   : > { %v778_v39 = vpop.permute.xlu1 %777  ;;  %3949 = vmatmul.mubr.msk.bf16.vlgmr.msra.gmra.mxu1 %vm560_vm9, %v513_v31  ;;  %v890_v40 = vpop.permute.xlu0 %889 }
 0x147   : > { %v784_v41 = vsel %vm781_vm11, %v776_v28, %v778_v39  ;;  %v785_v42 = vsel %vm781_vm11, %v778_v39, %v780_v35  ;;  %874 = vmatprep.mubr.bf16.mxu1 %v4179_v6  ;;  %v519_v35 = vld [vmem:[%s4991_s2 + $0x18] sm:$0xf]  ;;  %vm2507_vm11 = vcmask 957440  }
 0x148   : > { %2267 = vrot.lane.b32.xlu1 %v4356_v59, %s4194_s18  ;;  %3952 = vmatprep.subr.msk.bf16.mxu1 %vm564_vm8, %v785_v42  ;;  %v796_v44 = vsel %vm564_vm8, %v784_v41, 0 }
 0x149   : > { %2273 = vrot.lane.b32.xlu0 %v4463_v33, %s4194_s18  ;;  %857 = vmatpush1.bf16.msra.mxu1 %v796_v44 }
 0x14a   : > { %v888_v45 = vpop.permute.xlu1 %887  ;;  %3951 = vmatmul.mubr.msk.bf16.vlgmr.msra.gmra.mxu0 %vm560_vm9, %v515_v43  ;;  %v894_v46 = vpop.permute.xlu0 %893 }
 0x14b   : > { %949 = vmatprep.mubr.bf16.mxu0 %v4179_v6  ;;  %v898_v47 = vsel %vm897_vm12, %v888_v45, %v890_v40 }
 0x14c   : > { %2271 = vrot.lane.b32.xlu1 %v4362_v63, %s4194_s18  ;;  %v906_v51 = vsel %vm564_vm8, %v898_v47, 0  ;;  %s4199_s18 = smov 37   ;;  %v520_v47 = vld [vmem:[%s4991_s2 + $0x1c] sm:$0xf] }
 0x14d   : > { %2383 = vrot.lane.b32.xlu0 %v4356_v59, %s4195_s25 }
 0x14e   : > { %v892_v48 = vpop.permute.xlu1 %891  ;;  %3953 = vmatmul.mubr.msk.bf16.vlgmr.msra.gmra.mxu1 %vm560_vm9, %v515_v43  ;;  %v1004_v49 = vpop.permute.xlu0 %1003 }
 0x14f   : > { %v899_v50 = vsel %vm897_vm12, %v890_v40, %v892_v48  ;;  %990 = vmatprep.mubr.bf16.mxu1 %v4179_v6  ;;  %v900_v52 = vsel %vm897_vm12, %v892_v48, %v894_v46 }
 0x150   : > { %2381 = vrot.lane.b32.xlu1 %v4360_v61, %s4195_s25  ;;  %3954 = vmatprep.subr.msk.bf16.mxu0 %vm564_vm8, %v899_v50  ;;  %v912_v57 = vsel %vm564_vm8, %v900_v52, 0 }
 0x151   : > { %2387 = vrot.lane.b32.xlu0 %v4362_v63, %s4195_s25  ;;  %932 = vmatpush1.bf16.msra.mxu0 %v906_v51 }
 0x152   : > { %v896_v53 = vpop.permute.xlu1 %895  ;;  %v1008_v54 = vpop.permute.xlu0 %1007 }
 0x153   : > { %v901_v55 = vsel %vm897_vm12, %v894_v46, %v896_v53  ;;  %vm2623_vm12 = vcmask 318464  }
 0x154   : > { %2385 = vrot.lane.b32.xlu1 %v4366_v0, %s4195_s25  ;;  %3956 = vmatprep.subr.msk.bf16.mxu1 %vm564_vm8, %v901_v55 }
 0x155   : > { %2497 = vrot.lane.b32.xlu0 %v4360_v61, %s4196_s19  ;;  %973 = vmatpush1.bf16.msra.mxu1 %v912_v57 }
 0x156   : > { %v1006_v58 = vpop.permute.xlu1 %1005  ;;  %3955 = vmatmul.mubr.msk.bf16.vlgmr.msra.gmra.mxu0 %vm560_vm9, %v516_v56  ;;  %v1012_v60 = vpop.permute.xlu0 %1011 }
 0x157   : > { %v1014_v62 = vsel %vm1013_vm13, %v1004_v49, %v1006_v58  ;;  %v1015_v1 = vsel %vm1013_vm13, %v1006_v58, %v1008_v54  ;;  %1065 = vmatprep.mubr.bf16.mxu0 %v4179_v6 }
 0x158   : > { %2389 = vrot.lane.b32.xlu1 %v4463_v33, %s4195_s25  ;;  %3958 = vmatprep.subr.msk.bf16.mxu0 %vm564_vm8, %v1015_v1  ;;  %v1022_v2 = vsel %vm564_vm8, %v1014_v62, 0  ;;  %s4200_s25 = smov 29  }
 0x159   : > { %2501 = vrot.lane.b32.xlu0 %v4366_v0, %s4196_s19  ;;  %1048 = vmatpush1.bf16.msra.mxu0 %v1022_v2 }
 0x15a   : > { %v1010_v3 = vpop.permute.xlu1 %1009  ;;  %3957 = vmatmul.mubr.msk.bf16.vlgmr.msra.gmra.mxu1 %vm560_vm9, %v516_v56  ;;  %v1122_v4 = vpop.permute.xlu0 %1121 }
 0x15b   : > { %v1016_v5 = vsel %vm1013_vm13, %v1008_v54, %v1010_v3  ;;  %v1017_v7 = vsel %vm1013_vm13, %v1010_v3, %v1012_v60  ;;  %1106 = vmatprep.mubr.bf16.mxu1 %v4179_v6  ;;  %v521_v60 = vld [vmem:[%s4991_s2 + $0x20] sm:$0xf]  ;;  %vm2739_vm13 = vcmask 310272  }
 0x15c   : > { %2499 = vrot.lane.b32.xlu1 %v4356_v59, %s4196_s19  ;;  %3960 = vmatprep.subr.msk.bf16.mxu1 %vm564_vm8, %v1017_v7  ;;  %v1028_v10 = vsel %vm564_vm8, %v1016_v5, 0 }
 0x15d   : > { %2505 = vrot.lane.b32.xlu0 %v4463_v33, %s4196_s19  ;;  %1089 = vmatpush1.bf16.msra.mxu1 %v1028_v10 }
 0x15e   : > { %v1120_v11 = vpop.permute.xlu1 %1119  ;;  %3959 = vmatmul.mubr.msk.bf16.vlgmr.msra.gmra.mxu0 %vm560_vm9, %v517_v9  ;;  %v1126_v12 = vpop.permute.xlu0 %1125 }
 0x15f   : > { %1181 = vmatprep.mubr.bf16.mxu0 %v4179_v6  ;;  %v1130_v13 = vsel %vm1129_vm14, %v1120_v11, %v1122_v4 }
 0x160   : > { %2503 = vrot.lane.b32.xlu1 %v4362_v63, %s4196_s19  ;;  %v1138_v18 = vsel %vm564_vm8, %v1130_v13, 0  ;;  %s4201_s19 = smov 28   ;;  %v522_v13 = vld [vmem:[%s4991_s2 + $0x24] sm:$0xf] }
 0x161   : > { %2615 = vrot.lane.b32.xlu0 %v4356_v59, %s4197_s30 }
 0x162   : > { %v1124_v14 = vpop.permute.xlu1 %1123  ;;  %3961 = vmatmul.mubr.msk.bf16.vlgmr.msra.gmra.mxu1 %vm560_vm9, %v517_v9  ;;  %v1236_v15 = vpop.permute.xlu0 %1235 }
 0x163   : > { %v1131_v16 = vsel %vm1129_vm14, %v1122_v4, %v1124_v14  ;;  %1222 = vmatprep.mubr.bf16.mxu1 %v4179_v6  ;;  %v1132_v20 = vsel %vm1129_vm14, %v1124_v14, %v1126_v12 }
 0x164   : > { %2613 = vrot.lane.b32.xlu1 %v4360_v61, %s4197_s30  ;;  %3962 = vmatprep.subr.msk.bf16.mxu0 %vm564_vm8, %v1131_v16  ;;  %v1144_v26 = vsel %vm564_vm8, %v1132_v20, 0 }
 0x165   : > { %2619 = vrot.lane.b32.xlu0 %v4362_v63, %s4197_s30  ;;  %1164 = vmatpush1.bf16.msra.mxu0 %v1138_v18 }
 0x166   : > { %v1128_v21 = vpop.permute.xlu1 %1127  ;;  %v1240_v24 = vpop.permute.xlu0 %1239 }
 0x167   : > { %v1133_v25 = vsel %vm1129_vm14, %v1126_v12, %v1128_v21  ;;  %vm2855_vm14 = vcmask 302080  }
 0x168   : > { %2617 = vrot.lane.b32.xlu1 %v4366_v0, %s4197_s30  ;;  %3964 = vmatprep.subr.msk.bf16.mxu1 %vm564_vm8, %v1133_v25 }
 0x169   : > { %2729 = vrot.lane.b32.xlu0 %v4360_v61, %s4198_s11  ;;  %3963 = vmatmul.mubr.msk.bf16.vlgmr.msra.gmra.mxu0 %vm560_vm9, %v518_v22 }
 0x16a   : > { %1205 = vmatpush1.bf16.msra.mxu1 %v1144_v26  ;;  %v1238_v27 = vpop.permute.xlu1 %1237  ;;  %1297 = vmatprep.mubr.bf16.mxu0 %v4179_v6  ;;  %v1244_v28 = vpop.permute.xlu0 %1243 }
 0x16b   : > { %v1246_v29 = vsel %vm1245_vm15, %v1236_v15, %v1238_v27  ;;  %v1247_v31 = vsel %vm1245_vm15, %v1238_v27, %v1240_v24 }
 0x16c   : > { %2621 = vrot.lane.b32.xlu1 %v4463_v33, %s4197_s30  ;;  %3966 = vmatprep.subr.msk.bf16.mxu0 %vm564_vm8, %v1247_v31  ;;  %v1254_v32 = vsel %vm564_vm8, %v1246_v29, 0  ;;  %s4202_s30 = smov 27  }
 0x16d   : > { %2733 = vrot.lane.b32.xlu0 %v4366_v0, %s4198_s11  ;;  %3965 = vmatmul.mubr.msk.bf16.vlgmr.msra.gmra.mxu1 %vm560_vm9, %v518_v22 }
 0x16e   : > { %1280 = vmatpush1.bf16.msra.mxu0 %v1254_v32  ;;  %v1242_v34 = vpop.permute.xlu1 %1241  ;;  %1338 = vmatprep.mubr.bf16.mxu1 %v4179_v6  ;;  %v1354_v36 = vpop.permute.xlu0 %1353 }
 0x16f   : > { %v1248_v37 = vsel %vm1245_vm15, %v1240_v24, %v1242_v34  ;;  %v1249_v38 = vsel %vm1245_vm15, %v1242_v34, %v1244_v28  ;;  %v523_v28 = vld [vmem:[%s4991_s2 + $0x28] sm:$0xf]  ;;  %vm2971_vm15 = vcmask 236544  }
 0x170   : > { %v1260_v39 = vsel %vm564_vm8, %v1248_v37, 0  ;;  %2731 = vrot.lane.b32.xlu1 %v4356_v59, %s4198_s11  ;;  %3968 = vmatprep.subr.msk.bf16.mxu1 %vm564_vm8, %v1249_v38 }
 0x171   : > { %2737 = vrot.lane.b32.xlu0 %v4463_v33, %s4198_s11  ;;  %3967 = vmatmul.mubr.msk.bf16.vlgmr.msra.gmra.mxu0 %vm560_vm9, %v519_v35 }
 0x172   : > { %1321 = vmatpush1.bf16.msra.mxu1 %v1260_v39  ;;  %v1352_v40 = vpop.permute.xlu1 %1351  ;;  %1413 = vmatprep.mubr.bf16.mxu0 %v4179_v6  ;;  %v1358_v41 = vpop.permute.xlu0 %1357 }
 0x173   : > { %v1362_v42 = vsel %vm1361_vm0, %v1352_v40, %v1354_v36 }
 0x174   : > { %2735 = vrot.lane.b32.xlu1 %v4362_v63, %s4198_s11  ;;  %v1370_v46 = vsel %vm564_vm8, %v1362_v42, 0  ;;  %s4203_s11 = smov 19   ;;  %v524_v42 = vld [vmem:[%s4991_s2 + $0x2c] sm:$0xf] }
 0x175   : > { %2847 = vrot.lane.b32.xlu0 %v4356_v59, %s4199_s18  ;;  %3969 = vmatmul.mubr.msk.bf16.vlgmr.msra.gmra.mxu1 %vm560_vm9, %v519_v35 }
 0x176   : > { %v1356_v43 = vpop.permute.xlu1 %1355  ;;  %1454 = vmatprep.mubr.bf16.mxu1 %v4179_v6  ;;  %v1468_v44 = vpop.permute.xlu0 %1467 }
 0x177   : > { %v1363_v45 = vsel %vm1361_vm0, %v1354_v36, %v1356_v43  ;;  %v1364_v48 = vsel %vm1361_vm0, %v1356_v43, %v1358_v41 }
 0x178   : > { %2845 = vrot.lane.b32.xlu1 %v4360_v61, %s4199_s18  ;;  %3970 = vmatprep.subr.msk.bf16.mxu0 %vm564_vm8, %v1363_v45  ;;  %v1376_v52 = vsel %vm564_vm8, %v1364_v48, 0 }
 0x179   : > { %2851 = vrot.lane.b32.xlu0 %v4362_v63, %s4199_s18  ;;  %1396 = vmatpush1.bf16.msra.mxu0 %v1370_v46 }
 0x17a   : > { %v1360_v49 = vpop.permute.xlu1 %1359  ;;  %v1472_v50 = vpop.permute.xlu0 %1471 }
 0x17b   : > { %v1365_v51 = vsel %vm1361_vm0, %v1358_v41, %v1360_v49  ;;  %vm3087_vm0 = vcmask 228352  }
 0x17c   : > { %2849 = vrot.lane.b32.xlu1 %v4366_v0, %s4199_s18  ;;  %3971 = vmatmul.mubr.msk.bf16.vlgmr.msra.gmra.mxu0 %vm560_vm9, %v520_v47 }
 0x17d   : > { %2961 = vrot.lane.b32.xlu0 %v4360_v61, %s4200_s25  ;;  %3972 = vmatprep.subr.msk.bf16.mxu1 %vm564_vm8, %v1365_v51 }
 0x17e   : > { %1437 = vmatpush1.bf16.msra.mxu1 %v1376_v52  ;;  %v1470_v53 = vpop.permute.xlu1 %1469  ;;  %1529 = vmatprep.mubr.bf16.mxu0 %v4179_v6  ;;  %v1476_v54 = vpop.permute.xlu0 %1475 }
 0x17f   : > { %v1478_v55 = vsel %vm1477_vm1, %v1468_v44, %v1470_v53  ;;  %v1479_v56 = vsel %vm1477_vm1, %v1470_v53, %v1472_v50 }
 0x180   : > { %v1486_v57 = vsel %vm564_vm8, %v1478_v55, 0  ;;  %2853 = vrot.lane.b32.xlu1 %v4463_v33, %s4199_s18  ;;  %3974 = vmatprep.subr.msk.bf16.mxu0 %vm564_vm8, %v1479_v56  ;;  %s4204_s18 = smov 18  }
 0x181   : > { %2965 = vrot.lane.b32.xlu0 %v4366_v0, %s4200_s25  ;;  %3973 = vmatmul.mubr.msk.bf16.vlgmr.msra.gmra.mxu1 %vm560_vm9, %v520_v47 }
 0x182   : > { %1512 = vmatpush1.bf16.msra.mxu0 %v1486_v57  ;;  %v1474_v58 = vpop.permute.xlu1 %1473  ;;  %1570 = vmatprep.mubr.bf16.mxu1 %v4179_v6  ;;  %v1586_v62 = vpop.permute.xlu0 %1585 }
 0x183   : > { %v1480_v1 = vsel %vm1477_vm1, %v1472_v50, %v1474_v58  ;;  %v1481_v2 = vsel %vm1477_vm1, %v1474_v58, %v1476_v54  ;;  %v525_v54 = vld [vmem:[%s4991_s2 + $0x30] sm:$0xf]  ;;  %vm3203_vm1 = vcmask 220160  }
 0x184   : > { %v1492_v3 = vsel %vm564_vm8, %v1480_v1, 0  ;;  %2963 = vrot.lane.b32.xlu1 %v4356_v59, %s4200_s25  ;;  %3976 = vmatprep.subr.msk.bf16.mxu1 %vm564_vm8, %v1481_v2  ;;  %v2057_v2 = vsel %vm564_vm8, %v4366_v0, 0 }
 0x185   : > { %2969 = vrot.lane.b32.xlu0 %v4463_v33, %s4200_s25  ;;  %3975 = vmatmul.mubr.msk.bf16.vlgmr.msra.gmra.mxu0 %vm560_vm9, %v521_v60 }
 0x186   : > { %1553 = vmatpush1.bf16.msra.mxu1 %v1492_v3  ;;  %v1584_v4 = vpop.permute.xlu1 %1583  ;;  %1645 = vmatprep.mubr.bf16.mxu0 %v4179_v6  ;;  %v1590_v5 = vpop.permute.xlu0 %1589 }
 0x187   : > { %v1594_v7 = vsel %vm1593_vm2, %v1584_v4, %v1586_v62 }
 0x188   : > { %2967 = vrot.lane.b32.xlu1 %v4362_v63, %s4200_s25  ;;  %v1602_v12 = vsel %vm564_vm8, %v1594_v7, 0  ;;  %s4205_s25 = smov 17  }
 0x189   : > { %3079 = vrot.lane.b32.xlu0 %v4356_v59, %s4201_s19  ;;  %3977 = vmatmul.mubr.msk.bf16.vlgmr.msra.gmra.mxu1 %vm560_vm9, %v521_v60  ;;  %v2051_v60 = vsel %vm564_vm8, %v4360_v61, 0 }
 0x18a   : > { %v1588_v9 = vpop.permute.xlu1 %1587  ;;  %1686 = vmatprep.mubr.bf16.mxu1 %v4179_v6  ;;  %v1700_v10 = vpop.permute.xlu0 %1699 }
 0x18b   : > { %v1595_v11 = vsel %vm1593_vm2, %v1586_v62, %v1588_v9  ;;  %v1596_v14 = vsel %vm1593_vm2, %v1588_v9, %v1590_v5 }
 0x18c   : > { %3077 = vrot.lane.b32.xlu1 %v4360_v61, %s4201_s19  ;;  %3978 = vmatprep.subr.msk.bf16.mxu0 %vm564_vm8, %v1595_v11  ;;  %v1608_v20 = vsel %vm564_vm8, %v1596_v14, 0  ;;  %v527_v14 = vld [vmem:[%s4991_s2 + $0x38] sm:$0xf] }
 0x18d   : > { %3083 = vrot.lane.b32.xlu0 %v4362_v63, %s4201_s19  ;;  %1628 = vmatpush1.bf16.msra.mxu0 %v1602_v12 }
 0x18e   : > { %v1592_v15 = vpop.permute.xlu1 %1591  ;;  %v1704_v16 = vpop.permute.xlu0 %1703 }
 0x18f   : > { %v1597_v18 = vsel %vm1593_vm2, %v1590_v5, %v1592_v15  ;;  %v526_v5 = vld [vmem:[%s4991_s2 + $0x34] sm:$0xf]  ;;  %vm3319_vm2 = vcmask 154624  }
 0x190   : > { %3081 = vrot.lane.b32.xlu1 %v4366_v0, %s4201_s19  ;;  %3979 = vmatmul.mubr.msk.bf16.vlgmr.msra.gmra.mxu0 %vm560_vm9, %v522_v13 }
 0x191   : > { %3193 = vrot.lane.b32.xlu0 %v4360_v61, %s4202_s30  ;;  %3980 = vmatprep.subr.msk.bf16.mxu1 %vm564_vm8, %v1597_v18 }
 0x192   : > { %1669 = vmatpush1.bf16.msra.mxu1 %v1608_v20  ;;  %v1702_v21 = vpop.permute.xlu1 %1701  ;;  %1761 = vmatprep.mubr.bf16.mxu0 %v4179_v6  ;;  %v1708_v22 = vpop.permute.xlu0 %1707 }
 0x193   : > { %v1710_v24 = vsel %vm1709_vm3, %v1700_v10, %v1702_v21  ;;  %v1711_v25 = vsel %vm1709_vm3, %v1702_v21, %v1704_v16 }
 0x194   : > { %v1718_v26 = vsel %vm564_vm8, %v1710_v24, 0  ;;  %3085 = vrot.lane.b32.xlu1 %v4463_v33, %s4201_s19  ;;  %3982 = vmatprep.subr.msk.bf16.mxu0 %vm564_vm8, %v1711_v25 }
 0x195   : > { %3197 = vrot.lane.b32.xlu0 %v4366_v0, %s4202_s30  ;;  %3981 = vmatmul.mubr.msk.bf16.vlgmr.msra.gmra.mxu1 %vm560_vm9, %v522_v13 }
 0x196   : > { %1744 = vmatpush1.bf16.msra.mxu0 %v1718_v26  ;;  %v1706_v27 = vpop.permute.xlu1 %1705  ;;  %1802 = vmatprep.mubr.bf16.mxu1 %v4179_v6  ;;  %v1818_v29 = vpop.permute.xlu0 %1817  ;;  %v528_v26 = vld [vmem:[%s4991_s2 + $0x3c] sm:$0xf] }
 0x197   : > { %v1712_v31 = vsel %vm1709_vm3, %v1704_v16, %v1706_v27  ;;  %v1713_v32 = vsel %vm1709_vm3, %v1706_v27, %v1708_v22  ;;  %vm3435_vm3 = vcmask 146432  }
 0x198   : > { %v1724_v34 = vsel %vm564_vm8, %v1712_v31, 0  ;;  %3195 = vrot.lane.b32.xlu1 %v4356_v59, %s4202_s30  ;;  %3984 = vmatprep.subr.msk.bf16.mxu1 %vm564_vm8, %v1713_v32 }
 0x199   : > { %3201 = vrot.lane.b32.xlu0 %v4463_v33, %s4202_s30  ;;  %3983 = vmatmul.mubr.msk.bf16.vlgmr.msra.gmra.mxu0 %vm560_vm9, %v523_v28 }
 0x19a   : > { %1785 = vmatpush1.bf16.msra.mxu1 %v1724_v34  ;;  %v1816_v35 = vpop.permute.xlu1 %1815  ;;  %1877 = vmatprep.mubr.bf16.mxu0 %v4179_v6  ;;  %v1822_v36 = vpop.permute.xlu0 %1821 }
 0x19b   : > { %v1826_v37 = vsel %vm1825_vm4, %v1816_v35, %v1818_v29 }
 0x19c   : > { %3199 = vrot.lane.b32.xlu1 %v4362_v63, %s4202_s30  ;;  %v1834_v41 = vsel %vm564_vm8, %v1826_v37, 0  ;;  %v529_v37 = vld [vmem:[%s4991_s2 + $0x40] sm:$0xf] }
 0x19d   : > { %3311 = vrot.lane.b32.xlu0 %v4356_v59, %s4203_s11  ;;  %3985 = vmatmul.mubr.msk.bf16.vlgmr.msra.gmra.mxu1 %vm560_vm9, %v523_v28 }
 0x19e   : > { %v1820_v38 = vpop.permute.xlu1 %1819  ;;  %1918 = vmatprep.mubr.bf16.mxu1 %v4179_v6  ;;  %v1932_v39 = vpop.permute.xlu0 %1931 }
 0x19f   : > { %v1827_v40 = vsel %vm1825_vm4, %v1818_v29, %v1820_v38  ;;  %v1828_v43 = vsel %vm1825_vm4, %v1820_v38, %v1822_v36 }
 0x1a0   : > { %3309 = vrot.lane.b32.xlu1 %v4360_v61, %s4203_s11  ;;  %3986 = vmatprep.subr.msk.bf16.mxu0 %vm564_vm8, %v1827_v40  ;;  %v1840_v47 = vsel %vm564_vm8, %v1828_v43, 0 }
 0x1a1   : > { %3315 = vrot.lane.b32.xlu0 %v4362_v63, %s4203_s11  ;;  %1860 = vmatpush1.bf16.msra.mxu0 %v1834_v41 }
 0x1a2   : > { %v1824_v44 = vpop.permute.xlu1 %1823 }
 0x1a3   : > { %v1936_v45 = vpop.permute.xlu0 %1935  ;;  %v1829_v46 = vsel %vm1825_vm4, %v1822_v36, %v1824_v44  ;;  %vm3551_vm4 = vcmask 138240  }
 0x1a4   : > { %3313 = vrot.lane.b32.xlu1 %v4366_v0, %s4203_s11  ;;  %3987 = vmatmul.mubr.msk.bf16.vlgmr.msra.gmra.mxu0 %vm560_vm9, %v524_v42 }
 0x1a5   : > { %3425 = vrot.lane.b32.xlu0 %v4360_v61, %s4204_s18  ;;  %3988 = vmatprep.subr.msk.bf16.mxu1 %vm564_vm8, %v1829_v46 }
 0x1a6   : > { %1901 = vmatpush1.bf16.msra.mxu1 %v1840_v47  ;;  %v1934_v48 = vpop.permute.xlu1 %1933  ;;  %1993 = vmatprep.mubr.bf16.mxu0 %v4179_v6  ;;  %v530_v47 = vld [vmem:[%s4991_s2 + $0x44] sm:$0xf] }
 0x1a7   : > { %v1940_v49 = vpop.permute.xlu0 %1939  ;;  %v1942_v50 = vsel %vm1941_vm5, %v1932_v39, %v1934_v48  ;;  %v1943_v51 = vsel %vm1941_vm5, %v1934_v48, %v1936_v45 }
 0x1a8   : > { %v1950_v52 = vsel %vm564_vm8, %v1942_v50, 0  ;;  %3317 = vrot.lane.b32.xlu1 %v4463_v33, %s4203_s11  ;;  %3990 = vmatprep.subr.msk.bf16.mxu0 %vm564_vm8, %v1943_v51 }
 0x1a9   : > { %3429 = vrot.lane.b32.xlu0 %v4366_v0, %s4204_s18  ;;  %3989 = vmatmul.mubr.msk.bf16.vlgmr.msra.gmra.mxu1 %vm560_vm9, %v524_v42 }
 0x1aa   : > { %1976 = vmatpush1.bf16.msra.mxu0 %v1950_v52  ;;  %v1938_v53 = vpop.permute.xlu1 %1937  ;;  %2034 = vmatprep.mubr.bf16.mxu1 %v4179_v6 }
 0x1ab   : > { %v2152_v55 = vpop.permute.xlu0 %2151  ;;  %3994 = vmatprep.subr.msk.bf16.mxu0 %vm564_vm8, %v4356_v59  ;;  %v1944_v56 = vsel %vm1941_vm5, %v1936_v45, %v1938_v53  ;;  %v1945_v57 = vsel %vm1941_vm5, %v1938_v53, %v1940_v49 }
 0x1ac   : > { %v1956_v58 = vsel %vm564_vm8, %v1944_v56, 0  ;;  %3427 = vrot.lane.b32.xlu1 %v4356_v59, %s4204_s18  ;;  %3992 = vmatprep.subr.msk.bf16.mxu1 %vm564_vm8, %v1945_v57 }
 0x1ad   : > { %3433 = vrot.lane.b32.xlu0 %v4463_v33, %s4204_s18  ;;  %3991 = vmatmul.mubr.msk.bf16.vlgmr.msra.gmra.mxu0 %vm560_vm9, %v525_v54 }
 0x1ae   : > { %2017 = vmatpush1.bf16.msra.mxu1 %v1956_v58  ;;  %2077 = vmatpush1.bf16.msra.mxu0 %v2051_v60  ;;  %v2150_v62 = vpop.permute.xlu1 %2149 }
 0x1af   : > { %v2156_v1 = vpop.permute.xlu0 %2155  ;;  %3996 = vmatprep.subr.msk.bf16.mxu1 %vm564_vm8, %v4362_v63  ;;  %2094 = vmatprep.mubr.bf16.mxu0 %v4179_v6  ;;  %v2160_v3 = vsel %vm2159_vm6, %v2150_v62, %v2152_v55  ;;  %v531_v62 = vld [vmem:[%s4991_s2 + $0x48] sm:$0xf] }
 0x1b0   : > { %3431 = vrot.lane.b32.xlu1 %v4362_v63, %s4204_s18 }
 0x1b1   : > { %3543 = vrot.lane.b32.xlu0 %v4356_v59, %s4205_s25  ;;  %3993 = vmatmul.mubr.msk.bf16.vlgmr.msra.gmra.mxu1 %vm560_vm9, %v525_v54  ;;  %v2168_v59 = vsel %vm564_vm8, %v2160_v3, 0 }
 0x1b2   : > { %2118 = vmatpush1.bf16.msra.mxu1 %v2057_v2  ;;  %v2154_v4 = vpop.permute.xlu1 %2153  ;;  %2135 = vmatprep.mubr.bf16.mxu1 %v4179_v6 }
 0x1b3   : > { %v2266_v7 = vpop.permute.xlu0 %2265  ;;  %v2161_v9 = vsel %vm2159_vm6, %v2152_v55, %v2154_v4  ;;  %v2162_v10 = vsel %vm2159_vm6, %v2154_v4, %v2156_v1 }
 0x1b4   : > { %3541 = vrot.lane.b32.xlu1 %v4360_v61, %s4205_s25  ;;  %3998 = vmatprep.subr.msk.bf16.mxu0 %vm564_vm8, %v2161_v9  ;;  %v2174_v61 = vsel %vm564_vm8, %v2162_v10, 0 }
 0x1b5   : > { %3547 = vrot.lane.b32.xlu0 %v4362_v63, %s4205_s25  ;;  %3995 = vmatmul.mubr.msk.bf16.vlgmr.msra.gmra.mxu0 %vm560_vm9, %v526_v5 }
 0x1b6   : > { %2194 = vmatpush1.bf16.msra.mxu0 %v2168_v59  ;;  %v2158_v11 = vpop.permute.xlu1 %2157  ;;  %2211 = vmatprep.mubr.bf16.mxu0 %v4179_v6 }
 0x1b7   : > { %v2270_v12 = vpop.permute.xlu0 %2269  ;;  %v2163_v13 = vsel %vm2159_vm6, %v2156_v1, %v2158_v11  ;;  %v532_v11 = vld [vmem:[%s4991_s2 + $0x4c] sm:$0xf] }
 0x1b8   : > { %3545 = vrot.lane.b32.xlu1 %v4366_v0, %s4205_s25  ;;  %4000 = vmatprep.subr.msk.bf16.mxu1 %vm564_vm8, %v2163_v13 }
 0x1b9   : > { %3997 = vmatmul.mubr.msk.bf16.vlgmr.msra.gmra.mxu1 %vm560_vm9, %v526_v5 }
 0x1ba   : > { %2235 = vmatpush1.bf16.msra.mxu1 %v2174_v61  ;;  %v2268_v63 = vpop.permute.xlu1 %2267  ;;  %2252 = vmatprep.mubr.bf16.mxu1 %v4179_v6 }
 0x1bb   : > { %v2274_v15 = vpop.permute.xlu0 %2273  ;;  %v2276_v16 = vsel %vm2275_vm7, %v2266_v7, %v2268_v63  ;;  %v2277_v0 = vsel %vm2275_vm7, %v2268_v63, %v2270_v12 }
 0x1bc   : > { %v2284_v18 = vsel %vm564_vm8, %v2276_v16, 0  ;;  %3549 = vrot.lane.b32.xlu1 %v4463_v33, %s4205_s25  ;;  %4002 = vmatprep.subr.msk.bf16.mxu0 %vm564_vm8, %v2277_v0 }
 0x1bd   : > { %3999 = vmatmul.mubr.msk.bf16.vlgmr.msra.gmra.mxu0 %vm560_vm9, %v527_v14 }
 0x1be   : > { %2310 = vmatpush1.bf16.msra.mxu0 %v2284_v18  ;;  %v2272_v20 = vpop.permute.xlu1 %2271  ;;  %2327 = vmatprep.mubr.bf16.mxu0 %v4179_v6 }
 0x1bf   : > { %v2384_v21 = vpop.permute.xlu0 %2383  ;;  %v2278_v22 = vsel %vm2275_vm7, %v2270_v12, %v2272_v20  ;;  %v2279_v24 = vsel %vm2275_vm7, %v2272_v20, %v2274_v15 }
 0x1c0   : > { %v2290_v25 = vsel %vm564_vm8, %v2278_v22, 0  ;;  %4004 = vmatprep.subr.msk.bf16.mxu1 %vm564_vm8, %v2279_v24 }
 0x1c1   : > { %4001 = vmatmul.mubr.msk.bf16.vlgmr.msra.gmra.mxu1 %vm560_vm9, %v527_v14 }
 0x1c2   : > { %2351 = vmatpush1.bf16.msra.mxu1 %v2290_v25  ;;  %v2382_v33 = vpop.permute.xlu1 %2381  ;;  %2368 = vmatprep.mubr.bf16.mxu1 %v4179_v6  ;;  %v533_v25 = vld [vmem:[%s4991_s2 + $0x50] sm:$0xf] }
 0x1c3   : > { %v2388_v27 = vpop.permute.xlu0 %2387  ;;  %v2392_v28 = vsel %vm2391_vm10, %v2382_v33, %v2384_v21 }
 0x1c4   : > { %v2400_v34 = vsel %vm564_vm8, %v2392_v28, 0 }
 0x1c5   : > { %4003 = vmatmul.mubr.msk.bf16.vlgmr.msra.gmra.mxu0 %vm560_vm9, %v528_v26 }
 0x1c6   : > { %v2386_v29 = vpop.permute.xlu1 %2385  ;;  %2443 = vmatprep.mubr.bf16.mxu0 %v4179_v6 }
 0x1c7   : > { %v2498_v31 = vpop.permute.xlu0 %2497  ;;  %v2393_v32 = vsel %vm2391_vm10, %v2384_v21, %v2386_v29  ;;  %v2394_v35 = vsel %vm2391_vm10, %v2386_v29, %v2388_v27 }
 0x1c8   : > { %4006 = vmatprep.subr.msk.bf16.mxu0 %vm564_vm8, %v2393_v32  ;;  %v2406_v40 = vsel %vm564_vm8, %v2394_v35, 0 }
 0x1c9   : > { %4005 = vmatmul.mubr.msk.bf16.vlgmr.msra.gmra.mxu1 %vm560_vm9, %v528_v26  ;;  %2426 = vmatpush1.bf16.msra.mxu0 %v2400_v34 }
 0x1ca   : > { %v2390_v36 = vpop.permute.xlu1 %2389  ;;  %2484 = vmatprep.mubr.bf16.mxu1 %v4179_v6 }
 0x1cb   : > { %v2502_v38 = vpop.permute.xlu0 %2501  ;;  %v2395_v39 = vsel %vm2391_vm10, %v2388_v27, %v2390_v36 }
 0x1cc   : > { %4008 = vmatprep.subr.msk.bf16.mxu1 %vm564_vm8, %v2395_v39  ;;  %v534_v39 = vld [vmem:[%s4991_s2 + $0x54] sm:$0xf] }
 0x1cd   : > { %4007 = vmatmul.mubr.msk.bf16.vlgmr.msra.gmra.mxu0 %vm560_vm9, %v529_v37  ;;  %2467 = vmatpush1.bf16.msra.mxu1 %v2406_v40 }
 0x1ce   : > { %v2500_v41 = vpop.permute.xlu1 %2499  ;;  %2559 = vmatprep.mubr.bf16.mxu0 %v4179_v6 }
 0x1cf   : > { %v2506_v42 = vpop.permute.xlu0 %2505  ;;  %v2508_v43 = vsel %vm2507_vm11, %v2498_v31, %v2500_v41  ;;  %v2509_v44 = vsel %vm2507_vm11, %v2500_v41, %v2502_v38 }
 0x1d0   : > { %v2516_v45 = vsel %vm564_vm8, %v2508_v43, 0  ;;  %4010 = vmatprep.subr.msk.bf16.mxu0 %vm564_vm8, %v2509_v44 }
 0x1d1   : > { %4009 = vmatmul.mubr.msk.bf16.vlgmr.msra.gmra.mxu1 %vm560_vm9, %v529_v37  ;;  %2542 = vmatpush1.bf16.msra.mxu0 %v2516_v45 }
 0x1d2   : > { %v2504_v46 = vpop.permute.xlu1 %2503  ;;  %2600 = vmatprep.mubr.bf16.mxu1 %v4179_v6 }
 0x1d3   : > { %v2616_v48 = vpop.permute.xlu0 %2615  ;;  %v2510_v49 = vsel %vm2507_vm11, %v2502_v38, %v2504_v46  ;;  %v2511_v50 = vsel %vm2507_vm11, %v2504_v46, %v2506_v42 }
 0x1d4   : > { %v2522_v51 = vsel %vm564_vm8, %v2510_v49, 0  ;;  %4012 = vmatprep.subr.msk.bf16.mxu1 %vm564_vm8, %v2511_v50 }
 0x1d5   : > { %4011 = vmatmul.mubr.msk.bf16.vlgmr.msra.gmra.mxu0 %vm560_vm9, %v530_v47  ;;  %2583 = vmatpush1.bf16.msra.mxu1 %v2522_v51 }
 0x1d6   : > { %v2614_v52 = vpop.permute.xlu1 %2613  ;;  %2675 = vmatprep.mubr.bf16.mxu0 %v4179_v6 }
 0x1d7   : > { %v2620_v53 = vpop.permute.xlu0 %2619  ;;  %v2624_v54 = vsel %vm2623_vm12, %v2614_v52, %v2616_v48 }
 0x1d8   : > { %v2632_v58 = vsel %vm564_vm8, %v2624_v54, 0 }
 0x1d9   : > { %4013 = vmatmul.mubr.msk.bf16.vlgmr.msra.gmra.mxu1 %vm560_vm9, %v530_v47 }
 0x1da   : > { %v2618_v55 = vpop.permute.xlu1 %2617  ;;  %2716 = vmatprep.mubr.bf16.mxu1 %v4179_v6 }
 0x1db   : > { %v2730_v56 = vpop.permute.xlu0 %2729  ;;  %v2625_v57 = vsel %vm2623_vm12, %v2616_v48, %v2618_v55  ;;  %v2626_v60 = vsel %vm2623_vm12, %v2618_v55, %v2620_v53 }
 0x1dc   : > { %4014 = vmatprep.subr.msk.bf16.mxu0 %vm564_vm8, %v2625_v57  ;;  %v2638_v4 = vsel %vm564_vm8, %v2626_v60, 0 }
 0x1dd   : > { %2658 = vmatpush1.bf16.msra.mxu0 %v2632_v58 }
 0x1de   : > { %v2622_v1 = vpop.permute.xlu1 %2621 }
 0x1df   : > { %v2734_v2 = vpop.permute.xlu0 %2733  ;;  %v2627_v3 = vsel %vm2623_vm12, %v2620_v53, %v2622_v1  ;;  %v535_v1 = vld [vmem:[%s4991_s2 + $0x58] sm:$0xf] }
 0x1e0   : > { %4015 = vmatmul.mubr.msk.bf16.vlgmr.msra.gmra.mxu0 %vm560_vm9, %v531_v62  ;;  %4016 = vmatprep.subr.msk.bf16.mxu1 %vm564_vm8, %v2627_v3 }
 0x1e1   : > { %2699 = vmatpush1.bf16.msra.mxu1 %v2638_v4  ;;  %2791 = vmatprep.mubr.bf16.mxu0 %v4179_v6 }
 0x1e2   : > { %v2732_v5 = vpop.permute.xlu1 %2731 }
 0x1e3   : > { %v2738_v7 = vpop.permute.xlu0 %2737  ;;  %v2740_v9 = vsel %vm2739_vm13, %v2730_v56, %v2732_v5  ;;  %v2741_v59 = vsel %vm2739_vm13, %v2732_v5, %v2734_v2 }
 0x1e4   : > { %v2748_v10 = vsel %vm564_vm8, %v2740_v9, 0  ;;  %4017 = vmatmul.mubr.msk.bf16.vlgmr.msra.gmra.mxu1 %vm560_vm9, %v531_v62  ;;  %4018 = vmatprep.subr.msk.bf16.mxu0 %vm564_vm8, %v2741_v59 }
 0x1e5   : > { %2774 = vmatpush1.bf16.msra.mxu0 %v2748_v10  ;;  %2832 = vmatprep.mubr.bf16.mxu1 %v4179_v6 }
 0x1e6   : > { %v2736_v12 = vpop.permute.xlu1 %2735 }
 0x1e7   : > { %v2848_v13 = vpop.permute.xlu0 %2847  ;;  %v2742_v61 = vsel %vm2739_vm13, %v2734_v2, %v2736_v12  ;;  %v2743_v63 = vsel %vm2739_vm13, %v2736_v12, %v2738_v7 }
 0x1e8   : > { %v2754_v14 = vsel %vm564_vm8, %v2742_v61, 0  ;;  %4019 = vmatmul.mubr.msk.bf16.vlgmr.msra.gmra.mxu0 %vm560_vm9, %v532_v11  ;;  %4020 = vmatprep.subr.msk.bf16.mxu1 %vm564_vm8, %v2743_v63 }
 0x1e9   : > { %2815 = vmatpush1.bf16.msra.mxu1 %v2754_v14  ;;  %2907 = vmatprep.mubr.bf16.mxu0 %v4179_v6 }
 0x1ea   : > { %v2846_v15 = vpop.permute.xlu1 %2845 }
 0x1eb   : > { %v2852_v16 = vpop.permute.xlu0 %2851  ;;  %v2856_v0 = vsel %vm2855_vm14, %v2846_v15, %v2848_v13 }
 0x1ec   : > { %4021 = vmatmul.mubr.msk.bf16.vlgmr.msra.gmra.mxu1 %vm560_vm9, %v532_v11  ;;  %v2864_v22 = vsel %vm564_vm8, %v2856_v0, 0 }
 0x1ed   : > { %2948 = vmatprep.mubr.bf16.mxu1 %v4179_v6 }
 0x1ee   : > { %v2850_v18 = vpop.permute.xlu1 %2849 }
 0x1ef   : > { %v2962_v20 = vpop.permute.xlu0 %2961  ;;  %v2857_v21 = vsel %vm2855_vm14, %v2848_v13, %v2850_v18  ;;  %v2858_v24 = vsel %vm2855_vm14, %v2850_v18, %v2852_v16 }
 0x1f0   : > { %4022 = vmatprep.subr.msk.bf16.mxu0 %vm564_vm8, %v2857_v21  ;;  %v2870_v28 = vsel %vm564_vm8, %v2858_v24, 0 }
 0x1f1   : > { %2890 = vmatpush1.bf16.msra.mxu0 %v2864_v22  ;;  %v536_v22 = vld [vmem:[%s4991_s2 + $0x5c] sm:$0xf] }
 0x1f2   : > { %v2854_v33 = vpop.permute.xlu1 %2853 }
 0x1f3   : > { %v2966_v26 = vpop.permute.xlu0 %2965  ;;  %v2859_v27 = vsel %vm2855_vm14, %v2852_v16, %v2854_v33 }
 0x1f4   : > { %4023 = vmatmul.mubr.msk.bf16.vlgmr.msra.gmra.mxu0 %vm560_vm9, %v533_v25  ;;  %4024 = vmatprep.subr.msk.bf16.mxu1 %vm564_vm8, %v2859_v27 }
 0x1f5   : > { %2931 = vmatpush1.bf16.msra.mxu1 %v2870_v28  ;;  %3023 = vmatprep.mubr.bf16.mxu0 %v4179_v6 }
 0x1f6   : > { %v2964_v29 = vpop.permute.xlu1 %2963  ;;  %v611_v31 = vpop.f32.mrf.mxu0 }
 0x1f7   : > { %v2970_v32 = vpop.permute.xlu0 %2969  ;;  %v2972_v34 = vsel %vm2971_vm15, %v2962_v20, %v2964_v29  ;;  %v2973_v35 = vsel %vm2971_vm15, %v2964_v29, %v2966_v26 }
 0x1f8   : > { %v2980_v36 = vsel %vm564_vm8, %v2972_v34, 0  ;;  %4025 = vmatmul.mubr.msk.bf16.vlgmr.msra.gmra.mxu1 %vm560_vm9, %v533_v25  ;;  %4026 = vmatprep.subr.msk.bf16.mxu0 %vm564_vm8, %v2973_v35  ;;  %v613_v37 = vpop.f32.mrf.mxu0  ;;  %v652_v38 = vpop.f32.mrf.mxu1 }
 0x1f9   : > { %3006 = vmatpush1.bf16.msra.mxu0 %v2980_v36  ;;  %3064 = vmatprep.mubr.bf16.mxu1 %v4179_v6 }
 0x1fa   : > { %v2968_v40 = vpop.permute.xlu1 %2967  ;;  %v615_v41 = vpop.f32.mrf.mxu0 }
 0x1fb   : > { %v3080_v42 = vpop.permute.xlu0 %3079  ;;  %v2974_v43 = vsel %vm2971_vm15, %v2966_v26, %v2968_v40  ;;  %v2975_v44 = vsel %vm2971_vm15, %v2968_v40, %v2970_v32  ;;  %v654_v45 = vpop.f32.mrf.mxu1 }
 0x1fc   : > { %v2986_v46 = vsel %vm564_vm8, %v2974_v43, 0  ;;  %4027 = vmatmul.mubr.msk.bf16.vlgmr.msra.gmra.mxu0 %vm560_vm9, %v534_v39  ;;  %4028 = vmatprep.subr.msk.bf16.mxu1 %vm564_vm8, %v2975_v44  ;;  %v616_v47 = vpop.f32.mrf.mxu0 }
 0x1fd   : > { %3047 = vmatpush1.bf16.msra.mxu1 %v2986_v46  ;;  %3139 = vmatprep.mubr.bf16.mxu0 %v4179_v6  ;;  %v656_v48 = vpop.f32.mrf.mxu1 }
 0x1fe   : > { %v3078_v49 = vpop.permute.xlu1 %3077 }
 0x1ff   : > { %v3084_v50 = vpop.permute.xlu0 %3083  ;;  %v657_v51 = vpop.f32.mrf.mxu1  ;;  %v3088_v52 = vsel %vm3087_vm0, %v3078_v49, %v3080_v42 }
 0x200   : > { %4029 = vmatmul.mubr.msk.bf16.vlgmr.msra.gmra.mxu1 %vm560_vm9, %v534_v39  ;;  %v3096_v58 = vsel %vm564_vm8, %v3088_v52, 0  ;;  %v537_v52 = vld [vmem:[%s4991_s2 + $0x60] sm:$0xf] }
 0x201   : > { %3180 = vmatprep.mubr.bf16.mxu1 %v4179_v6 }
 0x202   : > { %v3082_v53 = vpop.permute.xlu1 %3081  ;;  %v723_v54 = vpop.f32.mrf.mxu0 }
 0x203   : > { %v3194_v55 = vpop.permute.xlu0 %3193  ;;  %v3089_v56 = vsel %vm3087_vm0, %v3080_v42, %v3082_v53  ;;  %v724_v57 = vadd.f32 %v723_v54, %v611_v31  ;;  %v3090_v62 = vsel %vm3087_vm0, %v3082_v53, %v3084_v50 }
 0x204   : > { %4030 = vmatprep.subr.msk.bf16.mxu0 %vm564_vm8, %v3089_v56  ;;  %v725_v60 = vpop.f32.mrf.mxu0  ;;  %v3102_v10 = vsel %vm564_vm8, %v3090_v62, 0 }
 0x205   : > { %3122 = vmatpush1.bf16.msra.mxu0 %v3096_v58  ;;  %v726_v2 = vadd.f32 %v725_v60, %v613_v37 }
 0x206   : > { %v3086_v3 = vpop.permute.xlu1 %3085  ;;  %v764_v4 = vpop.f32.mrf.mxu1 }
 0x207   : > { %v3198_v5 = vpop.permute.xlu0 %3197  ;;  %v3091_v7 = vsel %vm3087_vm0, %v3084_v50, %v3086_v3  ;;  %v765_v9 = vadd.f32 %v764_v4, %v652_v38  ;;  %v727_v59 = vpop.f32.mrf.mxu0 }
 0x208   : > { %4031 = vmatmul.mubr.msk.bf16.vlgmr.msra.gmra.mxu0 %vm560_vm9, %v535_v1  ;;  %4032 = vmatprep.subr.msk.bf16.mxu1 %vm564_vm8, %v3091_v7  ;;  %v766_v11 = vpop.f32.mrf.mxu1 }
 0x209   : > { %3163 = vmatpush1.bf16.msra.mxu1 %v3102_v10  ;;  %v767_v12 = vadd.f32 %v766_v11, %v654_v45  ;;  %v728_v13 = vpop.f32.mrf.mxu0  ;;  %3255 = vmatprep.mubr.bf16.mxu0 %v4179_v6 }
 0x20a   : > { %v3196_v61 = vpop.permute.xlu1 %3195  ;;  %v768_v63 = vpop.f32.mrf.mxu1 }
 0x20b   : > { %v3202_v14 = vpop.permute.xlu0 %3201  ;;  %v3204_v15 = vsel %vm3203_vm1, %v3194_v55, %v3196_v61  ;;  %v3205_v16 = vsel %vm3203_vm1, %v3196_v61, %v3198_v5  ;;  %v835_v0 = vpop.f32.mrf.mxu0  ;;  %v538_v61 = vld [vmem:[%s4991_s2 + $0x64] sm:$0xf] }
 0x20c   : > { %v3212_v18 = vsel %vm564_vm8, %v3204_v15, 0  ;;  %4033 = vmatmul.mubr.msk.bf16.vlgmr.msra.gmra.mxu1 %vm560_vm9, %v535_v1  ;;  %4034 = vmatprep.subr.msk.bf16.mxu0 %vm564_vm8, %v3205_v16  ;;  %v883_v20 = vadd.f32 %v835_v0, %v724_v57  ;;  %v769_v21 = vpop.f32.mrf.mxu1 }
 0x20d   : > { %3238 = vmatpush1.bf16.msra.mxu0 %v3212_v18  ;;  %v837_v24 = vpop.f32.mrf.mxu0  ;;  %3296 = vmatprep.mubr.bf16.mxu1 %v4179_v6 }
 0x20e   : > { %v3200_v25 = vpop.permute.xlu1 %3199  ;;  %v884_v33 = vadd.f32 %v837_v24, %v726_v2  ;;  %v876_v26 = vpop.f32.mrf.mxu1 }
 0x20f   : > { %v3312_v27 = vpop.permute.xlu0 %3311  ;;  %v3206_v28 = vsel %vm3203_vm1, %v3198_v5, %v3200_v25  ;;  %v3207_v29 = vsel %vm3203_vm1, %v3200_v25, %v3202_v14  ;;  %v885_v31 = vadd.f32 %v876_v26, %v765_v9  ;;  %v839_v32 = vpop.f32.mrf.mxu0 }
 0x210   : > { %v3218_v34 = vsel %vm564_vm8, %v3206_v28, 0  ;;  %4035 = vmatmul.mubr.msk.bf16.vlgmr.msra.gmra.mxu0 %vm560_vm9, %v536_v22  ;;  %4036 = vmatprep.subr.msk.bf16.mxu1 %vm564_vm8, %v3207_v29  ;;  %v878_v35 = vpop.f32.mrf.mxu1 }
 0x211   : > { %3279 = vmatpush1.bf16.msra.mxu1 %v3218_v34  ;;  %v886_v36 = vadd.f32 %v878_v35, %v767_v12  ;;  %v840_v37 = vpop.f32.mrf.mxu0  ;;  %3371 = vmatprep.mubr.bf16.mxu0 %v4179_v6 }
 0x212   : > { %v3310_v38 = vpop.permute.xlu1 %3309  ;;  %v880_v39 = vpop.f32.mrf.mxu1 }
 0x213   : > { %v3316_v40 = vpop.permute.xlu0 %3315  ;;  %v3320_v42 = vsel %vm3319_vm2, %v3310_v38, %v3312_v27 }
 0x214   : > { %4037 = vmatmul.mubr.msk.bf16.vlgmr.msra.gmra.mxu1 %vm560_vm9, %v536_v22  ;;  %v881_v41 = vpop.f32.mrf.mxu1  ;;  %v3328_v48 = vsel %vm564_vm8, %v3320_v42, 0 }
 0x215   : > { %3412 = vmatprep.mubr.bf16.mxu1 %v4179_v6 }
 0x216   : > { %v3314_v43 = vpop.permute.xlu1 %3313  ;;  %v951_v44 = vpop.f32.mrf.mxu0 }
 0x217   : > { %v3426_v45 = vpop.permute.xlu0 %3425  ;;  %v3321_v46 = vsel %vm3319_vm2, %v3312_v27, %v3314_v43  ;;  %v999_v47 = vadd.f32 %v951_v44, %v883_v20  ;;  %v3322_v50 = vsel %vm3319_vm2, %v3314_v43, %v3316_v40  ;;  %v539_v43 = vld [vmem:[%s4991_s2 + $0x68] sm:$0xf] }
 0x218   : > { %4038 = vmatprep.subr.msk.bf16.mxu0 %vm564_vm8, %v3321_v46  ;;  %v953_v49 = vpop.f32.mrf.mxu0  ;;  %v3334_v60 = vsel %vm564_vm8, %v3322_v50, 0 }
 0x219   : > { %3354 = vmatpush1.bf16.msra.mxu0 %v3328_v48  ;;  %v1000_v51 = vadd.f32 %v953_v49, %v884_v33 }
 0x21a   : > { %v3318_v53 = vpop.permute.xlu1 %3317  ;;  %v992_v54 = vpop.f32.mrf.mxu1 }
 0x21b   : > { %v3430_v55 = vpop.permute.xlu0 %3429  ;;  %v3323_v56 = vsel %vm3319_vm2, %v3316_v40, %v3318_v53  ;;  %v1001_v57 = vadd.f32 %v992_v54, %v885_v31  ;;  %v955_v58 = vpop.f32.mrf.mxu0 }
 0x21c   : > { %4039 = vmatmul.mubr.msk.bf16.vlgmr.msra.gmra.mxu0 %vm560_vm9, %v537_v52  ;;  %4040 = vmatprep.subr.msk.bf16.mxu1 %vm564_vm8, %v3323_v56  ;;  %v994_v62 = vpop.f32.mrf.mxu1 }
 0x21d   : > { %3395 = vmatpush1.bf16.msra.mxu1 %v3334_v60  ;;  %v1002_v1 = vadd.f32 %v994_v62, %v886_v36  ;;  %v956_v2 = vpop.f32.mrf.mxu0  ;;  %3487 = vmatprep.mubr.bf16.mxu0 %v4179_v6 }
 0x21e   : > { %v3428_v3 = vpop.permute.xlu1 %3427  ;;  %v996_v4 = vpop.f32.mrf.mxu1 }
 0x21f   : > { %v3434_v5 = vpop.permute.xlu0 %3433  ;;  %v3436_v7 = vsel %vm3435_vm3, %v3426_v45, %v3428_v3  ;;  %v3437_v9 = vsel %vm3435_vm3, %v3428_v3, %v3430_v55  ;;  %v1067_v59 = vpop.f32.mrf.mxu0 }
 0x220   : > { %v3444_v10 = vsel %vm564_vm8, %v3436_v7, 0  ;;  %4041 = vmatmul.mubr.msk.bf16.vlgmr.msra.gmra.mxu1 %vm560_vm9, %v537_v52  ;;  %4042 = vmatprep.subr.msk.bf16.mxu0 %vm564_vm8, %v3437_v9  ;;  %v1115_v11 = vadd.f32 %v1067_v59, %v999_v47  ;;  %v997_v12 = vpop.f32.mrf.mxu1 }
 0x221   : > { %3470 = vmatpush1.bf16.msra.mxu0 %v3444_v10  ;;  %v1069_v13 = vpop.f32.mrf.mxu0  ;;  %3528 = vmatprep.mubr.bf16.mxu1 %v4179_v6 }
 0x222   : > { %v3432_v63 = vpop.permute.xlu1 %3431  ;;  %v1116_v14 = vadd.f32 %v1069_v13, %v1000_v51  ;;  %v1108_v15 = vpop.f32.mrf.mxu1 }
 0x223   : > { %v3438_v16 = vsel %vm3435_vm3, %v3430_v55, %v3432_v63  ;;  %v3439_v0 = vsel %vm3435_vm3, %v3432_v63, %v3434_v5  ;;  %v1117_v18 = vadd.f32 %v1108_v15, %v1001_v57  ;;  %v1071_v20 = vpop.f32.mrf.mxu0  ;;  %v3544_v24 = vpop.permute.xlu0 %3543 }
 0x224   : > { %v3450_v21 = vsel %vm564_vm8, %v3438_v16, 0  ;;  %4043 = vmatmul.mubr.msk.bf16.vlgmr.msra.gmra.mxu0 %vm560_vm9, %v538_v61  ;;  %4044 = vmatprep.subr.msk.bf16.mxu1 %vm564_vm8, %v3439_v0  ;;  %v1110_v22 = vpop.f32.mrf.mxu1 }
 0x225   : > { %3511 = vmatpush1.bf16.msra.mxu1 %v3450_v21  ;;  %v1118_v25 = vadd.f32 %v1110_v22, %v1002_v1  ;;  %v1072_v33 = vpop.f32.mrf.mxu0  ;;  %3603 = vmatprep.mubr.bf16.mxu0 %v4179_v6 }
 0x226   : > { %v3542_v26 = vpop.permute.xlu1 %3541  ;;  %v1112_v27 = vpop.f32.mrf.mxu1 }
 0x227   : > { %v3552_v29 = vsel %vm3551_vm4, %v3542_v26, %v3544_v24  ;;  %v3548_v37 = vpop.permute.xlu0 %3547 }
 0x228   : > { %4045 = vmatmul.mubr.msk.bf16.vlgmr.msra.gmra.mxu1 %vm560_vm9, %v538_v61  ;;  %v1113_v28 = vpop.f32.mrf.mxu1  ;;  %v3560_v38 = vsel %vm564_vm8, %v3552_v29, 0 }
 0x229   : > { %v1183_v31 = vpop.f32.mrf.mxu0  ;;  %3644 = vmatprep.mubr.bf16.mxu1 %v4179_v6 }
 0x22a   : > { %v1231_v32 = vadd.f32 %v1183_v31, %v1115_v11  ;;  %v3546_v34 = vpop.permute.xlu1 %3545 }
 0x22b   : > { %v3553_v35 = vsel %vm3551_vm4, %v3544_v24, %v3546_v34  ;;  %v1185_v36 = vpop.f32.mrf.mxu0  ;;  %v3554_v40 = vsel %vm3551_vm4, %v3546_v34, %v3548_v37 }
 0x22c   : > { %v1232_v39 = vadd.f32 %v1185_v36, %v1116_v14  ;;  %4046 = vmatprep.subr.msk.bf16.mxu0 %vm564_vm8, %v3553_v35  ;;  %v3566_v49 = vsel %vm564_vm8, %v3554_v40, 0 }
 0x22d   : > { %v1224_v41 = vpop.f32.mrf.mxu1  ;;  %v1187_v42 = vpop.f32.mrf.mxu0  ;;  %3586 = vmatpush1.bf16.msra.mxu0 %v3560_v38 }
 0x22e   : > { %v1233_v44 = vadd.f32 %v1224_v41, %v1117_v18  ;;  %v3550_v45 = vpop.permute.xlu1 %3549 }
 0x22f   : > { %v1226_v46 = vpop.f32.mrf.mxu1  ;;  %v3555_v47 = vsel %vm3551_vm4, %v3548_v37, %v3550_v45  ;;  %v1188_v48 = vpop.f32.mrf.mxu0 }
 0x230   : > { %v1234_v50 = vadd.f32 %v1226_v46, %v1118_v25  ;;  %4047 = vmatmul.mubr.msk.bf16.vlgmr.msra.gmra.mxu0 %vm560_vm9, %v539_v43  ;;  %4048 = vmatprep.subr.msk.bf16.mxu1 %vm564_vm8, %v3555_v47 }
 0x231   : > { %v1228_v51 = vpop.f32.mrf.mxu1  ;;  %v1299_v52 = vpop.f32.mrf.mxu0  ;;  %3627 = vmatpush1.bf16.msra.mxu1 %v3566_v49 }
 0x232   : > { %v1347_v53 = vadd.f32 %v1299_v52, %v1231_v32 }
 0x233   : > { %v1229_v54 = vpop.f32.mrf.mxu1  ;;  %v1301_v55 = vpop.f32.mrf.mxu0 }
 0x234   : > { %v1348_v56 = vadd.f32 %v1301_v55, %v1232_v39  ;;  %4049 = vmatmul.mubr.msk.bf16.vlgmr.msra.gmra.mxu1 %vm560_vm9, %v539_v43 }
 0x235   : > { %v1340_v57 = vpop.f32.mrf.mxu1  ;;  %v1303_v58 = vpop.f32.mrf.mxu0 }
 0x236   : > { %v1349_v60 = vadd.f32 %v1340_v57, %v1233_v44 }
 0x237   : > { %v1342_v62 = vpop.f32.mrf.mxu1  ;;  %v1304_v1 = vpop.f32.mrf.mxu0 }
 0x238   : > { %v1350_v2 = vadd.f32 %v1342_v62, %v1234_v50 }
 0x239   : > { %v1344_v3 = vpop.f32.mrf.mxu1 }
 0x23b   : > { %v1345_v4 = vpop.f32.mrf.mxu1 }
 0x23c   : > { %v1415_v5 = vpop.f32.mrf.mxu0 }
 0x23d   : > { %v1463_v7 = vadd.f32 %v1415_v5, %v1347_v53 }
 0x23e   : > { %v1417_v9 = vpop.f32.mrf.mxu0 }
 0x23f   : > { %v1464_v59 = vadd.f32 %v1417_v9, %v1348_v56 }
 0x240   : > { %v1419_v10 = vpop.f32.mrf.mxu0 }
 0x241   : > { %v1456_v11 = vpop.f32.mrf.mxu1 }
 0x242   : > { %v1465_v12 = vadd.f32 %v1456_v11, %v1349_v60  ;;  %v1420_v13 = vpop.f32.mrf.mxu0 }
 0x243   : > { %v1458_v61 = vpop.f32.mrf.mxu1 }
 0x244   : > { %v1466_v63 = vadd.f32 %v1458_v61, %v1350_v2 }
 0x245   : > { %v1460_v14 = vpop.f32.mrf.mxu1  ;;  %v1531_v15 = vpop.f32.mrf.mxu0 }
 0x246   : > { %v1579_v16 = vadd.f32 %v1531_v15, %v1463_v7 }
 0x247   : > { %v1461_v0 = vpop.f32.mrf.mxu1  ;;  %v1533_v18 = vpop.f32.mrf.mxu0 }
 0x248   : > { %v1580_v20 = vadd.f32 %v1533_v18, %v1464_v59 }
 0x249   : > { %v1572_v21 = vpop.f32.mrf.mxu1  ;;  %v1535_v22 = vpop.f32.mrf.mxu0 }
 0x24a   : > { %v1581_v24 = vadd.f32 %v1572_v21, %v1465_v12 }
 0x24b   : > { %v1574_v25 = vpop.f32.mrf.mxu1  ;;  %v1536_v33 = vpop.f32.mrf.mxu0 }
 0x24c   : > { %v1582_v26 = vadd.f32 %v1574_v25, %v1466_v63 }
 0x24d   : > { %v1576_v27 = vpop.f32.mrf.mxu1 }
 0x24f   : > { %v1577_v28 = vpop.f32.mrf.mxu1 }
 0x250   : > { %v1647_v29 = vpop.f32.mrf.mxu0 }
 0x251   : > { %v1695_v31 = vadd.f32 %v1647_v29, %v1579_v16 }
 0x252   : > { %v1649_v32 = vpop.f32.mrf.mxu0 }
 0x253   : > { %v1696_v34 = vadd.f32 %v1649_v32, %v1580_v20 }
 0x254   : > { %v1651_v35 = vpop.f32.mrf.mxu0 }
 0x255   : > { %v1688_v36 = vpop.f32.mrf.mxu1 }
 0x256   : > { %v1697_v37 = vadd.f32 %v1688_v36, %v1581_v24  ;;  %v1652_v38 = vpop.f32.mrf.mxu0 }
 0x257   : > { %v1690_v39 = vpop.f32.mrf.mxu1 }
 0x258   : > { %v1698_v40 = vadd.f32 %v1690_v39, %v1582_v26 }
 0x259   : > { %v1692_v41 = vpop.f32.mrf.mxu1  ;;  %v1763_v42 = vpop.f32.mrf.mxu0 }
 0x25a   : > { %v1811_v43 = vadd.f32 %v1763_v42, %v1695_v31 }
 0x25b   : > { %v1693_v44 = vpop.f32.mrf.mxu1  ;;  %v1765_v45 = vpop.f32.mrf.mxu0 }
 0x25c   : > { %v1812_v46 = vadd.f32 %v1765_v45, %v1696_v34 }
 0x25d   : > { %v1804_v47 = vpop.f32.mrf.mxu1  ;;  %v1767_v48 = vpop.f32.mrf.mxu0 }
 0x25e   : > { %v1813_v49 = vadd.f32 %v1804_v47, %v1697_v37 }
 0x25f   : > { %v1806_v50 = vpop.f32.mrf.mxu1  ;;  %v1768_v51 = vpop.f32.mrf.mxu0 }
 0x260   : > { %v1814_v52 = vadd.f32 %v1806_v50, %v1698_v40 }
 0x261   : > { %v1808_v53 = vpop.f32.mrf.mxu1 }
 0x263   : > { %v1809_v54 = vpop.f32.mrf.mxu1 }
 0x264   : > { %v1879_v55 = vpop.f32.mrf.mxu0 }
 0x265   : > { %v1927_v56 = vadd.f32 %v1879_v55, %v1811_v43 }
 0x266   : > { %v1881_v57 = vpop.f32.mrf.mxu0 }
 0x267   : > { %v1928_v58 = vadd.f32 %v1881_v57, %v1812_v46 }
 0x268   : > { %v1883_v60 = vpop.f32.mrf.mxu0 }
 0x269   : > { %v1920_v62 = vpop.f32.mrf.mxu1 }
 0x26a   : > { %v1929_v1 = vadd.f32 %v1920_v62, %v1813_v49  ;;  %v1884_v2 = vpop.f32.mrf.mxu0 }
 0x26b   : > { %v1922_v3 = vpop.f32.mrf.mxu1 }
 0x26c   : > { %v1930_v4 = vadd.f32 %v1922_v3, %v1814_v52 }
 0x26d   : > { %v1924_v5 = vpop.f32.mrf.mxu1  ;;  %v1995_v7 = vpop.f32.mrf.mxu0 }
 0x26e   : > { %v2043_v9 = vadd.f32 %v1995_v7, %v1927_v56 }
 0x26f   : > { %v1925_v59 = vpop.f32.mrf.mxu1  ;;  %v1997_v10 = vpop.f32.mrf.mxu0 }
 0x270   : > { %v2044_v11 = vadd.f32 %v1997_v10, %v1928_v58 }
 0x271   : > { %v1999_v12 = vpop.f32.mrf.mxu0  ;;  %v2036_v13 = vpop.f32.mrf.mxu1 }
 0x272   : > { %v2045_v61 = vadd.f32 %v2036_v13, %v1929_v1 }
 0x273   : > { %v2000_v63 = vpop.f32.mrf.mxu0  ;;  %v2038_v14 = vpop.f32.mrf.mxu1 }
 0x274   : > { %v2046_v15 = vadd.f32 %v2038_v14, %v1930_v4 }
 0x275   : > { %v2040_v16 = vpop.f32.mrf.mxu1  ;;  %v2096_v0 = vpop.f32.mrf.mxu0 }
 0x276   : > { %v2144_v18 = vadd.f32 %v2096_v0, %v2043_v9 }
 0x277   : > { %v2041_v20 = vpop.f32.mrf.mxu1  ;;  %v2098_v21 = vpop.f32.mrf.mxu0 }
 0x278   : > { %v2145_v22 = vadd.f32 %v2098_v21, %v2044_v11 }
 0x279   : > { %v2100_v24 = vpop.f32.mrf.mxu0  ;;  %v2137_v25 = vpop.f32.mrf.mxu1 }
 0x27a   : > { %v2146_v33 = vadd.f32 %v2137_v25, %v2045_v61 }
 0x27b   : > { %v2101_v26 = vpop.f32.mrf.mxu0  ;;  %v2139_v27 = vpop.f32.mrf.mxu1 }
 0x27c   : > { %v2147_v28 = vadd.f32 %v2139_v27, %v2046_v15 }
 0x27d   : > { %v2141_v29 = vpop.f32.mrf.mxu1  ;;  %v2213_v31 = vpop.f32.mrf.mxu0 }
 0x27e   : > { %v2261_v32 = vadd.f32 %v2213_v31, %v2144_v18 }
 0x27f   : > { %v2142_v34 = vpop.f32.mrf.mxu1  ;;  %v2215_v35 = vpop.f32.mrf.mxu0 }
 0x280   : > { %v2262_v36 = vadd.f32 %v2215_v35, %v2145_v22 }
 0x281   : > { %v2217_v37 = vpop.f32.mrf.mxu0  ;;  %v2254_v38 = vpop.f32.mrf.mxu1 }
 0x282   : > { %v2263_v39 = vadd.f32 %v2254_v38, %v2146_v33 }
 0x283   : > { %v2218_v40 = vpop.f32.mrf.mxu0  ;;  %v2256_v41 = vpop.f32.mrf.mxu1 }
 0x284   : > { %v2264_v42 = vadd.f32 %v2256_v41, %v2147_v28 }
 0x285   : > { %v2258_v43 = vpop.f32.mrf.mxu1  ;;  %v2329_v44 = vpop.f32.mrf.mxu0 }
 0x286   : > { %v2377_v45 = vadd.f32 %v2329_v44, %v2261_v32 }
 0x287   : > { %v2259_v46 = vpop.f32.mrf.mxu1  ;;  %v2331_v47 = vpop.f32.mrf.mxu0 }
 0x288   : > { %v2378_v48 = vadd.f32 %v2331_v47, %v2262_v36 }
 0x289   : > { %v2333_v49 = vpop.f32.mrf.mxu0  ;;  %v2370_v50 = vpop.f32.mrf.mxu1 }
 0x28a   : > { %v2379_v51 = vadd.f32 %v2370_v50, %v2263_v39 }
 0x28b   : > { %v2334_v52 = vpop.f32.mrf.mxu0  ;;  %v2372_v53 = vpop.f32.mrf.mxu1 }
 0x28c   : > { %v2380_v54 = vadd.f32 %v2372_v53, %v2264_v42 }
 0x28d   : > { %v2374_v55 = vpop.f32.mrf.mxu1  ;;  %v2445_v56 = vpop.f32.mrf.mxu0 }
 0x28e   : > { %v2493_v57 = vadd.f32 %v2445_v56, %v2377_v45 }
 0x28f   : > { %v2375_v58 = vpop.f32.mrf.mxu1  ;;  %v2447_v60 = vpop.f32.mrf.mxu0 }
 0x290   : > { %v2494_v62 = vadd.f32 %v2447_v60, %v2378_v48 }
 0x291   : > { %v2449_v1 = vpop.f32.mrf.mxu0  ;;  %v2486_v2 = vpop.f32.mrf.mxu1 }
 0x292   : > { %v2495_v3 = vadd.f32 %v2486_v2, %v2379_v51 }
 0x293   : > { %v2450_v4 = vpop.f32.mrf.mxu0  ;;  %v2488_v5 = vpop.f32.mrf.mxu1 }
 0x294   : > { %v2496_v7 = vadd.f32 %v2488_v5, %v2380_v54 }
 0x295   : > { %v2490_v9 = vpop.f32.mrf.mxu1  ;;  %v2561_v59 = vpop.f32.mrf.mxu0 }
 0x296   : > { %v2609_v10 = vadd.f32 %v2561_v59, %v2493_v57 }
 0x297   : > { %v2491_v11 = vpop.f32.mrf.mxu1  ;;  %v2563_v12 = vpop.f32.mrf.mxu0 }
 0x298   : > { %v2610_v13 = vadd.f32 %v2563_v12, %v2494_v62 }
 0x299   : > { %v2602_v61 = vpop.f32.mrf.mxu1  ;;  %v2565_v63 = vpop.f32.mrf.mxu0 }
 0x29a   : > { %v2611_v14 = vadd.f32 %v2602_v61, %v2495_v3 }
 0x29b   : > { %v2604_v15 = vpop.f32.mrf.mxu1  ;;  %v2566_v16 = vpop.f32.mrf.mxu0 }
 0x29c   : > { %v2612_v0 = vadd.f32 %v2604_v15, %v2496_v7 }
 0x29d   : > { %v2606_v18 = vpop.f32.mrf.mxu1 }
 0x29f   : > { %v2607_v20 = vpop.f32.mrf.mxu1 }
 0x2a0   : > { %v2677_v21 = vpop.f32.mrf.mxu0 }
 0x2a1   : > { %v2725_v22 = vadd.f32 %v2677_v21, %v2609_v10 }
 0x2a2   : > { %v2679_v24 = vpop.f32.mrf.mxu0 }
 0x2a3   : > { %v2726_v25 = vadd.f32 %v2679_v24, %v2610_v13  ;;  %v4136_v24 = vld [vmem:[%s4289_s17] sm:$0x3f] }
 0x2a4   : > { %v2681_v33 = vpop.f32.mrf.mxu0  ;;  %v2718_v26 = vpop.f32.mrf.mxu1 }
 0x2a5   : > { %v2727_v27 = vadd.f32 %v2718_v26, %v2611_v14  ;;  %v3658_v33 = vrot.slane %v4136_v24, 1 }
 0x2a6   : > { %v2682_v28 = vpop.f32.mrf.mxu0  ;;  %v2720_v29 = vpop.f32.mrf.mxu1 }
 0x2a7   : > { %v4951_v31 = vadd.f32 %v2720_v29, %v2612_v0  ;;  %vm3660_vm8 = vcmp.gt.f32.partialorder %v3658_v33, 0.5 }
 0x2a8   : > { %v2722_v32 = vpop.f32.mrf.mxu1  ;;  %v2793_v34 = vpop.f32.mrf.mxu0 }
 0x2a9   : > { %v2841_v21 = vadd.f32 %v2793_v34, %v2725_v22 }
 0x2aa   : > { %v2723_v35 = vpop.f32.mrf.mxu1  ;;  %v2795_v36 = vpop.f32.mrf.mxu0 }
 0x2ab   : > { %v2842_v29 = vadd.f32 %v2795_v36, %v2726_v25 }
 0x2ac   : > { %v2834_v37 = vpop.f32.mrf.mxu1  ;;  %v2797_v38 = vpop.f32.mrf.mxu0 }
 0x2ae   : > { %v2836_v39 = vpop.f32.mrf.mxu1  ;;  %v2798_v40 = vpop.f32.mrf.mxu0 }
 0x2af   : > { %v2843_v40 = vadd.f32 %v2834_v37, %v2727_v27 }
 0x2b0   : > { %v2838_v41 = vpop.f32.mrf.mxu1 }
 0x2b2   : > { %v2839_v42 = vpop.f32.mrf.mxu1 }
 0x2b4   : > { %v2909_v43 = vpop.f32.mrf.mxu0 }
 0x2b5   : > { %v2957_v32 = vadd.f32 %v2909_v43, %v2841_v21 }
 0x2b6   : > { %v2911_v44 = vpop.f32.mrf.mxu0 }
 0x2b7   : > { %v2958_v41 = vadd.f32 %v2911_v44, %v2842_v29 }
 0x2b8   : > { %v2913_v45 = vpop.f32.mrf.mxu0  ;;  %v2950_v46 = vpop.f32.mrf.mxu1 }
 0x2ba   : > { %v2914_v47 = vpop.f32.mrf.mxu0  ;;  %v2952_v48 = vpop.f32.mrf.mxu1 }
 0x2bc   : > { %v2954_v49 = vpop.f32.mrf.mxu1  ;;  %v3025_v50 = vpop.f32.mrf.mxu0 }
 0x2bd   : > { %v3073_v42 = vadd.f32 %v3025_v50, %v2957_v32  ;;  %v2844_v49 = vadd.f32 %v2836_v39, %v4951_v31 }
 0x2be   : > { %v2955_v51 = vpop.f32.mrf.mxu1  ;;  %v3027_v52 = vpop.f32.mrf.mxu0 }
 0x2bf   : > { %v2959_v51 = vadd.f32 %v2950_v46, %v2843_v40 }
 0x2c0   : > { %v3066_v53 = vpop.f32.mrf.mxu1  ;;  %v3029_v54 = vpop.f32.mrf.mxu0 }
 0x2c1   : > { %v3074_v54 = vadd.f32 %v3027_v52, %v2958_v41  ;;  %v3075_v25 = vadd.f32 %v3066_v53, %v2959_v51 }
 0x2c2   : > { %v3068_v55 = vpop.f32.mrf.mxu1  ;;  %v3030_v56 = vpop.f32.mrf.mxu0 }
 0x2c4   : > { %v3070_v57 = vpop.f32.mrf.mxu1 }
 0x2c5   : > { %v3661_v57 = vsel %vm3660_vm8, 1, %v4179_v6 }
 0x2c6   : > { %v3071_v58 = vpop.f32.mrf.mxu1  ;;  %v3669_v39 = vrot.slane %v3661_v57, %v477_v23 }
 0x2c7   : > { %v2960_v58 = vadd.f32 %v2952_v48, %v2844_v49 }
 0x2c8   : > { %v3141_v60 = vpop.f32.mrf.mxu0  ;;  %vm3679_vm5 = vcmp.eq.s32.totalorder %v3669_v39, 1 }
 0x2c9   : > { %v3189_v56 = vadd.f32 %v3141_v60, %v3073_v42  ;;  %v3076_v27 = vadd.f32 %v3068_v55, %v2960_v58 }
 0x2ca   : > { %v3143_v62 = vpop.f32.mrf.mxu0 }
 0x2cb   : > { %v3190_v36 = vadd.f32 %v3143_v62, %v3074_v54 }
 0x2cc   : > { %v3145_v1 = vpop.f32.mrf.mxu0  ;;  %v3182_v2 = vpop.f32.mrf.mxu1 }
 0x2cd   : > { %v3191_v37 = vadd.f32 %v3182_v2, %v3075_v25  ;;  %v3673_v2 = vrot.slane %v3661_v57, %v481_v19 }
 0x2ce   : > { %v3146_v3 = vpop.f32.mrf.mxu0  ;;  %v3184_v4 = vpop.f32.mrf.mxu1 }
 0x2cf   : > { %v3665_v3 = vrot.slane %v3661_v57, %v473_v17  ;;  %v3192_v46 = vadd.f32 %v3184_v4, %v3076_v27  ;;  %v3677_v17 = vrot.slane %v3661_v57, %v485_v30  ;;  %vm3680_vm6 = vcmp.eq.s32.totalorder %v3673_v2, 1 }
 0x2d0   : > { %v3186_v5 = vpop.f32.mrf.mxu1  ;;  %v3257_v7 = vpop.f32.mrf.mxu0 }
 0x2d1   : > { %v3305_v43 = vadd.f32 %v3257_v7, %v3189_v56  ;;  %vm3678_vm9 = vcmp.eq.s32.totalorder %v3665_v3, 1  ;;  %vm3681_vm7 = vcmp.eq.s32.totalorder %v3677_v17, 1 }
 0x2d2   : > { %v3187_v9 = vpop.f32.mrf.mxu1  ;;  %v3259_v59 = vpop.f32.mrf.mxu0 }
 0x2d3   : > { %v3306_v44 = vadd.f32 %v3259_v59, %v3190_v36 }
 0x2d4   : > { %v3298_v10 = vpop.f32.mrf.mxu1  ;;  %v3261_v11 = vpop.f32.mrf.mxu0 }
 0x2d5   : > { %v3307_v52 = vadd.f32 %v3298_v10, %v3191_v37 }
 0x2d6   : > { %v3300_v12 = vpop.f32.mrf.mxu1  ;;  %v3262_v13 = vpop.f32.mrf.mxu0 }
 0x2d7   : > { %v3308_v53 = vadd.f32 %v3300_v12, %v3192_v46 }
 0x2d8   : > { %v3302_v61 = vpop.f32.mrf.mxu1 }
 0x2da   : > { %v3303_v63 = vpop.f32.mrf.mxu1 }
 0x2dc   : > { %v3373_v14 = vpop.f32.mrf.mxu0 }
 0x2dd   : > { %v3421_v50 = vadd.f32 %v3373_v14, %v3305_v43 }
 0x2de   : > { %v3375_v15 = vpop.f32.mrf.mxu0 }
 0x2df   : > { %v3422_v60 = vadd.f32 %v3375_v15, %v3306_v44 }
 0x2e0   : > { %v3377_v16 = vpop.f32.mrf.mxu0  ;;  %v3414_v0 = vpop.f32.mrf.mxu1 }
 0x2e1   : > { %v3423_v62 = vadd.f32 %v3414_v0, %v3307_v52 }
 0x2e2   : > { %v3378_v18 = vpop.f32.mrf.mxu0  ;;  %v3416_v20 = vpop.f32.mrf.mxu1 }
 0x2e3   : > { %v3424_v23 = vadd.f32 %v3416_v20, %v3308_v53 }
 0x2e4   : > { %v3418_v26 = vpop.f32.mrf.mxu1  ;;  %v3489_v28 = vpop.f32.mrf.mxu0 }
 0x2e5   : > { %v3537_v6 = vadd.f32 %v3489_v28, %v3421_v50 }
 0x2e6   : > { %v3419_v35 = vpop.f32.mrf.mxu1  ;;  %v3491_v38 = vpop.f32.mrf.mxu0 }
 0x2e7   : > { %v3538_v5 = vadd.f32 %v3491_v38, %v3422_v60 }
 0x2e8   : > { %v3530_v45 = vpop.f32.mrf.mxu1  ;;  %v3493_v47 = vpop.f32.mrf.mxu0 }
 0x2e9   : > { %v3539_v4 = vadd.f32 %v3530_v45, %v3423_v62 }
 0x2ea   : > { %v3532_v22 = vpop.f32.mrf.mxu1  ;;  %v3494_v34 = vpop.f32.mrf.mxu0 }
 0x2eb   : > { %v3540_v11 = vadd.f32 %v3532_v22, %v3424_v23 }
 0x2ec   : > { %v3534_v1 = vpop.f32.mrf.mxu1 }
 0x2ee   : > { %v3535_v31 = vpop.f32.mrf.mxu1 }
 0x2f0   : > { %v3605_v48 = vpop.f32.mrf.mxu0 }
 0x2f1   : > { %v3653_v7 = vadd.f32 %v3605_v48, %v3537_v6 }
 0x2f2   : > { %v3607_v55 = vpop.f32.mrf.mxu0 }
 0x2f3   : > { %v3654_v9 = vadd.f32 %v3607_v55, %v3538_v5  ;;  %v3682_v12 = vsel %vm3678_vm9, %v3653_v7, 0.0 }
 0x2f4   : > { %v3646_v59 = vpop.f32.mrf.mxu1  ;;  %v3609_v10 = vpop.f32.mrf.mxu0 }
 0x2f5   : > { %v3683_v13 = vsel %vm3679_vm5, %v3654_v9, 0.0  ;;  %v3655_v61 = vadd.f32 %v3646_v59, %v3539_v4 }
 0x2f6   : > { %v4064_v63 = vpack.c.bf16 %v3683_v13, %v3682_v12  ;;  %v3648_v14 = vpop.f32.mrf.mxu1  ;;  %v3610_v15 = vpop.f32.mrf.mxu0 }
 0x2f7   : > { %v3656_v19 = vadd.f32 %v3648_v14, %v3540_v11  ;;  %v3684_v30 = vsel %vm3680_vm6, %v3655_v61, 0.0 }
 0x2f8   : > { %3702 = vst [vmem:[%s4305_s15] sm:$0xff] %v4064_v63  ;;  %v3650_v8 = vpop.f32.mrf.mxu1  ;;  %3706 = sbr.rel (%p3929_p8) target bundleno = 767 (0x2ff), region = 116 }
 0x2f9   : > { %v3685_v16 = vsel %vm3681_vm7, %v3656_v19, 0.0 }
 0x2fa   : > { %v4065_v0 = vpack.c.bf16 %v3685_v16, %v3684_v30  ;;  %v3651_v18 = vpop.f32.mrf.mxu1 }
 0x2fc   : > { %3703 = vst [vmem:[%s4305_s15 + $0x8] sm:$0xff] %v4065_v0 }
 0x2fd   : > { %v4206_v20 = vmov 0.0  }
 0x2fe   : > { %3707 = vst [vmem:[%s4294_s20] sm:$0xff] %v4206_v20  ;;  %3708 = vst [vmem:[%s4299_s23] sm:$0xff] %v4206_v20 }
 0x2ff PF: > { %v3712_v21 = vadd.f32 %v3683_v13, %v3682_v12  ;;  %v3710_v24 = vmul.f32 %v3682_v12, %v3682_v12  ;;  %v3713_v33 = vmul.f32 %v3683_v13, %v3683_v13  ;;  %v3716_v26 = vmul.f32 %v3684_v30, %v3684_v30 }
 0x300   : > { %v3719_v32 = vmul.f32 %v3685_v16, %v3685_v16 }
 0x301   : > { %v3715_v28 = vadd.f32 %v3712_v21, %v3684_v30  ;;  %v3714_v29 = vadd.f32 %v3713_v33, %v3710_v24 }
 0x303   : > { %v3718_v38 = vadd.f32 %v3715_v28, %v3685_v16  ;;  %v3717_v40 = vadd.f32 %v3716_v26, %v3714_v29 }
 0x305   : > { %v3721_v35 = vld [vmem:[%s4294_s20] sm:$0xff]  ;;  %v3720_v45 = vadd.f32 %v3719_v32, %v3717_v40 }
 0x306   : > { %v3724_v41 = vld [vmem:[%s4299_s23] sm:$0xff]  ;;  %v3722_v42 = vadd.f32 %v3721_v35, %v3718_v38 }
 0x307   : > { %v3725_v47 = vadd.f32 %v3724_v41, %v3720_v45 }
 0x308   : > { %3723 = vst [vmem:[%s4294_s20] sm:$0xff] %v3722_v42 }
 0x309   : > { %3726 = vst [vmem:[%s4299_s23] sm:$0xff] %v3725_v47 }
 0x30a PF: > { %s18_s28 = sadd.s32 1, %s4177_s28   ;;  %s5001_s17 = sld [smem:[#allocation7_spill]] }
 0x30b   : > { %p15_p10 = scmp.ge.s32.totalorder %s18_s28, 6   ;;  %s5002_s15 = sld [smem:[#allocation8_spill]] }
 0x30c   : > { %s5003_s24 = smov %s4169_s26  ;;  %s5004_s25 = smov %s4173_s27 }
 0x30d   :  { %17 = sbr.rel (!%p15_p10) target bundleno = 3 (0x3), region = 193 }
 0x310   : > { %s5005_s26 = smov %s5001_s17 }
 0x311   : > { %s5006_s27 = smov %s5002_s15 }
 0x312   :  { %3788 = vsyncmov [#allocation3] }
 0x315   :  { %s3789_s20 = vpop.sfrf %3788 }
 0x316   :  { %p4055_p11 = scmp.ne.s32.totalorder %s3789_s20, 0 }
 0x318   :  { %3793 = shalt.err (%p4055_p11)  }
 0x319   :  { %3795 = vsyncmov [#allocation3 + $0x1] }
 0x31c   :  { %s3796_s23 = vpop.sfrf %3795 }
 0x31d   :  { %p4056_p12 = scmp.ne.s32.totalorder %s3796_s23, 0 }
 0x31f   :  { %3800 = shalt.err (%p4056_p12)  }

</bundles_post_ra>
